<compile_context>
chip_gen: v5e
topology: v5e:2x2
jax: 0.10.0
libtpu: 0.0.40
codegen_flags: <defaults>
</compile_context>

<pallas_src>
import jax
import jax.numpy as jnp
from jax import lax
from jax.experimental import pallas as pl
from jax.experimental.pallas import tpu as pltpu

# ---- small config consistent with the module (scaled down) ----
VOCAB_SIZE = 128
N_EMBD     = 128
N_HEAD     = 4           # head_size = 32
N_LAYER    = 2
BLOCK_SIZE = 128         # T (lane-width aligned)
BATCH      = 2
LN_EPS     = 1e-5


def _layernorm(h, g, b):
    mu = jnp.mean(h, axis=-1, keepdims=True)
    var = jnp.mean(jnp.square(h - mu), axis=-1, keepdims=True)
    return (h - mu) * lax.rsqrt(var + LN_EPS) * g + b


def gpt_stack_kernel(x_ref, small_ref, wqkv_ref, wo_ref, w1_ref, b1_ref, w2_ref,
                     lnfg_ref, lnfb_ref, wlm_ref, blm_ref,
                     logits_ref,
                     x_acc_ref):
    l = pl.program_id(1)
    last = pl.num_programs(1) - 1

    # Load the embedded input into the resident residual-stream scratch once per batch row.
    @pl.when(l == 0)
    def _():
        x_acc_ref[...] = x_ref[0]

    x = x_acc_ref[...]                       # (T, C) f32
    T, C = x.shape
    hs = C // N_HEAD
    scale = float(hs) ** -0.5

    # packed small per-layer params: rows [ln1_g, ln1_b, bo, ln2_g, ln2_b, b2, pad, pad]
    sm = small_ref[0]                        # (8, C) f32
    ln1_g, ln1_b = sm[0:1], sm[1:2]
    bo           = sm[2:3]
    ln2_g, ln2_b = sm[3:4], sm[4:5]
    b2           = sm[5:6]

    # causal mask generated in-kernel (tril equivalent)
    row = lax.broadcasted_iota(jnp.int32, (T, T), 0)
    col = lax.broadcasted_iota(jnp.int32, (T, T), 1)
    causal = col <= row

    # ---------------- self-attention on LN1(x) ----------------
    h = _layernorm(x, ln1_g, ln1_b).astype(jnp.bfloat16)
    qkv = jnp.dot(h, wqkv_ref[0], preferred_element_type=jnp.float32)   # (T, 3C) f32

    qb = (qkv[:, 0:C] * scale).astype(jnp.bfloat16)     # scale folded into q
    kb = qkv[:, C:2 * C].astype(jnp.bfloat16)
    vb = qkv[:, 2 * C:3 * C].astype(jnp.bfloat16)
    wo_full = wo_ref[0]                                  # (C, C) bf16

    sa = jnp.zeros((T, C), jnp.float32)
    for hd in range(N_HEAD):                             # static loop, fused per head
        lo = hd * hs
        qh = qb[:, lo:lo + hs]                           # (T, hs)
        kh = kb[:, lo:lo + hs]
        vh = vb[:, lo:lo + hs]

        wei = jnp.einsum('td,sd->ts', qh, kh,
                         preferred_element_type=jnp.float32)            # (T, T)
        wei = jnp.where(causal, wei, -1e30)
        m = jnp.max(wei, axis=-1, keepdims=True)
        p = jnp.exp(wei - m)
        p = p * pl.reciprocal(jnp.sum(p, axis=-1, keepdims=True), approx=True)

        att = jnp.dot(p.astype(jnp.bfloat16), vh,
                      preferred_element_type=jnp.float32)                # (T, hs)
        # att @ Wo == sum_h att_h @ Wo[h*hs:(h+1)*hs, :]  -> no concatenate needed
        sa = sa + jnp.dot(att.astype(jnp.bfloat16), wo_full[lo:lo + hs, :],
                          preferred_element_type=jnp.float32)            # (T, C)

    x = x + sa + bo

    # ---------------- feed-forward on LN2(x) ----------------
    h2 = _layernorm(x, ln2_g, ln2_b).astype(jnp.bfloat16)
    ff = jnp.dot(h2, w1_ref[0], preferred_element_type=jnp.float32) + b1_ref[0]
    ff = jnp.maximum(ff, 0.0).astype(jnp.bfloat16)
    ff = jnp.dot(ff, w2_ref[0], preferred_element_type=jnp.float32) + b2
    x = x + ff

    x_acc_ref[...] = x

    # ---------------- fused final LN + lm_head on the last layer ----------------
    @pl.when(l == last)
    def _():
        hf = _layernorm(x, lnfg_ref[...], lnfb_ref[...]).astype(jnp.bfloat16)
        logits_ref[0] = (jnp.dot(hf, wlm_ref[...], preferred_element_type=jnp.float32)
                         + blm_ref[...])


def run_gpt_stack(x, blocks, lnf_g, lnf_b, w_lm, b_lm):
    B, T, C = x.shape
    L = blocks["wqkv"].shape[0]
    V = w_lm.shape[-1]

    def const_spec(shape):
        # whole array, constant block index -> loaded once, resident across the grid
        return pl.BlockSpec(shape, lambda b, l, _n=len(shape): (0,) * _n)

    def layer_spec(shape):
        # stacked per-layer weights: leading dim indexed by the layer grid axis
        return pl.BlockSpec((1,) + shape[1:],
                            lambda b, l, _n=len(shape): (l,) + (0,) * (_n - 1))

    x_spec = pl.BlockSpec((1, T, C), lambda b, l: (b, 0, 0))
    out_spec = pl.BlockSpec((1, T, V), lambda b, l: (b, 0, 0))

    layer_ws = (blocks["small"], blocks["wqkv"], blocks["wo"],
                blocks["w1"], blocks["b1"], blocks["w2"])
    final_ws = (lnf_g, lnf_b, w_lm, b_lm)

    in_specs = ([x_spec]
                + [layer_spec(w.shape) for w in layer_ws]
                + [const_spec(w.shape) for w in final_ws])

    return pl.pallas_call(
        gpt_stack_kernel,
        out_shape=jax.ShapeDtypeStruct((B, T, V), jnp.float32),
        grid=(B, L),
        in_specs=in_specs,
        out_specs=out_spec,
        scratch_shapes=[pltpu.VMEM((T, C), jnp.float32)],
        compiler_params=pltpu.CompilerParams(
            dimension_semantics=("parallel", "arbitrary")),
    )(x, *layer_ws, *final_ws)


def init_params(key):
    """Deterministic init mirroring PyTorch _init_weights: Linear/Embedding ~ N(0, 0.02),
    zero biases, LayerNorm gamma=1/beta=0. MXU weights stored in bf16."""
    C, V, T, L = N_EMBD, VOCAB_SIZE, BLOCK_SIZE, N_LAYER

    def nrm(k, shape):
        return 0.02 * jax.random.normal(k, shape, dtype=jnp.float32)

    keys = jax.random.split(key, 8)

    # packed per-layer small vectors: [ln1_g, ln1_b, bo, ln2_g, ln2_b, b2, pad, pad]
    small = jnp.zeros((L, 8, C), jnp.float32)
    small = small.at[:, 0, :].set(1.0)       # ln1 gamma
    small = small.at[:, 3, :].set(1.0)       # ln2 gamma

    params = {
        "tok_emb": nrm(keys[0], (V, C)),
        "pos_emb": nrm(keys[1], (T, C)),
        "lnf_g": jnp.ones((1, C), jnp.float32),
        "lnf_b": jnp.zeros((1, C), jnp.float32),
        "w_lm": nrm(keys[2], (C, V)).astype(jnp.bfloat16),      # (in, out) for x @ W
        "b_lm": jnp.zeros((1, V), jnp.float32),
        "blocks": {
            "small": small,
            # fused per-head K/Q/V Linears (C -> hs, no bias): [Q | K | V] along out dim
            "wqkv": nrm(keys[3], (L, C, 3 * C)).astype(jnp.bfloat16),
            "wo": nrm(keys[4], (L, C, C)).astype(jnp.bfloat16),
            "w1": nrm(keys[5], (L, C, 4 * C)).astype(jnp.bfloat16),
            "b1": jnp.zeros((L, 1, 4 * C), jnp.float32),
            "w2": nrm(keys[6], (L, 4 * C, C)).astype(jnp.bfloat16),
        },
    }
    return params


@jax.jit
def gpt_forward(params, idx):
    """idx: int32 [B, T] token ids -> logits float32 [B, T, VOCAB_SIZE]."""
    B, T = idx.shape
    tok_emb = jnp.take(params["tok_emb"], idx, axis=0)            # (B, T, C) — XLA glue
    x = tok_emb + params["pos_emb"][:T][None, :, :]
    return run_gpt_stack(x,
                         params["blocks"],
                         params["lnf_g"], params["lnf_b"],
                         params["w_lm"], params["b_lm"])


if __name__ == "__main__":
    key = jax.random.PRNGKey(0)
    pkey, ikey = jax.random.split(key)
    params = init_params(pkey)
    idx = jax.random.randint(ikey, (BATCH, BLOCK_SIZE), 0, VOCAB_SIZE, dtype=jnp.int32)

    logits = gpt_forward(params, idx)
    jax.block_until_ready(logits)

    assert logits.shape == (BATCH, BLOCK_SIZE, VOCAB_SIZE)
    assert bool(jnp.all(jnp.isfinite(logits)))
    print("KERNEL_OK")
</pallas_src>

<mosaic_0001>
module attributes {stable_mosaic.version = 11 : i64} {
  func.func @gpt_stack_kernel(%arg0: i32, %arg1: i32, %arg2: memref<1x128x128xf32, #tpu.memory_space<vmem>>, %arg3: memref<1x8x128xf32, #tpu.memory_space<vmem>>, %arg4: memref<1x128x384xbf16, #tpu.memory_space<vmem>>, %arg5: memref<1x128x128xbf16, #tpu.memory_space<vmem>>, %arg6: memref<1x128x512xbf16, #tpu.memory_space<vmem>>, %arg7: memref<1x1x512xf32, #tpu.memory_space<vmem>>, %arg8: memref<1x512x128xbf16, #tpu.memory_space<vmem>>, %arg9: memref<1x128xf32, #tpu.memory_space<vmem>>, %arg10: memref<1x128xf32, #tpu.memory_space<vmem>>, %arg11: memref<128x128xbf16, #tpu.memory_space<vmem>>, %arg12: memref<1x128xf32, #tpu.memory_space<vmem>>, %arg13: memref<1x128x128xf32, #tpu.memory_space<vmem>>, %arg14: memref<128x128xf32, #tpu.memory_space<vmem>>) attributes {dimension_semantics = [#tpu.dimension_semantics<parallel>, #tpu.dimension_semantics<arbitrary>], iteration_bounds = array<i64: 2, 2>, scalar_prefetch = 0 : i64, scratch_operands = 1 : i64, tpu.core_type = #tpu.core_type<tc>, window_params = [{transform_indices = @transform_0, window_bounds = array<i64: 1, 128, 128>}, {transform_indices = @transform_1, window_bounds = array<i64: 1, 8, 128>}, {transform_indices = @transform_2, window_bounds = array<i64: 1, 128, 384>}, {transform_indices = @transform_3, window_bounds = array<i64: 1, 128, 128>}, {transform_indices = @transform_4, window_bounds = array<i64: 1, 128, 512>}, {transform_indices = @transform_5, window_bounds = array<i64: 1, 1, 512>}, {transform_indices = @transform_6, window_bounds = array<i64: 1, 512, 128>}, {pipeline_mode = #tpu.pipeline_mode<synchronous>, transform_indices = @transform_7, window_bounds = array<i64: 1, 128>}, {pipeline_mode = #tpu.pipeline_mode<synchronous>, transform_indices = @transform_8, window_bounds = array<i64: 1, 128>}, {pipeline_mode = #tpu.pipeline_mode<synchronous>, transform_indices = @transform_9, window_bounds = array<i64: 128, 128>}, {pipeline_mode = #tpu.pipeline_mode<synchronous>, transform_indices = @transform_10, window_bounds = array<i64: 1, 128>}, {transform_indices = @transform_11, window_bounds = array<i64: 1, 128, 128>}]} {
    %c0_i32 = arith.constant 0 : i32
    %0 = arith.cmpi eq, %arg1, %c0_i32 : i32
    %1 = arith.extui %0 : i1 to i32
    %c0_i32_0 = arith.constant 0 : i32
    %2 = arith.cmpi ne, %1, %c0_i32_0 : i32
    scf.if %2 {
      %c0_62 = arith.constant 0 : index
      %c0_63 = arith.constant 0 : index
      %c0_64 = arith.constant 0 : index
      %186 = vector.load %arg2[%c0_62, %c0_63, %c0_64] : memref<1x128x128xf32, #tpu.memory_space<vmem>>, vector<1x128x128xf32>
      %187 = vector.shape_cast %186 : vector<1x128x128xf32> to vector<128x128xf32>
      %c0_65 = arith.constant 0 : index
      %c0_66 = arith.constant 0 : index
      %188 = vector.load %arg14[%c0_65, %c0_66] : memref<128x128xf32, #tpu.memory_space<vmem>>, vector<128x128xf32>
      tpu.vector_store %arg14[%c0_65, %c0_66], %187 {strides = array<i32>} : memref<128x128xf32, #tpu.memory_space<vmem>>, vector<128x128xf32>,
    } else {
    }
    %c0 = arith.constant 0 : index
    %c0_1 = arith.constant 0 : index
    %3 = vector.load %arg14[%c0, %c0_1] : memref<128x128xf32, #tpu.memory_space<vmem>>, vector<128x128xf32>
    %c0_2 = arith.constant 0 : index
    %c0_3 = arith.constant 0 : index
    %c0_4 = arith.constant 0 : index
    %4 = vector.load %arg3[%c0_2, %c0_3, %c0_4] : memref<1x8x128xf32, #tpu.memory_space<vmem>>, vector<1x8x128xf32>
    %5 = vector.shape_cast %4 : vector<1x8x128xf32> to vector<8x128xf32>
    %6 = vector.extract_strided_slice %5 {offsets = [0, 0], sizes = [1, 128], strides = [1, 1]} : vector<8x128xf32> to vector<1x128xf32>
    %7 = vector.extract_strided_slice %5 {offsets = [1, 0], sizes = [1, 128], strides = [1, 1]} : vector<8x128xf32> to vector<1x128xf32>
    %8 = vector.extract_strided_slice %5 {offsets = [2, 0], sizes = [1, 128], strides = [1, 1]} : vector<8x128xf32> to vector<1x128xf32>
    %9 = vector.extract_strided_slice %5 {offsets = [3, 0], sizes = [1, 128], strides = [1, 1]} : vector<8x128xf32> to vector<1x128xf32>
    %10 = vector.extract_strided_slice %5 {offsets = [4, 0], sizes = [1, 128], strides = [1, 1]} : vector<8x128xf32> to vector<1x128xf32>
    %11 = vector.extract_strided_slice %5 {offsets = [5, 0], sizes = [1, 128], strides = [1, 1]} : vector<8x128xf32> to vector<1x128xf32>
    %12 = tpu.iota {dimensions = array<i32: 0>} : vector<128x128xi32>
    %13 = tpu.iota {dimensions = array<i32: 1>} : vector<128x128xi32>
    %14 = arith.cmpi sle, %13, %12 : vector<128x128xi32>
    %cst = arith.constant dense<0.000000e+00> : vector<128xf32>
    %15 = vector.multi_reduction <add>, %3, %cst [1] : vector<128x128xf32> to vector<128xf32>
    %16 = vector.shape_cast %15 : vector<128xf32> to vector<128x1xf32>
    %cst_5 = arith.constant 1.280000e+02 : f32
    %17 = vector.broadcast %cst_5 : f32 to vector<128x1xf32>
    %18 = arith.divf %16, %17 : vector<128x1xf32>
    %19 = vector.broadcast %18 : vector<128x1xf32> to vector<128x128xf32>
    %20 = arith.subf %3, %19 : vector<128x128xf32>
    %21 = arith.mulf %20, %20 : vector<128x128xf32>
    %cst_6 = arith.constant dense<0.000000e+00> : vector<128xf32>
    %22 = vector.multi_reduction <add>, %21, %cst_6 [1] : vector<128x128xf32> to vector<128xf32>
    %23 = vector.shape_cast %22 : vector<128xf32> to vector<128x1xf32>
    %cst_7 = arith.constant 1.280000e+02 : f32
    %24 = vector.broadcast %cst_7 : f32 to vector<128x1xf32>
    %25 = arith.divf %23, %24 : vector<128x1xf32>
    %26 = vector.broadcast %18 : vector<128x1xf32> to vector<128x128xf32>
    %27 = arith.subf %3, %26 : vector<128x128xf32>
    %cst_8 = arith.constant 9.99999974E-6 : f32
    %28 = vector.broadcast %cst_8 : f32 to vector<128x1xf32>
    %29 = arith.addf %25, %28 : vector<128x1xf32>
    %30 = math.rsqrt %29 : vector<128x1xf32>
    %31 = vector.broadcast %30 : vector<128x1xf32> to vector<128x128xf32>
    %32 = arith.mulf %27, %31 : vector<128x128xf32>
    %33 = vector.broadcast %6 : vector<1x128xf32> to vector<128x128xf32>
    %34 = arith.mulf %32, %33 : vector<128x128xf32>
    %35 = vector.broadcast %7 : vector<1x128xf32> to vector<128x128xf32>
    %36 = arith.addf %34, %35 : vector<128x128xf32>
    %37 = arith.truncf %36 : vector<128x128xf32> to vector<128x128xbf16>
    %c0_9 = arith.constant 0 : index
    %c0_10 = arith.constant 0 : index
    %c0_11 = arith.constant 0 : index
    %38 = vector.load %arg4[%c0_9, %c0_10, %c0_11] : memref<1x128x384xbf16, #tpu.memory_space<vmem>>, vector<1x128x384xbf16>
    %39 = vector.shape_cast %38 : vector<1x128x384xbf16> to vector<128x384xbf16>
    %cst_12 = arith.constant dense<0.000000e+00> : vector<128x384xf32>
    %40 = tpu.matmul %37, %39, %cst_12 {dimension_numbers = #tpu.dot_dimension_numbers<[1], [0], [0], [1], [0, 0, 1, 1], [], []>} : vector<128x128xbf16>, vector<128x384xbf16>, vector<128x384xf32> -> vector<128x384xf32>
    %41 = vector.extract_strided_slice %40 {offsets = [0, 0], sizes = [128, 128], strides = [1, 1]} : vector<128x384xf32> to vector<128x128xf32>
    %cst_13 = arith.constant 0.176776692 : f32
    %42 = vector.broadcast %cst_13 : f32 to vector<128x128xf32>
    %43 = arith.mulf %41, %42 : vector<128x128xf32>
    %44 = arith.truncf %43 : vector<128x128xf32> to vector<128x128xbf16>
    %45 = vector.extract_strided_slice %40 {offsets = [0, 128], sizes = [128, 128], strides = [1, 1]} : vector<128x384xf32> to vector<128x128xf32>
    %46 = arith.truncf %45 : vector<128x128xf32> to vector<128x128xbf16>
    %47 = vector.extract_strided_slice %40 {offsets = [0, 256], sizes = [128, 128], strides = [1, 1]} : vector<128x384xf32> to vector<128x128xf32>
    %48 = arith.truncf %47 : vector<128x128xf32> to vector<128x128xbf16>
    %c0_14 = arith.constant 0 : index
    %c0_15 = arith.constant 0 : index
    %c0_16 = arith.constant 0 : index
    %49 = vector.load %arg5[%c0_14, %c0_15, %c0_16] : memref<1x128x128xbf16, #tpu.memory_space<vmem>>, vector<1x128x128xbf16>
    %50 = vector.shape_cast %49 : vector<1x128x128xbf16> to vector<128x128xbf16>
    %cst_17 = arith.constant 0.000000e+00 : f32
    %51 = vector.broadcast %cst_17 : f32 to vector<128x128xf32>
    %52 = vector.extract_strided_slice %44 {offsets = [0, 0], sizes = [128, 32], strides = [1, 1]} : vector<128x128xbf16> to vector<128x32xbf16>
    %53 = vector.extract_strided_slice %46 {offsets = [0, 0], sizes = [128, 32], strides = [1, 1]} : vector<128x128xbf16> to vector<128x32xbf16>
    %54 = vector.extract_strided_slice %48 {offsets = [0, 0], sizes = [128, 32], strides = [1, 1]} : vector<128x128xbf16> to vector<128x32xbf16>
    "tpu.trace_start"() <{level = 10 : i32, message = "td,sd->ts"}> : () -> ()
    %cst_18 = arith.constant dense<0.000000e+00> : vector<128x128xf32>
    %55 = tpu.matmul %52, %53, %cst_18 {dimension_numbers = #tpu.dot_dimension_numbers<[1], [1], [0], [0], [0, 0, 1, 0], [], []>} : vector<128x32xbf16>, vector<128x32xbf16>, vector<128x128xf32> -> vector<128x128xf32>
    %cst_19 = arith.constant -1.000000e+30 : f32
    "tpu.trace_stop"() : () -> ()
    %56 = vector.broadcast %cst_19 : f32 to vector<128x128xf32>
    %57 = arith.select %14, %55, %56 : vector<128x128xi1>, vector<128x128xf32>
    %cst_20 = arith.constant dense<0xFF800000> : vector<128xf32>
    %58 = vector.multi_reduction <maximumf>, %57, %cst_20 [1] : vector<128x128xf32> to vector<128xf32>
    %59 = vector.shape_cast %58 : vector<128xf32> to vector<128x1xf32>
    %60 = vector.broadcast %59 : vector<128x1xf32> to vector<128x128xf32>
    %61 = arith.subf %57, %60 : vector<128x128xf32>
    %62 = math.exp %61 : vector<128x128xf32>
    %cst_21 = arith.constant dense<0.000000e+00> : vector<128xf32>
    %63 = vector.multi_reduction <add>, %62, %cst_21 [1] : vector<128x128xf32> to vector<128xf32>
    %64 = vector.shape_cast %63 : vector<128xf32> to vector<128x1xf32>
    %65 = tpu.reciprocal %64 {approx = true} : vector<128x1xf32> -> vector<128x1xf32>
    %66 = vector.broadcast %65 : vector<128x1xf32> to vector<128x128xf32>
    %67 = arith.mulf %62, %66 : vector<128x128xf32>
    %68 = arith.truncf %67 : vector<128x128xf32> to vector<128x128xbf16>
    %cst_22 = arith.constant dense<0.000000e+00> : vector<128x32xf32>
    %69 = tpu.matmul %68, %54, %cst_22 {dimension_numbers = #tpu.dot_dimension_numbers<[1], [0], [0], [1], [0, 0, 1, 1], [], []>} : vector<128x128xbf16>, vector<128x32xbf16>, vector<128x32xf32> -> vector<128x32xf32>
    %70 = arith.truncf %69 : vector<128x32xf32> to vector<128x32xbf16>
    %71 = vector.extract_strided_slice %50 {offsets = [0, 0], sizes = [32, 128], strides = [1, 1]} : vector<128x128xbf16> to vector<32x128xbf16>
    %cst_23 = arith.constant dense<0.000000e+00> : vector<128x128xf32>
    %72 = tpu.matmul %70, %71, %cst_23 {dimension_numbers = #tpu.dot_dimension_numbers<[1], [0], [0], [1], [0, 0, 1, 1], [], []>} : vector<128x32xbf16>, vector<32x128xbf16>, vector<128x128xf32> -> vector<128x128xf32>
    %73 = arith.addf %51, %72 : vector<128x128xf32>
    %74 = vector.extract_strided_slice %44 {offsets = [0, 32], sizes = [128, 32], strides = [1, 1]} : vector<128x128xbf16> to vector<128x32xbf16>
    %75 = vector.extract_strided_slice %46 {offsets = [0, 32], sizes = [128, 32], strides = [1, 1]} : vector<128x128xbf16> to vector<128x32xbf16>
    %76 = vector.extract_strided_slice %48 {offsets = [0, 32], sizes = [128, 32], strides = [1, 1]} : vector<128x128xbf16> to vector<128x32xbf16>
    "tpu.trace_start"() <{level = 10 : i32, message = "td,sd->ts"}> : () -> ()
    %cst_24 = arith.constant dense<0.000000e+00> : vector<128x128xf32>
    %77 = tpu.matmul %74, %75, %cst_24 {dimension_numbers = #tpu.dot_dimension_numbers<[1], [1], [0], [0], [0, 0, 1, 0], [], []>} : vector<128x32xbf16>, vector<128x32xbf16>, vector<128x128xf32> -> vector<128x128xf32>
    %cst_25 = arith.constant -1.000000e+30 : f32
    "tpu.trace_stop"() : () -> ()
    %78 = vector.broadcast %cst_25 : f32 to vector<128x128xf32>
    %79 = arith.select %14, %77, %78 : vector<128x128xi1>, vector<128x128xf32>
    %cst_26 = arith.constant dense<0xFF800000> : vector<128xf32>
    %80 = vector.multi_reduction <maximumf>, %79, %cst_26 [1] : vector<128x128xf32> to vector<128xf32>
    %81 = vector.shape_cast %80 : vector<128xf32> to vector<128x1xf32>
    %82 = vector.broadcast %81 : vector<128x1xf32> to vector<128x128xf32>
    %83 = arith.subf %79, %82 : vector<128x128xf32>
    %84 = math.exp %83 : vector<128x128xf32>
    %cst_27 = arith.constant dense<0.000000e+00> : vector<128xf32>
    %85 = vector.multi_reduction <add>, %84, %cst_27 [1] : vector<128x128xf32> to vector<128xf32>
    %86 = vector.shape_cast %85 : vector<128xf32> to vector<128x1xf32>
    %87 = tpu.reciprocal %86 {approx = true} : vector<128x1xf32> -> vector<128x1xf32>
    %88 = vector.broadcast %87 : vector<128x1xf32> to vector<128x128xf32>
    %89 = arith.mulf %84, %88 : vector<128x128xf32>
    %90 = arith.truncf %89 : vector<128x128xf32> to vector<128x128xbf16>
    %cst_28 = arith.constant dense<0.000000e+00> : vector<128x32xf32>
    %91 = tpu.matmul %90, %76, %cst_28 {dimension_numbers = #tpu.dot_dimension_numbers<[1], [0], [0], [1], [0, 0, 1, 1], [], []>} : vector<128x128xbf16>, vector<128x32xbf16>, vector<128x32xf32> -> vector<128x32xf32>
    %92 = arith.truncf %91 : vector<128x32xf32> to vector<128x32xbf16>
    %93 = vector.extract_strided_slice %50 {offsets = [32, 0], sizes = [32, 128], strides = [1, 1]} : vector<128x128xbf16> to vector<32x128xbf16>
    %cst_29 = arith.constant dense<0.000000e+00> : vector<128x128xf32>
    %94 = tpu.matmul %92, %93, %cst_29 {dimension_numbers = #tpu.dot_dimension_numbers<[1], [0], [0], [1], [0, 0, 1, 1], [], []>} : vector<128x32xbf16>, vector<32x128xbf16>, vector<128x128xf32> -> vector<128x128xf32>
    %95 = arith.addf %73, %94 : vector<128x128xf32>
    %96 = vector.extract_strided_slice %44 {offsets = [0, 64], sizes = [128, 32], strides = [1, 1]} : vector<128x128xbf16> to vector<128x32xbf16>
    %97 = vector.extract_strided_slice %46 {offsets = [0, 64], sizes = [128, 32], strides = [1, 1]} : vector<128x128xbf16> to vector<128x32xbf16>
    %98 = vector.extract_strided_slice %48 {offsets = [0, 64], sizes = [128, 32], strides = [1, 1]} : vector<128x128xbf16> to vector<128x32xbf16>
    "tpu.trace_start"() <{level = 10 : i32, message = "td,sd->ts"}> : () -> ()
    %cst_30 = arith.constant dense<0.000000e+00> : vector<128x128xf32>
    %99 = tpu.matmul %96, %97, %cst_30 {dimension_numbers = #tpu.dot_dimension_numbers<[1], [1], [0], [0], [0, 0, 1, 0], [], []>} : vector<128x32xbf16>, vector<128x32xbf16>, vector<128x128xf32> -> vector<128x128xf32>
    %cst_31 = arith.constant -1.000000e+30 : f32
    "tpu.trace_stop"() : () -> ()
    %100 = vector.broadcast %cst_31 : f32 to vector<128x128xf32>
    %101 = arith.select %14, %99, %100 : vector<128x128xi1>, vector<128x128xf32>
    %cst_32 = arith.constant dense<0xFF800000> : vector<128xf32>
    %102 = vector.multi_reduction <maximumf>, %101, %cst_32 [1] : vector<128x128xf32> to vector<128xf32>
    %103 = vector.shape_cast %102 : vector<128xf32> to vector<128x1xf32>
    %104 = vector.broadcast %103 : vector<128x1xf32> to vector<128x128xf32>
    %105 = arith.subf %101, %104 : vector<128x128xf32>
    %106 = math.exp %105 : vector<128x128xf32>
    %cst_33 = arith.constant dense<0.000000e+00> : vector<128xf32>
    %107 = vector.multi_reduction <add>, %106, %cst_33 [1] : vector<128x128xf32> to vector<128xf32>
    %108 = vector.shape_cast %107 : vector<128xf32> to vector<128x1xf32>
    %109 = tpu.reciprocal %108 {approx = true} : vector<128x1xf32> -> vector<128x1xf32>
    %110 = vector.broadcast %109 : vector<128x1xf32> to vector<128x128xf32>
    %111 = arith.mulf %106, %110 : vector<128x128xf32>
    %112 = arith.truncf %111 : vector<128x128xf32> to vector<128x128xbf16>
    %cst_34 = arith.constant dense<0.000000e+00> : vector<128x32xf32>
    %113 = tpu.matmul %112, %98, %cst_34 {dimension_numbers = #tpu.dot_dimension_numbers<[1], [0], [0], [1], [0, 0, 1, 1], [], []>} : vector<128x128xbf16>, vector<128x32xbf16>, vector<128x32xf32> -> vector<128x32xf32>
    %114 = arith.truncf %113 : vector<128x32xf32> to vector<128x32xbf16>
    %115 = vector.extract_strided_slice %50 {offsets = [64, 0], sizes = [32, 128], strides = [1, 1]} : vector<128x128xbf16> to vector<32x128xbf16>
    %cst_35 = arith.constant dense<0.000000e+00> : vector<128x128xf32>
    %116 = tpu.matmul %114, %115, %cst_35 {dimension_numbers = #tpu.dot_dimension_numbers<[1], [0], [0], [1], [0, 0, 1, 1], [], []>} : vector<128x32xbf16>, vector<32x128xbf16>, vector<128x128xf32> -> vector<128x128xf32>
    %117 = arith.addf %95, %116 : vector<128x128xf32>
    %118 = vector.extract_strided_slice %44 {offsets = [0, 96], sizes = [128, 32], strides = [1, 1]} : vector<128x128xbf16> to vector<128x32xbf16>
    %119 = vector.extract_strided_slice %46 {offsets = [0, 96], sizes = [128, 32], strides = [1, 1]} : vector<128x128xbf16> to vector<128x32xbf16>
    %120 = vector.extract_strided_slice %48 {offsets = [0, 96], sizes = [128, 32], strides = [1, 1]} : vector<128x128xbf16> to vector<128x32xbf16>
    "tpu.trace_start"() <{level = 10 : i32, message = "td,sd->ts"}> : () -> ()
    %cst_36 = arith.constant dense<0.000000e+00> : vector<128x128xf32>
    %121 = tpu.matmul %118, %119, %cst_36 {dimension_numbers = #tpu.dot_dimension_numbers<[1], [1], [0], [0], [0, 0, 1, 0], [], []>} : vector<128x32xbf16>, vector<128x32xbf16>, vector<128x128xf32> -> vector<128x128xf32>
    %cst_37 = arith.constant -1.000000e+30 : f32
    "tpu.trace_stop"() : () -> ()
    %122 = vector.broadcast %cst_37 : f32 to vector<128x128xf32>
    %123 = arith.select %14, %121, %122 : vector<128x128xi1>, vector<128x128xf32>
    %cst_38 = arith.constant dense<0xFF800000> : vector<128xf32>
    %124 = vector.multi_reduction <maximumf>, %123, %cst_38 [1] : vector<128x128xf32> to vector<128xf32>
    %125 = vector.shape_cast %124 : vector<128xf32> to vector<128x1xf32>
    %126 = vector.broadcast %125 : vector<128x1xf32> to vector<128x128xf32>
    %127 = arith.subf %123, %126 : vector<128x128xf32>
    %128 = math.exp %127 : vector<128x128xf32>
    %cst_39 = arith.constant dense<0.000000e+00> : vector<128xf32>
    %129 = vector.multi_reduction <add>, %128, %cst_39 [1] : vector<128x128xf32> to vector<128xf32>
    %130 = vector.shape_cast %129 : vector<128xf32> to vector<128x1xf32>
    %131 = tpu.reciprocal %130 {approx = true} : vector<128x1xf32> -> vector<128x1xf32>
    %132 = vector.broadcast %131 : vector<128x1xf32> to vector<128x128xf32>
    %133 = arith.mulf %128, %132 : vector<128x128xf32>
    %134 = arith.truncf %133 : vector<128x128xf32> to vector<128x128xbf16>
    %cst_40 = arith.constant dense<0.000000e+00> : vector<128x32xf32>
    %135 = tpu.matmul %134, %120, %cst_40 {dimension_numbers = #tpu.dot_dimension_numbers<[1], [0], [0], [1], [0, 0, 1, 1], [], []>} : vector<128x128xbf16>, vector<128x32xbf16>, vector<128x32xf32> -> vector<128x32xf32>
    %136 = arith.truncf %135 : vector<128x32xf32> to vector<128x32xbf16>
    %137 = vector.extract_strided_slice %50 {offsets = [96, 0], sizes = [32, 128], strides = [1, 1]} : vector<128x128xbf16> to vector<32x128xbf16>
    %cst_41 = arith.constant dense<0.000000e+00> : vector<128x128xf32>
    %138 = tpu.matmul %136, %137, %cst_41 {dimension_numbers = #tpu.dot_dimension_numbers<[1], [0], [0], [1], [0, 0, 1, 1], [], []>} : vector<128x32xbf16>, vector<32x128xbf16>, vector<128x128xf32> -> vector<128x128xf32>
    %139 = arith.addf %117, %138 : vector<128x128xf32>
    %140 = arith.addf %3, %139 : vector<128x128xf32>
    %141 = vector.broadcast %8 : vector<1x128xf32> to vector<128x128xf32>
    %142 = arith.addf %140, %141 : vector<128x128xf32>
    %cst_42 = arith.constant dense<0.000000e+00> : vector<128xf32>
    %143 = vector.multi_reduction <add>, %142, %cst_42 [1] : vector<128x128xf32> to vector<128xf32>
    %144 = vector.shape_cast %143 : vector<128xf32> to vector<128x1xf32>
    %cst_43 = arith.constant 1.280000e+02 : f32
    %145 = vector.broadcast %cst_43 : f32 to vector<128x1xf32>
    %146 = arith.divf %144, %145 : vector<128x1xf32>
    %147 = vector.broadcast %146 : vector<128x1xf32> to vector<128x128xf32>
    %148 = arith.subf %142, %147 : vector<128x128xf32>
    %149 = arith.mulf %148, %148 : vector<128x128xf32>
    %cst_44 = arith.constant dense<0.000000e+00> : vector<128xf32>
    %150 = vector.multi_reduction <add>, %149, %cst_44 [1] : vector<128x128xf32> to vector<128xf32>
    %151 = vector.shape_cast %150 : vector<128xf32> to vector<128x1xf32>
    %cst_45 = arith.constant 1.280000e+02 : f32
    %152 = vector.broadcast %cst_45 : f32 to vector<128x1xf32>
    %153 = arith.divf %151, %152 : vector<128x1xf32>
    %154 = vector.broadcast %146 : vector<128x1xf32> to vector<128x128xf32>
    %155 = arith.subf %142, %154 : vector<128x128xf32>
    %cst_46 = arith.constant 9.99999974E-6 : f32
    %156 = vector.broadcast %cst_46 : f32 to vector<128x1xf32>
    %157 = arith.addf %153, %156 : vector<128x1xf32>
    %158 = math.rsqrt %157 : vector<128x1xf32>
    %159 = vector.broadcast %158 : vector<128x1xf32> to vector<128x128xf32>
    %160 = arith.mulf %155, %159 : vector<128x128xf32>
    %161 = vector.broadcast %9 : vector<1x128xf32> to vector<128x128xf32>
    %162 = arith.mulf %160, %161 : vector<128x128xf32>
    %163 = vector.broadcast %10 : vector<1x128xf32> to vector<128x128xf32>
    %164 = arith.addf %162, %163 : vector<128x128xf32>
    %165 = arith.truncf %164 : vector<128x128xf32> to vector<128x128xbf16>
    %c0_47 = arith.constant 0 : index
    %c0_48 = arith.constant 0 : index
    %c0_49 = arith.constant 0 : index
    %166 = vector.load %arg6[%c0_47, %c0_48, %c0_49] : memref<1x128x512xbf16, #tpu.memory_space<vmem>>, vector<1x128x512xbf16>
    %167 = vector.shape_cast %166 : vector<1x128x512xbf16> to vector<128x512xbf16>
    %cst_50 = arith.constant dense<0.000000e+00> : vector<128x512xf32>
    %168 = tpu.matmul %165, %167, %cst_50 {dimension_numbers = #tpu.dot_dimension_numbers<[1], [0], [0], [1], [0, 0, 1, 1], [], []>} : vector<128x128xbf16>, vector<128x512xbf16>, vector<128x512xf32> -> vector<128x512xf32>
    %c0_51 = arith.constant 0 : index
    %c0_52 = arith.constant 0 : index
    %c0_53 = arith.constant 0 : index
    %169 = vector.load %arg7[%c0_51, %c0_52, %c0_53] : memref<1x1x512xf32, #tpu.memory_space<vmem>>, vector<1x1x512xf32>
    %170 = vector.shape_cast %169 : vector<1x1x512xf32> to vector<1x512xf32>
    %171 = vector.broadcast %170 : vector<1x512xf32> to vector<128x512xf32>
    %172 = arith.addf %168, %171 : vector<128x512xf32>
    %cst_54 = arith.constant 0.000000e+00 : f32
    %173 = vector.broadcast %cst_54 : f32 to vector<128x512xf32>
    %174 = arith.maximumf %172, %173 : vector<128x512xf32>
    %175 = arith.truncf %174 : vector<128x512xf32> to vector<128x512xbf16>
    %c0_55 = arith.constant 0 : index
    %c0_56 = arith.constant 0 : index
    %c0_57 = arith.constant 0 : index
    %176 = vector.load %arg8[%c0_55, %c0_56, %c0_57] : memref<1x512x128xbf16, #tpu.memory_space<vmem>>, vector<1x512x128xbf16>
    %177 = vector.shape_cast %176 : vector<1x512x128xbf16> to vector<512x128xbf16>
    %cst_58 = arith.constant dense<0.000000e+00> : vector<128x128xf32>
    %178 = tpu.matmul %175, %177, %cst_58 {dimension_numbers = #tpu.dot_dimension_numbers<[1], [0], [0], [1], [0, 0, 1, 1], [], []>} : vector<128x512xbf16>, vector<512x128xbf16>, vector<128x128xf32> -> vector<128x128xf32>
    %179 = vector.broadcast %11 : vector<1x128xf32> to vector<128x128xf32>
    %180 = arith.addf %178, %179 : vector<128x128xf32>
    %181 = arith.addf %142, %180 : vector<128x128xf32>
    %c0_59 = arith.constant 0 : index
    %c0_60 = arith.constant 0 : index
    %182 = vector.load %arg14[%c0_59, %c0_60] : memref<128x128xf32, #tpu.memory_space<vmem>>, vector<128x128xf32>
    tpu.vector_store %arg14[%c0_59, %c0_60], %181 {strides = array<i32>} : memref<128x128xf32, #tpu.memory_space<vmem>>, vector<128x128xf32>,
    %c1_i32 = arith.constant 1 : i32
    %183 = arith.cmpi eq, %arg1, %c1_i32 : i32
    %184 = arith.extui %183 : i1 to i32
    %c0_i32_61 = arith.constant 0 : i32
    %185 = arith.cmpi ne, %184, %c0_i32_61 : i32
    scf.if %185 {
      %c0_62 = arith.constant 0 : index
      %c0_63 = arith.constant 0 : index
      %186 = vector.load %arg9[%c0_62, %c0_63] : memref<1x128xf32, #tpu.memory_space<vmem>>, vector<1x128xf32>
      %c0_64 = arith.constant 0 : index
      %c0_65 = arith.constant 0 : index
      %187 = vector.load %arg10[%c0_64, %c0_65] : memref<1x128xf32, #tpu.memory_space<vmem>>, vector<1x128xf32>
      %cst_66 = arith.constant dense<0.000000e+00> : vector<128xf32>
      %188 = vector.multi_reduction <add>, %181, %cst_66 [1] : vector<128x128xf32> to vector<128xf32>
      %189 = vector.shape_cast %188 : vector<128xf32> to vector<128x1xf32>
      %cst_67 = arith.constant 1.280000e+02 : f32
      %190 = vector.broadcast %cst_67 : f32 to vector<128x1xf32>
      %191 = arith.divf %189, %190 : vector<128x1xf32>
      %192 = vector.broadcast %191 : vector<128x1xf32> to vector<128x128xf32>
      %193 = arith.subf %181, %192 : vector<128x128xf32>
      %194 = arith.mulf %193, %193 : vector<128x128xf32>
      %cst_68 = arith.constant dense<0.000000e+00> : vector<128xf32>
      %195 = vector.multi_reduction <add>, %194, %cst_68 [1] : vector<128x128xf32> to vector<128xf32>
      %196 = vector.shape_cast %195 : vector<128xf32> to vector<128x1xf32>
      %cst_69 = arith.constant 1.280000e+02 : f32
      %197 = vector.broadcast %cst_69 : f32 to vector<128x1xf32>
      %198 = arith.divf %196, %197 : vector<128x1xf32>
      %199 = vector.broadcast %191 : vector<128x1xf32> to vector<128x128xf32>
      %200 = arith.subf %181, %199 : vector<128x128xf32>
      %cst_70 = arith.constant 9.99999974E-6 : f32
      %201 = vector.broadcast %cst_70 : f32 to vector<128x1xf32>
      %202 = arith.addf %198, %201 : vector<128x1xf32>
      %203 = math.rsqrt %202 : vector<128x1xf32>
      %204 = vector.broadcast %203 : vector<128x1xf32> to vector<128x128xf32>
      %205 = arith.mulf %200, %204 : vector<128x128xf32>
      %206 = vector.broadcast %186 : vector<1x128xf32> to vector<128x128xf32>
      %207 = arith.mulf %205, %206 : vector<128x128xf32>
      %208 = vector.broadcast %187 : vector<1x128xf32> to vector<128x128xf32>
      %209 = arith.addf %207, %208 : vector<128x128xf32>
      %210 = arith.truncf %209 : vector<128x128xf32> to vector<128x128xbf16>
      %c0_71 = arith.constant 0 : index
      %c0_72 = arith.constant 0 : index
      %211 = vector.load %arg11[%c0_71, %c0_72] : memref<128x128xbf16, #tpu.memory_space<vmem>>, vector<128x128xbf16>
      %cst_73 = arith.constant dense<0.000000e+00> : vector<128x128xf32>
      %212 = tpu.matmul %210, %211, %cst_73 {dimension_numbers = #tpu.dot_dimension_numbers<[1], [0], [0], [1], [0, 0, 1, 1], [], []>} : vector<128x128xbf16>, vector<128x128xbf16>, vector<128x128xf32> -> vector<128x128xf32>
      %c0_74 = arith.constant 0 : index
      %c0_75 = arith.constant 0 : index
      %213 = vector.load %arg12[%c0_74, %c0_75] : memref<1x128xf32, #tpu.memory_space<vmem>>, vector<1x128xf32>
      %214 = vector.broadcast %213 : vector<1x128xf32> to vector<128x128xf32>
      %215 = arith.addf %212, %214 : vector<128x128xf32>
      %c0_76 = arith.constant 0 : index
      %c0_77 = arith.constant 0 : index
      %c0_78 = arith.constant 0 : index
      %216 = vector.load %arg13[%c0_76, %c0_77, %c0_78] : memref<1x128x128xf32, #tpu.memory_space<vmem>>, vector<1x128x128xf32>
      %217 = vector.shape_cast %216 : vector<1x128x128xf32> to vector<128x128xf32>
      %218 = vector.shape_cast %215 : vector<128x128xf32> to vector<1x128x128xf32>
      tpu.vector_store %arg13[%c0_76, %c0_77, %c0_78], %218 {strides = array<i32>} : memref<1x128x128xf32, #tpu.memory_space<vmem>>, vector<1x128x128xf32>,
    } else {
    }
    return
  }
  func.func @transform_0(%arg0: i32, %arg1: i32) -> (i32, i32, i32) {
    %c0_i32 = arith.constant 0 : i32
    %c0_i32_0 = arith.constant 0 : i32
    %c0_i32_1 = arith.constant 0 : i32
    return %arg0, %c0_i32, %c0_i32_0 : i32, i32, i32
  }
  func.func @transform_1(%arg0: i32, %arg1: i32) -> (i32, i32, i32) {
    %c0_i32 = arith.constant 0 : i32
    %c0_i32_0 = arith.constant 0 : i32
    %c0_i32_1 = arith.constant 0 : i32
    return %arg1, %c0_i32, %c0_i32_0 : i32, i32, i32
  }
  func.func @transform_2(%arg0: i32, %arg1: i32) -> (i32, i32, i32) {
    %c0_i32 = arith.constant 0 : i32
    %c0_i32_0 = arith.constant 0 : i32
    %c0_i32_1 = arith.constant 0 : i32
    return %arg1, %c0_i32, %c0_i32_0 : i32, i32, i32
  }
  func.func @transform_3(%arg0: i32, %arg1: i32) -> (i32, i32, i32) {
    %c0_i32 = arith.constant 0 : i32
    %c0_i32_0 = arith.constant 0 : i32
    %c0_i32_1 = arith.constant 0 : i32
    return %arg1, %c0_i32, %c0_i32_0 : i32, i32, i32
  }
  func.func @transform_4(%arg0: i32, %arg1: i32) -> (i32, i32, i32) {
    %c0_i32 = arith.constant 0 : i32
    %c0_i32_0 = arith.constant 0 : i32
    %c0_i32_1 = arith.constant 0 : i32
    return %arg1, %c0_i32, %c0_i32_0 : i32, i32, i32
  }
  func.func @transform_5(%arg0: i32, %arg1: i32) -> (i32, i32, i32) {
    %c0_i32 = arith.constant 0 : i32
    %c0_i32_0 = arith.constant 0 : i32
    %c0_i32_1 = arith.constant 0 : i32
    return %arg1, %c0_i32, %c0_i32_0 : i32, i32, i32
  }
  func.func @transform_6(%arg0: i32, %arg1: i32) -> (i32, i32, i32) {
    %c0_i32 = arith.constant 0 : i32
    %c0_i32_0 = arith.constant 0 : i32
    %c0_i32_1 = arith.constant 0 : i32
    return %arg1, %c0_i32, %c0_i32_0 : i32, i32, i32
  }
  func.func @transform_7(%arg0: i32, %arg1: i32) -> (i32, i32) {
    %c0_i32 = arith.constant 0 : i32
    %c0_i32_0 = arith.constant 0 : i32
    %c0_i32_1 = arith.constant 0 : i32
    return %c0_i32, %c0_i32_0 : i32, i32
  }
  func.func @transform_8(%arg0: i32, %arg1: i32) -> (i32, i32) {
    %c0_i32 = arith.constant 0 : i32
    %c0_i32_0 = arith.constant 0 : i32
    %c0_i32_1 = arith.constant 0 : i32
    return %c0_i32, %c0_i32_0 : i32, i32
  }
  func.func @transform_9(%arg0: i32, %arg1: i32) -> (i32, i32) {
    %c0_i32 = arith.constant 0 : i32
    %c0_i32_0 = arith.constant 0 : i32
    %c0_i32_1 = arith.constant 0 : i32
    return %c0_i32, %c0_i32_0 : i32, i32
  }
  func.func @transform_10(%arg0: i32, %arg1: i32) -> (i32, i32) {
    %c0_i32 = arith.constant 0 : i32
    %c0_i32_0 = arith.constant 0 : i32
    %c0_i32_1 = arith.constant 0 : i32
    return %c0_i32, %c0_i32_0 : i32, i32
  }
  func.func @transform_11(%arg0: i32, %arg1: i32) -> (i32, i32, i32) {
    %c0_i32 = arith.constant 0 : i32
    %c0_i32_0 = arith.constant 0 : i32
    %c0_i32_1 = arith.constant 0 : i32
    return %arg0, %c0_i32, %c0_i32_0 : i32, i32, i32
  }
}

</mosaic_0001>

<bundles_post_ra>
// kernel: gpt_forward.1
= control target key start
LH: loop header
LB: loop body
LE: loop exit
PB: predicated region body
PF: predicated region fallthrough
CT: control target
= control target key end

     0   :  { %s9725_s0 = inlined_call_operand.vmem [shape: f32[2,128,128], index: 0, kind: input, shape index: {}]   ;;  %s9726_s1 = inlined_call_operand.vmem [shape: f32[2,8,128], index: 1, kind: input, shape index: {}]   ;;  %s9727_s2 = inlined_call_operand.vmem [shape: bf16[2,128,384], index: 2, kind: input, shape index: {}]   ;;  %s9728_s3 = inlined_call_operand.vmem [shape: bf16[2,128,128], index: 3, kind: input, shape index: {}]   ;;  %s9729_s4 = inlined_call_operand.vmem [shape: bf16[2,128,512], index: 4, kind: input, shape index: {}]   ;;  %s9730_s5 = inlined_call_operand.vmem [shape: f32[2,1,512], index: 5, kind: input, shape index: {}]   ;;  %s9731_s6 = inlined_call_operand.vmem [shape: bf16[2,512,128], index: 6, kind: input, shape index: {}]   ;;  %s9732_s7 = inlined_call_operand.vmem [shape: f32[1,128], index: 7, kind: input, shape index: {}]   ;;  %s9733_s8 = inlined_call_operand.vmem [shape: f32[1,128], index: 8, kind: input, shape index: {}]   ;;  %s9734_s9 = inlined_call_operand.vmem [shape: bf16[128,128], index: 9, kind: input, shape index: {}]   ;;  %s9735_s10 = inlined_call_operand.vmem [shape: f32[1,128], index: 10, kind: input, shape index: {}]   ;;  %s9736_s11 = inlined_call_operand.hbm [shape: f32[2,128,128], index: 11, kind: output, shape index: {}]  }
   0x1   :  { %9768 = sst [smem:[#allocation32_spill]] %s9725_s0 }
   0x2   :  { %9769 = sst [smem:[#allocation33_spill]] %s9726_s1 }
   0x3   :  { %9770 = sst [smem:[#allocation34_spill]] %s9736_s11 }
   0x4   :  { %16 = vsyncpa [#allocation4], 0 }
   0x5   :  { %18 = vsyncpa [#allocation4 + $0x1], 0  ;;  %s6629_s17 = smov 0   ;;  %s6631_s18 = smov 0  }
   0x6   :  { %s6633_s19 = smov 0   ;;  %s6635_s20 = smov 0  }
   0x7   :  { %s6637_s21 = smov 0   ;;  %s6639_s22 = smov 0  }
   0x8   :  { %s6641_s23 = smov 0   ;;  %s6643_s24 = smov 0  }
   0x9 LB: > { %9771 = sst [smem:[#allocation6_spill]] %s6533_s17  ;;  %s5353_s25 = sadd.s32 4294967295, %s6561_s24   ;;  %s6561_s24 = sphi %s6643_s24, %s24_s24   ;;  %s6557_s23 = sphi %s6641_s23, %s9888_s23   ;;  %s6553_s22 = sphi %s6639_s22, %s9887_s22   ;;  %s6549_s21 = sphi %s6637_s21, %s9886_s21   ;;  %s6545_s20 = sphi %s6635_s20, %s9885_s20   ;;  %s6541_s19 = sphi %s6633_s19, %s9884_s19   ;;  %s6537_s18 = sphi %s6631_s18, %s9883_s18   ;;  %s6533_s17 = sphi %s6629_s17, %s9882_s17  }
   0xa   : > { %9772 = sst [smem:[#allocation7_spill]] %s6537_s18  ;;  %s5354_s26 = sadd.s32 4294967294, %s6561_s24  }
   0xb   : > { %9773 = sst [smem:[#allocation8_spill]] %s6541_s19  ;;  %s33_s27 = sadd.s32 1, %s6553_s22 }
   0xc   : > { %9774 = sst [smem:[#allocation9_spill]] %s6549_s21  ;;  %p34_p0 = scmp.ge.s32.totalorder %s33_s27, 2 }
   0xd   : > { %9775 = sst [smem:[#allocation10_spill]] %s6553_s22  ;;  %s36_s28 = sadd.s32 1, %s6557_s23 }
   0xe   : > { %9776 = sst [smem:[#allocation11_spill]] %s6557_s23  ;;  %p319_p1 = scmp.ne.s32.totalorder %s6541_s19, %s6537_s18 }
   0xf   : > { %9777 = sst [smem:[#allocation12_spill]] %s6561_s24  ;;  %p320_p2 = scmp.eq.s32.totalorder %s5353_s25, 3 }
  0x10   : > { %s9890_s27 = smov (%p34_p0, %s33_s27), 0  ;;  %s9892_s28 = smov (!%p34_p0, %s36_s28), %s6557_s23 }
  0x11   : > { %9778 = sst [smem:[#allocation13_spill]] %s9890_s27  ;;  %p6678_p3 = por %p320_p2, %p319_p1 }
  0x12   : > { %p325_p4 = scmp.ne.s32.totalorder %s6537_s18, %s6533_s17  ;;  %p38_p5 = scmp.ge.s32.totalorder %s9892_s28, 2 }
  0x13   : > { %s9779_s29 = scalar_select %p6678_p3, 1, 0 }
  0x14   : > { %p326_p6 = scmp.eq.s32.totalorder %s5354_s26, 3  ;;  %p5357_p7 = scmp.ge.s32.totalorder %s6561_s24, 1 }
  0x15   : > { %9780 = sst [smem:[#allocation14_spill]] %s9779_s29  ;;  %p410_p8 = scmp.lt.s32.totalorder %s6561_s24, 5 }
  0x16   : > { %s9894_s28 = smov (%p38_p5, %s9892_s28), 0  ;;  %p6688_p9 = por %p326_p6, %p325_p4 }
  0x17   : > { %9781 = sst [smem:[#allocation15_spill]] %s9894_s28  ;;  %p411_p10 = pnand %p5357_p7, %p410_p8 }
  0x18   : > { %s9782_s30 = scalar_select %p6688_p9, 1, 0 }
  0x19   : > { %s306_s12 = ssub.s32 %s6557_s23, %s9894_s28  ;;  %s309_s13 = sadd.s32 1, %s6541_s19 }
  0x1a   : > { %9783 = sst [smem:[#allocation16_spill]] %s9782_s30  ;;  %p307_p11 = scmp.eq.s32.totalorder %s306_s12, 0 }
  0x1b   : > { %414 = sbr.rel (%p411_p10) target bundleno = 3495 (0xda7), region = 64 }
  0x1c   : > { %s6696_s14 = scalar_select %p307_p11, %s6541_s19, %s309_s13  }
  0x1e   : > { %9784 = sst [smem:[#allocation17_spill]] %s6696_s14 }
  0x20   : > { %s9746_s15 = sand.u32 1, %s6537_s18   ;;  %p478_p12 = scmp.lt.s32.totalorder %s6549_s21, 1 }
  0x21   : > { %s5358_s16 = sshll.u32 %s9746_s15, 7  ;;  %p483_p13 = scmp.lt.s32.totalorder %s6545_s20, 1 }
  0x22   : > { %s479_s25 = scalar_select %p478_p12, %s6549_s21, 1 }
  0x23   : > { %s484_s26 = scalar_select %p483_p13, %s6545_s20, 1 }
  0x24   : > { %s5857_s27 = sshll.u32 %s479_s25, 7  ;;  %s9785_s0 = sld [smem:[#allocation32_spill]] }
  0x25   : > { %s5361_s13 = sshll.u32 %s484_s26, 3  ;;  %s9786_s1 = sld [smem:[#allocation33_spill]] }
  0x26   : > { %s6014_s30 = smul.u32 192, %s484_s26  ;;  %s5858_s17 = sshll.u32 %s484_s26, 6 }
  0x27   : > { %s5859_s24 = sshll.u32 %s484_s26, 8  ;;  %s6723_s23 = scalar_lea.vmem %s9728_s3, %s5858_s17 }
  0x28   : > { %s6718_s29 = scalar_lea.vmem %s9727_s2, %s6014_s30  ;;  %s5367_s22 = sshll.u32 %s484_s26, 2 }
  0x29   : > { %s6738_s30 = scalar_lea.vmem %s9731_s6, %s5859_s24  ;;  %s6740_s15 = scalar_lea.vmem [#allocation3], %s5358_s16 }
  0x2a   : > { %s6708_s12 = scalar_lea.vmem %s9785_s0, %s5857_s27  ;;  %s6728_s0 = scalar_lea.vmem %s9729_s4, %s5859_s24 }
  0x2b   : > { %s6713_s19 = scalar_lea.vmem %s9786_s1, %s5361_s13  ;;  %s6733_s1 = scalar_lea.vmem %s9730_s5, %s5367_s22 }
  0x2c   : > { %p5370_p0 = scmp.ne.s32.totalorder %s6545_s20, 0 }
  0x2e   : > { %515 = sbr.rel (%p5370_p0) target bundleno = 68 (0x44), region = 68 }
  0x33   : > { %v516_v0 = vld [vmem:[%s6708_s12] sm:$0xff]  ;;  %v517_v1 = vld [vmem:[%s6708_s12 + $0x8] sm:$0xff]  ;;  %v518_v2 = vld [vmem:[%s6708_s12 + $0x10] sm:$0xff] }
  0x34   : > { %532 = vst [vmem:[#allocation2 + $0x30] sm:$0xff] %v516_v0  ;;  %v519_v3 = vld [vmem:[%s6708_s12 + $0x18] sm:$0xff]  ;;  %v520_v4 = vld [vmem:[%s6708_s12 + $0x20] sm:$0xff]  ;;  %v521_v5 = vld [vmem:[%s6708_s12 + $0x28] sm:$0xff] }
  0x35   : > { %533 = vst [vmem:[#allocation2] sm:$0xff] %v517_v1  ;;  %v522_v6 = vld [vmem:[%s6708_s12 + $0x30] sm:$0xff]  ;;  %v523_v7 = vld [vmem:[%s6708_s12 + $0x38] sm:$0xff]  ;;  %v524_v8 = vld [vmem:[%s6708_s12 + $0x40] sm:$0xff] }
  0x36   : > { %534 = vst [vmem:[#allocation2 + $0x58] sm:$0xff] %v518_v2  ;;  %v525_v9 = vld [vmem:[%s6708_s12 + $0x48] sm:$0xff]  ;;  %v526_v10 = vld [vmem:[%s6708_s12 + $0x50] sm:$0xff]  ;;  %v527_v11 = vld [vmem:[%s6708_s12 + $0x58] sm:$0xff] }
  0x37   : > { %535 = vst [vmem:[#allocation2 + $0x18] sm:$0xff] %v519_v3  ;;  %v528_v12 = vld [vmem:[%s6708_s12 + $0x60] sm:$0xff]  ;;  %v529_v13 = vld [vmem:[%s6708_s12 + $0x68] sm:$0xff]  ;;  %v530_v14 = vld [vmem:[%s6708_s12 + $0x70] sm:$0xff] }
  0x38   : > { %536 = vst [vmem:[#allocation2 + $0x50] sm:$0xff] %v520_v4  ;;  %v531_v15 = vld [vmem:[%s6708_s12 + $0x78] sm:$0xff] }
  0x39   : > { %537 = vst [vmem:[#allocation2 + $0x68] sm:$0xff] %v521_v5 }
  0x3a   : > { %538 = vst [vmem:[#allocation2 + $0x8] sm:$0xff] %v522_v6 }
  0x3b   : > { %539 = vst [vmem:[#allocation2 + $0x48] sm:$0xff] %v523_v7 }
  0x3c   : > { %540 = vst [vmem:[#allocation2 + $0x40] sm:$0xff] %v524_v8 }
  0x3d   : > { %541 = vst [vmem:[#allocation2 + $0x20] sm:$0xff] %v525_v9 }
  0x3e   : > { %542 = vst [vmem:[#allocation2 + $0x10] sm:$0xff] %v526_v10 }
  0x3f   : > { %543 = vst [vmem:[#allocation2 + $0x38] sm:$0xff] %v527_v11 }
  0x40   : > { %544 = vst [vmem:[#allocation2 + $0x60] sm:$0xff] %v528_v12 }
  0x41   : > { %545 = vst [vmem:[#allocation2 + $0x70] sm:$0xff] %v529_v13 }
  0x42   : > { %546 = vst [vmem:[#allocation2 + $0x78] sm:$0xff] %v530_v14 }
  0x43   : > { %547 = vst [vmem:[#allocation2 + $0x28] sm:$0xff] %v531_v15 }
  0x44 PF: > { %v556_v16 = vld [vmem:[#allocation2 + $0x40] sm:$0xff]  ;;  %v548_v17 = vld [vmem:[#allocation2 + $0x30] sm:$0xff]  ;;  %v550_v18 = vld [vmem:[#allocation2 + $0x58] sm:$0xff]  ;;  %v6563_v26 = vmov 128.0   ;;  %s6564_s17 = smov 64   ;;  %s6565_s18 = smov 96  }
  0x45   : > { %616 = vadd.xlane.f32.xlu1 %v556_v16  ;;  %600 = vadd.xlane.f32.xlu0 %v548_v17  ;;  %v557_v19 = vld [vmem:[#allocation2 + $0x20] sm:$0xff]  ;;  %v551_v21 = vld [vmem:[#allocation2 + $0x18] sm:$0xff]  ;;  %v558_v22 = vld [vmem:[#allocation2 + $0x10] sm:$0xff]  ;;  %6092 = vrcp.f32 %v6563_v26  ;;  %s6566_s21 = smov 32   ;;  %p5819_p1 = scmp.ne.s32.totalorder %s6545_s20, 1 }
  0x46   : > { %604 = vadd.xlane.f32.xlu2 %v550_v18  ;;  %v549_v20 = vld [vmem:[#allocation2] sm:$0xff]  ;;  %v559_v23 = vld [vmem:[#allocation2 + $0x38] sm:$0xff]  ;;  %v6811_v5 = vld [vmem:[#allocation2 + $0x68] sm:$0xff] }
  0x47   : > { %v560_v24 = vld [vmem:[#allocation2 + $0x60] sm:$0xff]  ;;  %v6818_v9 = vld [vmem:[#allocation2 + $0x8] sm:$0xff]  ;;  %v6821_v11 = vld [vmem:[#allocation2 + $0x50] sm:$0xff] }
  0x48   : > { %v6759_v25 = vld [vmem:[#allocation2 + $0x70] sm:$0xff]  ;;  %v6828_v13 = vld [vmem:[#allocation2 + $0x48] sm:$0xff] }
  0x49   : > { %v6797_v61 = vld [vmem:[#allocation2 + $0x78] sm:$0xff]  ;;  %v5457_v15 = vld [vmem:[%s6718_s29 + $0xa8] sm:$0xf]  ;;  %v5879_v26 = vld [vmem:[%s6718_s29 + $0x94] sm:$0xf] }
  0x4a   : > { %v6781_v49 = vld [vmem:[#allocation2 + $0x28] sm:$0xff] }
  0x4b   : > { %v6093_v27 = vpop.eup %6092 }
  0x4c   : > { %v633_v28 = vmul.f32 128.0, %v6093_v27  ;;  %vm637_vm0 = vweird.f32 %v6093_v27 }
  0x4d   : > { %618 = vadd.xlane.f32.xlu1 %v557_v19  ;;  %602 = vadd.xlane.f32.xlu0 %v549_v20 }
  0x4e   : > { %606 = vadd.xlane.f32.xlu2 %v551_v21  ;;  %v634_v29 = vsub.f32 1.0, %v633_v28  ;;  %v5447_v28 = vld [vmem:[%s6718_s29 + $0x9c] sm:$0xf0] }
  0x50   : > { %v635_v30 = vmul.f32 %v6093_v27, %v634_v29  ;;  %v5453_v29 = vld [vmem:[%s6718_s29 + $0x98] sm:$0xf] }
  0x52   : > { %v636_v31 = vadd.f32 %v6093_v27, %v635_v30  ;;  %v5881_v30 = vld [vmem:[%s6718_s29 + $0xa0] sm:$0xf0] }
  0x54   : > { %v6762_v32 = vsel %vm637_vm0, %v6093_v27, %v636_v31  ;;  %v6848_v31 = vor.u32 %v5879_v26, %v5447_v28 }
  0x55   : > { %620 = vadd.xlane.f32.xlu0 %v558_v22  ;;  %622 = vadd.xlane.f32.xlu1 %v559_v23  ;;  %9787 = vst [vmem:[#allocation18_spill] sm:$0xff] %v6762_v32 }
  0x56   : > { %624 = vadd.xlane.f32.xlu2 %v560_v24 }
  0x5d   : > { %626 = vadd.xlane.f32.xlu0 %v6759_v25 }
  0xb8   : > { %v617_v33 = vpop.xlane.xlu1 %616  ;;  %v601_v34 = vpop.xlane.xlu0 %600 }
  0xb9   : > { %v647_v35 = vmul.f32 %v6762_v32, %v617_v33  ;;  %v639_v36 = vmul.f32 %v6762_v32, %v601_v34  ;;  %v605_v39 = vpop.xlane.xlu2 %604  ;;  %v5454_v33 = vor.u32 %v5881_v30, %v5453_v29  ;;  %v5433_v34 = vld [vmem:[%s6718_s29 + $0x78] sm:$0xf]  ;;  %v5387_v29 = vld [vmem:[%s6718_s29 + $0x24] sm:$0xf0]  ;;  %v5393_v30 = vld [vmem:[%s6718_s29 + $0x20] sm:$0xf] }
  0xba   : > { %v641_v48 = vmul.f32 %v6762_v32, %v605_v39 }
  0xbb   : > { %v6766_v37 = vsub.f32 %v556_v16, %v647_v35  ;;  %v6768_v38 = vsub.f32 %v548_v17, %v639_v36  ;;  %v5883_v16 = vld [vmem:[%s6718_s29 + $0xb0] sm:$0xf0]  ;;  %v5882_v17 = vld [vmem:[%s6718_s29 + $0xac] sm:$0xf]  ;;  %v5877_v35 = vld [vmem:[%s6718_s29 + $0x80] sm:$0xf0] }
  0xbc   : > { %v6788_v53 = vsub.f32 %v550_v18, %v641_v48  ;;  %v5458_v18 = vor.u32 %v5883_v16, %v5457_v15  ;;  %v5876_v36 = vld [vmem:[%s6718_s29 + $0x7c] sm:$0xf]  ;;  %v5434_v39 = vor.u32 %v5877_v35, %v5433_v34  ;;  %v5874_v48 = vld [vmem:[%s6718_s29 + $0x68] sm:$0xf0]  ;;  %v5867_v15 = vld [vmem:[%s6718_s29 + $0x34] sm:$0xf] }
  0xbd   : > { %v679_v40 = vmul.f32 %v6766_v37, %v6766_v37  ;;  %v671_v41 = vmul.f32 %v6768_v38, %v6768_v38 }
  0xbe   : > { %v673_v57 = vmul.f32 %v6788_v53, %v6788_v53  ;;  %1129 = vmatpush.bf16.msra.mxu0 %v5458_v18  ;;  %5966 = vmatpush.bf16.msra.mxu3 %v5458_v18  ;;  %v5405_v18 = vld [vmem:[%s6718_s29 + $0x38] sm:$0xf] }
  0xbf   : > { %703 = vadd.xlane.f32.xlu0 %v679_v40  ;;  %687 = vadd.xlane.f32.xlu1 %v671_v41  ;;  %v5435_v40 = vld [vmem:[%s6718_s29 + $0x84] sm:$0xf0]  ;;  %v5441_v41 = vld [vmem:[%s6718_s29 + $0x80] sm:$0xf] }
  0xc0   : > { %v619_v42 = vpop.xlane.xlu1 %618  ;;  %v603_v43 = vpop.xlane.xlu0 %602 }
  0xc1   : > { %v648_v44 = vmul.f32 %v6762_v32, %v619_v42  ;;  %v640_v45 = vmul.f32 %v6762_v32, %v603_v43  ;;  %v607_v52 = vpop.xlane.xlu2 %606  ;;  %v5878_v42 = vld [vmem:[%s6718_s29 + $0x88] sm:$0xf0]  ;;  %v6857_v43 = vor.u32 %v5876_v36, %v5435_v40 }
  0xc2   : > { %v642_v60 = vmul.f32 %v6762_v32, %v607_v52  ;;  %v5423_v52 = vld [vmem:[%s6718_s29 + $0x6c] sm:$0xf0] }
  0xc3   : > { %v6776_v46 = vsub.f32 %v557_v19, %v648_v44  ;;  %v6778_v47 = vsub.f32 %v549_v20, %v640_v45  ;;  %v5459_v19 = vld [vmem:[%s6718_s29 + $0xb4] sm:$0xf0]  ;;  %v5465_v20 = vld [vmem:[%s6718_s29 + $0xb0] sm:$0xf]  ;;  %v5442_v44 = vor.u32 %v5878_v42, %v5441_v41  ;;  %v5421_v45 = vld [vmem:[%s6718_s29 + $0x60] sm:$0xf] }
  0xc4   : > { %v6804_v0 = vsub.f32 %v551_v21, %v642_v60  ;;  %v5884_v21 = vld [vmem:[%s6718_s29 + $0xb8] sm:$0xf0]  ;;  %v5871_v60 = vld [vmem:[%s6718_s29 + $0x50] sm:$0xf0]  ;;  %v5373_v42 = vld [vmem:[%s6718_s29] sm:$0xf] }
  0xc5   : > { %v680_v50 = vmul.f32 %v6776_v46, %v6776_v46  ;;  %v672_v51 = vmul.f32 %v6778_v47, %v6778_v47 }
  0xc6   : > { %v674_v4 = vmul.f32 %v6804_v0, %v6804_v0 }
  0xc7   : > { %630 = vadd.xlane.f32.xlu0 %v6781_v49  ;;  %705 = vadd.xlane.f32.xlu1 %v680_v50  ;;  %v5873_v50 = vld [vmem:[%s6718_s29 + $0x64] sm:$0xf] }
  0xc8   : > { %689 = vadd.xlane.f32.xlu2 %v672_v51  ;;  %v621_v54 = vpop.xlane.xlu0 %620  ;;  %v623_v55 = vpop.xlane.xlu1 %622  ;;  %v5422_v51 = vor.u32 %v5874_v48, %v5421_v45  ;;  %v5861_v45 = vld [vmem:[%s6718_s29 + $0x4] sm:$0xf]  ;;  %v5375_v48 = vld [vmem:[%s6718_s29 + $0xc] sm:$0xf0] }
  0xc9   : > { %v649_v56 = vmul.f32 %v6762_v32, %v621_v54  ;;  %v650_v59 = vmul.f32 %v6762_v32, %v623_v55  ;;  %v625_v1 = vpop.xlane.xlu2 %624  ;;  %v5429_v54 = vld [vmem:[%s6718_s29 + $0x68] sm:$0xf]  ;;  %v5875_v55 = vld [vmem:[%s6718_s29 + $0x70] sm:$0xf0] }
  0xca   : > { %v651_v3 = vmul.f32 %v6762_v32, %v625_v1 }
  0xcb   : > { %v6793_v58 = vsub.f32 %v558_v22, %v649_v56  ;;  %v6801_v63 = vsub.f32 %v559_v23, %v650_v59  ;;  %v6839_v22 = vor.u32 %v5882_v17, %v5459_v19  ;;  %v5466_v23 = vor.u32 %v5884_v21, %v5465_v20  ;;  %v5409_v59 = vld [vmem:[%s6718_s29 + $0x48] sm:$0xf]  ;;  %v5399_v17 = vld [vmem:[%s6718_s29 + $0x3c] sm:$0xf0]  ;;  %v5869_v19 = vld [vmem:[%s6718_s29 + $0x40] sm:$0xf0] }
  0xcc   : > { %v6814_v6 = vsub.f32 %v560_v24, %v651_v3  ;;  %v5445_v24 = vld [vmem:[%s6718_s29 + $0x90] sm:$0xf]  ;;  %v6866_v56 = vor.u32 %v5873_v50, %v5423_v52  ;;  %v5410_v1 = vor.u32 %v5871_v60, %v5409_v59  ;;  %v6884_v20 = vor.u32 %v5867_v15, %v5399_v17  ;;  %v5863_v52 = vld [vmem:[%s6718_s29 + $0x10] sm:$0xf0] }
  0xcd   : > { %v681_v62 = vmul.f32 %v6793_v58, %v6793_v58  ;;  %v682_v2 = vmul.f32 %v6801_v63, %v6801_v63  ;;  %5974 = vmatpush.bf16.msra.mxu1 %v6839_v22  ;;  %1227 = vmatpush.bf16.msra.mxu2 %v5466_v23  ;;  %v5417_v3 = vld [vmem:[%s6718_s29 + $0x50] sm:$0xf]  ;;  %v5406_v21 = vor.u32 %v5869_v19, %v5405_v18  ;;  %v5385_v23 = vld [vmem:[%s6718_s29 + $0x18] sm:$0xf] }
  0xce   : > { %v683_v8 = vmul.f32 %v6814_v6, %v6814_v6 }
  0xcf   : > { %691 = vadd.xlane.f32.xlu1 %v673_v57  ;;  %707 = vadd.xlane.f32.xlu0 %v681_v62  ;;  %v5430_v57 = vor.u32 %v5875_v55, %v5429_v54  ;;  %v5870_v62 = vld [vmem:[%s6718_s29 + $0x4c] sm:$0xf]  ;;  %v6910_v54 = vor.u32 %v5861_v45, %v5375_v48 }
  0xd0   : > { %628 = vadd.xlane.f32.xlu2 %v6797_v61  ;;  %v627_v7 = vpop.xlane.xlu0 %626 }
  0xd1   : > { %v652_v10 = vmul.f32 %v6762_v32, %v627_v7  ;;  %5975 = vmatpush.bf16.msra.mxu1 %v6848_v31  ;;  %1228 = vmatpush.bf16.msra.mxu2 %v5454_v33  ;;  %v5866_v33 = vld [vmem:[%s6718_s29 + $0x28] sm:$0xf0] }
  0xd3   : > { %v6826_v12 = vsub.f32 %v6759_v25, %v652_v10  ;;  %v5880_v25 = vld [vmem:[%s6718_s29 + $0x98] sm:$0xf0]  ;;  %v5397_v10 = vld [vmem:[%s6718_s29 + $0x30] sm:$0xf] }
  0xd4   : > { %v5446_v27 = vor.u32 %v5880_v25, %v5445_v24  ;;  %v5865_v24 = vld [vmem:[%s6718_s29 + $0x20] sm:$0xf0]  ;;  %v5864_v25 = vld [vmem:[%s6718_s29 + $0x1c] sm:$0xf] }
  0xd5   : > { %v684_v14 = vmul.f32 %v6826_v12, %v6826_v12  ;;  %5976 = vmatpush.bf16.msra.mxu1 %v6857_v43  ;;  %1229 = vmatpush.bf16.msra.mxu2 %v5442_v44  ;;  %v5386_v28 = vor.u32 %v5865_v24, %v5385_v23  ;;  %v6895_v36 = vor.u32 %v5864_v25, %v5387_v29  ;;  %v5862_v44 = vld [vmem:[%s6718_s29 + $0x8] sm:$0xf0] }
  0xd6   : > { %1130 = vmatpush.bf16.msra.mxu0 %v5446_v27  ;;  %5967 = vmatpush.bf16.msra.mxu3 %v5446_v27  ;;  %v5374_v50 = vor.u32 %v5862_v44, %v5373_v42  ;;  %v564_v44 = vld [vmem:[%s6713_s19] sm:$0xff] }
  0xd7   : > { %709 = vadd.xlane.f32.xlu1 %v682_v2  ;;  %610 = vadd.xlane.f32.xlu0 %v6811_v5  ;;  %v5411_v2 = vld [vmem:[%s6718_s29 + $0x54] sm:$0xf0] }
  0xd8   : > { %693 = vadd.xlane.f32.xlu2 %v674_v4  ;;  %v5872_v4 = vld [vmem:[%s6718_s29 + $0x58] sm:$0xf0]  ;;  %v6875_v7 = vor.u32 %v5870_v62, %v5411_v2 }
  0xd9   : > { %5977 = vmatpush.bf16.msra.mxu1 %v6866_v56  ;;  %1230 = vmatpush.bf16.msra.mxu2 %v5430_v57 }
  0xda   : > { %1131 = vmatpush.bf16.msra.mxu0 %v5434_v39  ;;  %5968 = vmatpush.bf16.msra.mxu3 %v5434_v39  ;;  %v5394_v39 = vor.u32 %v5866_v33, %v5393_v30 }
  0xdd   : > { %5978 = vmatpush.bf16.msra.mxu1 %v6875_v7 }
  0xde   : > { %1132 = vmatpush.bf16.msra.mxu0 %v5422_v51  ;;  %5969 = vmatpush.bf16.msra.mxu3 %v5422_v51  ;;  %v5381_v51 = vld [vmem:[%s6718_s29 + $0x8] sm:$0xf] }
  0xdf   : > { %711 = vadd.xlane.f32.xlu1 %v683_v8  ;;  %612 = vadd.xlane.f32.xlu0 %v6818_v9  ;;  %v5418_v8 = vor.u32 %v5872_v4, %v5417_v3  ;;  %v5382_v55 = vor.u32 %v5863_v52, %v5381_v51 }
  0xe0   : > { %608 = vadd.xlane.f32.xlu2 %v6821_v11 }
  0xe1   : > { %1231 = vmatpush.bf16.msra.mxu2 %v5418_v8  ;;  %5979 = vmatpush.bf16.msra.mxu1 %v6884_v20 }
  0xe2   : > { %1133 = vmatpush.bf16.msra.mxu0 %v5410_v1  ;;  %5970 = vmatpush.bf16.msra.mxu3 %v5410_v1 }
  0xe5   : > { %1232 = vmatpush.bf16.msra.mxu2 %v5406_v21  ;;  %5980 = vmatpush.bf16.msra.mxu1 %v6895_v36 }
  0xe7   : > { %614 = vadd.xlane.f32.xlu1 %v6828_v13 }
  0xe8   : > { %713 = vadd.xlane.f32.xlu2 %v684_v14  ;;  %v5868_v14 = vld [vmem:[%s6718_s29 + $0x38] sm:$0xf0] }
  0xe9   : > { %v5398_v16 = vor.u32 %v5868_v14, %v5397_v10  ;;  %1233 = vmatpush.bf16.msra.mxu2 %v5394_v39  ;;  %5981 = vmatpush.bf16.msra.mxu1 %v6910_v54 }
  0xeb   : > { %1134 = vmatpush.bf16.msra.mxu0 %v5398_v16  ;;  %5971 = vmatpush.bf16.msra.mxu3 %v5398_v16 }
  0xed   : > { %1234 = vmatpush.bf16.msra.mxu2 %v5382_v55 }
  0xef   : > { %1135 = vmatpush.bf16.msra.mxu0 %v5386_v28  ;;  %5972 = vmatpush.bf16.msra.mxu3 %v5386_v28 }
  0xf3   : > { %1136 = vmatpush.bf16.msra.mxu0 %v5374_v50  ;;  %5973 = vmatpush.bf16.msra.mxu3 %v5374_v50 }
  0xf7   : > { %1178 = vmatpush.bf16.msrb.mxu0 %v6839_v22 }
  0xfb   : > { %1179 = vmatpush.bf16.msrb.mxu0 %v6848_v31 }
  0xff   : > { %1180 = vmatpush.bf16.msrb.mxu0 %v6857_v43 }
 0x103   : > { %1181 = vmatpush.bf16.msrb.mxu0 %v6866_v56 }
 0x107   : > { %1182 = vmatpush.bf16.msrb.mxu0 %v6875_v7 }
 0x10b   : > { %1183 = vmatpush.bf16.msrb.mxu0 %v6884_v20 }
 0x10f   : > { %1184 = vmatpush.bf16.msrb.mxu0 %v6895_v36 }
 0x113   : > { %1185 = vmatpush.bf16.msrb.mxu0 %v6910_v54 }
 0x132   : > { %v688_v26 = vpop.xlane.xlu1 %687  ;;  %v704_v27 = vpop.xlane.xlu0 %703 }
 0x133   : > { %v719_v34 = vmul.f32 %v688_v26, %v6762_v32  ;;  %v727_v35 = vmul.f32 %v704_v27, %v6762_v32 }
 0x135   : > { %v6897_v40 = vadd.f32 1e-05, %v719_v34  ;;  %v6899_v41 = vadd.f32 1e-05, %v727_v35 }
 0x137   : > { %6094 = vrsqrt.f32 %v6897_v40  ;;  %vm757_vm2 = vweird.f32 %v6897_v40  ;;  %vm837_vm3 = vweird.f32 %v6899_v41 }
 0x138   : > { %6096 = vrsqrt.f32 %v6899_v41 }
 0x13a   : > { %v706_v57 = vpop.xlane.xlu1 %705  ;;  %v631_v59 = vpop.xlane.xlu0 %630 }
 0x13b   : > { %v728_v60 = vmul.f32 %v706_v57, %v6762_v32  ;;  %v690_v62 = vpop.xlane.xlu2 %689  ;;  %v654_v1 = vmul.f32 %v6762_v32, %v631_v59  ;;  %v6980_v57 = vperm.slane %v564_v44, 0  ;;  %v6982_v59 = vperm.slane %v564_v44, 1 }
 0x13c   : > { %v720_v2 = vmul.f32 %v690_v62, %v6762_v32 }
 0x13d   : > { %v6917_v3 = vpop.eup %6094  ;;  %v6919_v4 = vadd.f32 1e-05, %v728_v60  ;;  %v6922_v8 = vsub.f32 %v6781_v49, %v654_v1 }
 0x13e   : > { %v6924_v10 = vpop.eup %6096  ;;  %v752_v14 = vmul.f32 %v6917_v3, %v6897_v40  ;;  %v6928_v15 = vadd.f32 1e-05, %v720_v2  ;;  %vm758_vm1 = vweird.f32 %v6917_v3 }
 0x13f   : > { %v832_v16 = vmul.f32 %v6924_v10, %v6899_v41  ;;  %6098 = vrsqrt.f32 %v6919_v4  ;;  %v686_v49 = vmul.f32 %v6922_v8, %v6922_v8  ;;  %vm6965_vm4 = vmor %vm757_vm2, %vm758_vm1  ;;  %vm838_vm5 = vweird.f32 %v6924_v10 }
 0x140   : > { %v753_v22 = vmul.f32 %v6917_v3, %v752_v14  ;;  %6100 = vrsqrt.f32 %v6928_v15  ;;  %vm847_vm6 = vweird.f32 %v6919_v4  ;;  %vm6986_vm7 = vmor %vm837_vm3, %vm838_vm5  ;;  %vm767_vm10 = vweird.f32 %v6928_v15 }
 0x141   : > { %v833_v17 = vmul.f32 %v6924_v10, %v832_v16  ;;  %717 = vadd.xlane.f32.xlu0 %v686_v49 }
 0x142   : > { %v754_v18 = vmul.f32 0.5, %v753_v22  ;;  %v692_v19 = vpop.xlane.xlu1 %691  ;;  %v708_v21 = vpop.xlane.xlu0 %707 }
 0x143   : > { %v834_v23 = vmul.f32 0.5, %v833_v17  ;;  %v721_v24 = vmul.f32 %v692_v19, %v6762_v32  ;;  %v629_v25 = vpop.xlane.xlu2 %628  ;;  %v729_v26 = vmul.f32 %v708_v21, %v6762_v32 }
 0x144   : > { %v755_v31 = vsub.f32 1.5, %v754_v18  ;;  %v653_v27 = vmul.f32 %v6762_v32, %v629_v25 }
 0x145   : > { %v6943_v28 = vpop.eup %6098  ;;  %v835_v29 = vsub.f32 1.5, %v834_v23  ;;  %v6946_v30 = vadd.f32 1e-05, %v721_v24  ;;  %v6948_v33 = vadd.f32 1e-05, %v729_v26 }
 0x146   : > { %v6950_v34 = vpop.eup %6100  ;;  %v756_v35 = vmul.f32 %v6917_v3, %v755_v31  ;;  %v842_v43 = vmul.f32 %v6943_v28, %v6919_v4  ;;  %v6956_v39 = vsub.f32 %v6797_v61, %v653_v27  ;;  %vm848_vm8 = vweird.f32 %v6943_v28 }
 0x147   : > { %v762_v42 = vmul.f32 %v6950_v34, %v6928_v15  ;;  %6102 = vrsqrt.f32 %v6946_v30  ;;  %v836_v48 = vmul.f32 %v6924_v10, %v835_v29  ;;  %vm768_vm9 = vweird.f32 %v6950_v34  ;;  %vm7019_vm11 = vmor %vm847_vm6, %vm848_vm8 }
 0x148   : > { %v843_v61 = vmul.f32 %v6943_v28, %v842_v43  ;;  %6104 = vrsqrt.f32 %v6948_v33  ;;  %v760_v40 = vsel %vm6965_vm4, %v6917_v3, %v756_v35  ;;  %v685_v56 = vmul.f32 %v6956_v39, %v6956_v39  ;;  %vm769_vm12 = vmor %vm767_vm10, %vm768_vm9 }
 0x149   : > { %v763_v50 = vmul.f32 %v6950_v34, %v762_v42  ;;  %v840_v14 = vsel %vm6986_vm7, %v6924_v10, %v836_v48  ;;  %v911_v22 = vmul.f32 %v760_v40, %v6768_v38  ;;  %vm777_vm14 = vweird.f32 %v6946_v30 }
 0x14a   : > { %v844_v51 = vmul.f32 0.5, %v843_v61  ;;  %v710_v52 = vpop.xlane.xlu1 %709  ;;  %v611_v55 = vpop.xlane.xlu0 %610  ;;  %715 = vadd.xlane.f32.xlu2 %v685_v56  ;;  %v919_v15 = vmul.f32 %v840_v14, %v6766_v37  ;;  %vm857_vm15 = vweird.f32 %v6948_v33 }
 0x14b   : > { %v764_v62 = vmul.f32 0.5, %v763_v50  ;;  %v730_v1 = vmul.f32 %v710_v52, %v6762_v32  ;;  %v694_v2 = vpop.xlane.xlu2 %693  ;;  %v644_v3 = vmul.f32 %v6762_v32, %v611_v55  ;;  %v928_v26 = vmul.f32 %v6980_v57, %v911_v22 }
 0x14c   : > { %v845_v41 = vsub.f32 1.5, %v844_v51  ;;  %v722_v16 = vmul.f32 %v694_v2, %v6762_v32 }
 0x14d   : > { %v6999_v49 = vpop.eup %6102  ;;  %v765_v17 = vsub.f32 1.5, %v764_v62  ;;  %v7002_v18 = vadd.f32 1e-05, %v730_v1  ;;  %v7005_v19 = vsub.f32 %v6811_v5, %v644_v3 }
 0x14e   : > { %v7007_v7 = vpop.eup %6104  ;;  %v846_v21 = vmul.f32 %v6943_v28, %v845_v41  ;;  %v772_v10 = vmul.f32 %v6999_v49, %v6946_v30  ;;  %v7013_v38 = vadd.f32 1e-05, %v722_v16  ;;  %vm778_vm13 = vweird.f32 %v6999_v49 }
 0x14f   : > { %v766_v5 = vmul.f32 %v6950_v34, %v765_v17  ;;  %v852_v24 = vmul.f32 %v7007_v7, %v6948_v33  ;;  %6106 = vrsqrt.f32 %v7002_v18  ;;  %v676_v37 = vmul.f32 %v7005_v19, %v7005_v19  ;;  %vm7075_vm1 = vmor %vm777_vm14, %vm778_vm13 }
 0x150   : > { %v850_v25 = vsel %vm7019_vm11, %v6943_v28, %v846_v21  ;;  %v773_v4 = vmul.f32 %v6999_v49, %v772_v10  ;;  %6108 = vrsqrt.f32 %v7013_v38  ;;  %vm858_vm0 = vweird.f32 %v7007_v7 }
 0x151   : > { %v770_v31 = vsel %vm769_vm12, %v6950_v34, %v766_v5  ;;  %v853_v27 = vmul.f32 %v7007_v7, %v852_v24  ;;  %v920_v43 = vmul.f32 %v850_v25, %v6776_v46  ;;  %v936_v34 = vmul.f32 %v6980_v57, %v919_v15  ;;  %vm7096_vm3 = vmor %vm857_vm15, %vm858_vm0 }
 0x152   : > { %v774_v20 = vmul.f32 0.5, %v773_v4  ;;  %v712_v29 = vpop.xlane.xlu1 %711  ;;  %v613_v35 = vpop.xlane.xlu0 %612  ;;  %v912_v28 = vmul.f32 %v770_v31, %v6778_v47  ;;  %697 = vadd.xlane.f32.xlu2 %v676_v37  ;;  %v945_v47 = vadd.f32 %v6982_v59, %v928_v26  ;;  %vm867_vm2 = vweird.f32 %v7002_v18 }
 0x153   : > { %v854_v42 = vmul.f32 0.5, %v853_v27  ;;  %v731_v44 = vmul.f32 %v712_v29, %v6762_v32  ;;  %v609_v45 = vpop.xlane.xlu2 %608  ;;  %v645_v48 = vmul.f32 %v6762_v32, %v613_v35  ;;  %v937_v52 = vmul.f32 %v6980_v57, %v920_v43 }
 0x154   : > { %v775_v61 = vsub.f32 1.5, %v774_v20  ;;  %v929_v40 = vmul.f32 %v6980_v57, %v912_v28  ;;  %v643_v51 = vmul.f32 %v6762_v32, %v609_v45  ;;  %v953_v54 = vadd.f32 %v6982_v59, %v936_v34 }
 0x155   : > { %v7050_v50 = vpop.eup %6106  ;;  %v855_v46 = vsub.f32 1.5, %v854_v42  ;;  %v7052_v56 = vadd.f32 1e-05, %v731_v44  ;;  %v7061_v1 = vsub.f32 %v6818_v9, %v645_v48  ;;  %v954_v22 = vadd.f32 %v6982_v59, %v937_v52 }
 0x156   : > { %v6109_v55 = vpop.eup %6108  ;;  %v776_v60 = vmul.f32 %v6999_v49, %v775_v61  ;;  %v862_v36 = vmul.f32 %v7050_v50, %v7002_v18  ;;  %v946_v62 = vadd.f32 %v6982_v59, %v929_v40  ;;  %v7080_v16 = vsub.f32 %v6821_v11, %v643_v51 }
 0x157   : > { %v782_v2 = vmul.f32 %v6109_v55, %v7013_v38  ;;  %6110 = vrsqrt.f32 %v7052_v56  ;;  %v856_v3 = vmul.f32 %v7007_v7, %v855_v46  ;;  %v677_v10 = vmul.f32 %v7061_v1, %v7061_v1 }
 0x158   : > { %v863_v14 = vmul.f32 %v7050_v50, %v862_v36  ;;  %v7071_v41 = vpack.c.bf16 %v946_v62, %v945_v47  ;;  %v780_v17 = vsel %vm7075_vm1, %v6999_v49, %v776_v60  ;;  %v675_v5 = vmul.f32 %v7080_v16, %v7080_v16 }
 0x159   : > { %v783_v30 = vmul.f32 %v6109_v55, %v782_v2  ;;  %v7102_v24 = vpack.c.bf16 %v954_v22, %v953_v54  ;;  %v860_v4 = vsel %vm7096_vm3, %v7007_v7, %v856_v3  ;;  %vm868_vm4 = vweird.f32 %v7050_v50  ;;  %699 = vadd.xlane.f32.xlu0 %v677_v10 }
 0x15a   : > { %v864_v21 = vmul.f32 0.5, %v863_v14  ;;  %1137 = vmatmul.bf16.vlgmr.msra.gmra.mxu0 %v7071_v41  ;;  %1235 = vmatmul.bf16.vlgmr.msra.gmra.mxu2 %v7071_v41  ;;  %v615_v11 = vpop.xlane.xlu1 %614  ;;  %vm788_vm5 = vweird.f32 %v6109_v55  ;;  %v913_v35 = vmul.f32 %v780_v17, %v6788_v53  ;;  %vm869_vm6 = vmor %vm867_vm2, %vm868_vm4  ;;  %vm787_vm7 = vweird.f32 %v7013_v38 }
 0x15b   : > { %v784_v49 = vmul.f32 0.5, %v783_v30  ;;  %v646_v15 = vmul.f32 %v6762_v32, %v615_v11  ;;  %v714_v25 = vpop.xlane.xlu2 %713  ;;  %695 = vadd.xlane.f32.xlu1 %v675_v5  ;;  %1206 = vmatmul.bf16.vlgmr.msra.gmra.mxu1 %v7102_v24  ;;  %v921_v43 = vmul.f32 %v860_v4, %v6793_v58  ;;  %vm789_vm8 = vmor %vm787_vm7, %vm788_vm5  ;;  %vm877_vm9 = vweird.f32 %v7052_v56 }
 0x15c   : > { %v865_v26 = vsub.f32 1.5, %v864_v21  ;;  %v732_v33 = vmul.f32 %v714_v25, %v6762_v32  ;;  %v930_v34 = vmul.f32 %v6980_v57, %v913_v35 }
 0x15d   : > { %v6111_v31 = vpop.eup %6110  ;;  %v785_v27 = vsub.f32 1.5, %v784_v49  ;;  %v7112_v37 = vsub.f32 %v6828_v13, %v646_v15  ;;  %v938_v38 = vmul.f32 %v6980_v57, %v921_v43 }
 0x15e   : > { %v866_v20 = vmul.f32 %v7050_v50, %v865_v26  ;;  %v872_v29 = vmul.f32 %v6111_v31, %v7052_v56  ;;  %v748_v7 = vadd.f32 1e-05, %v732_v33  ;;  %v947_v46 = vadd.f32 %v6982_v59, %v930_v34 }
 0x15f   : > { %v786_v28 = vmul.f32 %v6109_v55, %v785_v27  ;;  %v678_v45 = vmul.f32 %v7112_v37, %v7112_v37  ;;  %vm878_vm10 = vweird.f32 %v6111_v31 }
 0x160   : > { %v870_v42 = vsel %vm869_vm6, %v7050_v50, %v866_v20  ;;  %v873_v13 = vmul.f32 %v6111_v31, %v872_v29  ;;  %6112 = vrsqrt.f32 %v748_v7  ;;  %vm879_vm11 = vmor %vm877_vm9, %vm878_vm10  ;;  %vm887_vm12 = vweird.f32 %v748_v7 }
 0x161   : > { %v790_v44 = vsel %vm789_vm8, %v6109_v55, %v786_v28  ;;  %v922_v48 = vmul.f32 %v870_v42, %v6801_v63 }
 0x162   : > { %v874_v53 = vmul.f32 0.5, %v873_v13  ;;  %v914_v18 = vmul.f32 %v790_v44, %v6804_v0  ;;  %v955_v0 = vadd.f32 %v6982_v59, %v938_v38 }
 0x163   : > { %v939_v58 = vmul.f32 %v6980_v57, %v922_v48  ;;  %701 = vadd.xlane.f32.xlu1 %v678_v45 }
 0x164   : > { %v875_v61 = vsub.f32 1.5, %v874_v53  ;;  %v931_v40 = vmul.f32 %v6980_v57, %v914_v18 }
 0x165   : > { %v956_v47 = vadd.f32 %v6982_v59, %v939_v58 }
 0x166   : > { %v6113_v50 = vpop.eup %6112  ;;  %v948_v63 = vadd.f32 %v6982_v59, %v931_v40  ;;  %v876_v52 = vmul.f32 %v6111_v31, %v875_v61 }
 0x167   : > { %v882_v51 = vmul.f32 %v6113_v50, %v748_v7  ;;  %v7135_v36 = vpack.c.bf16 %v956_v47, %v955_v0  ;;  %vm888_vm13 = vweird.f32 %v6113_v50 }
 0x168   : > { %v962_v55 = vpack.c.bf16 %v948_v63, %v947_v46  ;;  %v880_v2 = vsel %vm879_vm11, %v6111_v31, %v876_v52  ;;  %vm889_vm14 = vmor %vm887_vm12, %vm888_vm13 }
 0x169   : > { %v883_v60 = vmul.f32 %v6113_v50, %v882_v51  ;;  %v923_v9 = vmul.f32 %v880_v2, %v6814_v6 }
 0x16a   : > { %1142 = vmatmul.bf16.gmra.mxu0 %v962_v55  ;;  %1240 = vmatmul.bf16.gmra.mxu2 %v962_v55 }
 0x16b   : > { %v884_v62 = vmul.f32 0.5, %v883_v60  ;;  %1211 = vmatmul.bf16.gmra.mxu1 %v7135_v36  ;;  %v940_v54 = vmul.f32 %v6980_v57, %v923_v9 }
 0x16d   : > { %v885_v3 = vsub.f32 1.5, %v884_v62  ;;  %v957_v21 = vadd.f32 %v6982_v59, %v940_v54 }
 0x16f   : > { %v886_v14 = vmul.f32 %v6113_v50, %v885_v3 }
 0x171   : > { %v890_v56 = vsel %vm889_vm14, %v6113_v50, %v886_v14 }
 0x172   : > { %v924_v30 = vmul.f32 %v890_v56, %v6826_v12 }
 0x174   : > { %v941_v22 = vmul.f32 %v6980_v57, %v924_v30 }
 0x176   : > { %v958_v17 = vadd.f32 %v6982_v59, %v941_v22 }
 0x178   : > { %v7144_v10 = vpack.c.bf16 %v958_v17, %v957_v21 }
 0x17a   : > { %1186 = vmatmul.bf16.vlgmr.msrb.gmra.mxu0 %v7071_v41 }
 0x17b   : > { %1216 = vmatmul.bf16.gmra.mxu1 %v7144_v10 }
 0x18a   : > { %1191 = vmatmul.bf16.gmra.mxu0 %v962_v55 }
 0x1b4   : > { %v718_v11 = vpop.xlane.xlu0 %717 }
 0x1b5   : > { %v734_v6 = vmul.f32 %v718_v11, %v6762_v32 }
 0x1b7   : > { %v750_v23 = vadd.f32 1e-05, %v734_v6 }
 0x1b9   : > { %6114 = vrsqrt.f32 %v750_v23  ;;  %vm907_vm15 = vweird.f32 %v750_v23 }
 0x1bd   : > { %v716_v12 = vpop.xlane.xlu2 %715 }
 0x1be   : > { %v733_v49 = vmul.f32 %v716_v12, %v6762_v32 }
 0x1bf   : > { %v6115_v5 = vpop.eup %6114 }
 0x1c0   : > { %v902_v15 = vmul.f32 %v6115_v5, %v750_v23  ;;  %v749_v25 = vadd.f32 1e-05, %v733_v49  ;;  %vm908_vm0 = vweird.f32 %v6115_v5 }
 0x1c1   : > { %vm909_vm1 = vmor %vm907_vm15, %vm908_vm0 }
 0x1c2   : > { %v903_v4 = vmul.f32 %v6115_v5, %v902_v15  ;;  %6116 = vrsqrt.f32 %v749_v25  ;;  %vm897_vm3 = vweird.f32 %v749_v25 }
 0x1c4   : > { %v904_v26 = vmul.f32 0.5, %v903_v4 }
 0x1c5   : > { %v698_v33 = vpop.xlane.xlu2 %697 }
 0x1c6   : > { %v724_v41 = vmul.f32 %v698_v33, %v6762_v32  ;;  %v905_v31 = vsub.f32 1.5, %v904_v26 }
 0x1c8   : > { %v6117_v27 = vpop.eup %6116  ;;  %v740_v20 = vadd.f32 1e-05, %v724_v41  ;;  %v906_v7 = vmul.f32 %v6115_v5, %v905_v31 }
 0x1c9   : > { %v892_v29 = vmul.f32 %v6117_v27, %v749_v25  ;;  %vm898_vm2 = vweird.f32 %v6117_v27 }
 0x1ca   : > { %6118 = vrsqrt.f32 %v740_v20  ;;  %v910_v42 = vsel %vm909_vm1, %v6115_v5, %v906_v7  ;;  %vm899_vm4 = vmor %vm897_vm3, %vm898_vm2  ;;  %vm807_vm5 = vweird.f32 %v740_v20  ;;  %vm1436_vm1 = vcmask 261120  }
 0x1cb   : > { %v893_v35 = vmul.f32 %v6117_v27, %v892_v29  ;;  %v926_v61 = vmul.f32 %v910_v42, %v6922_v8 }
 0x1cc   : > { %v700_v43 = vpop.xlane.xlu0 %699 }
 0x1cd   : > { %v894_v28 = vmul.f32 0.5, %v893_v35  ;;  %v725_v45 = vmul.f32 %v700_v43, %v6762_v32  ;;  %v943_v0 = vmul.f32 %v6980_v57, %v926_v61 }
 0x1ce   : > { %v696_v44 = vpop.xlane.xlu1 %695 }
 0x1cf   : > { %v895_v13 = vsub.f32 1.5, %v894_v28  ;;  %v723_v53 = vmul.f32 %v696_v44, %v6762_v32  ;;  %v7153_v38 = vadd.f32 1e-05, %v725_v45 }
 0x1d0   : > { %v6119_v48 = vpop.eup %6118 }
 0x1d1   : > { %v896_v18 = vmul.f32 %v6117_v27, %v895_v13  ;;  %v802_v34 = vmul.f32 %v6119_v48, %v740_v20  ;;  %v739_v58 = vadd.f32 1e-05, %v723_v53  ;;  %6120 = vrsqrt.f32 %v7153_v38 }
 0x1d2   : > { %vm808_vm6 = vweird.f32 %v6119_v48  ;;  %vm817_vm11 = vweird.f32 %v7153_v38 }
 0x1d3   : > { %v900_v40 = vsel %vm899_vm4, %v6117_v27, %v896_v18  ;;  %v803_v47 = vmul.f32 %v6119_v48, %v802_v34  ;;  %6122 = vrsqrt.f32 %v739_v58  ;;  %vm7169_vm7 = vmor %vm807_vm5, %vm808_vm6  ;;  %vm797_vm9 = vweird.f32 %v739_v58 }
 0x1d4   : > { %v925_v50 = vmul.f32 %v900_v40, %v6956_v39  ;;  %v960_v39 = vadd.f32 %v6982_v59, %v943_v0 }
 0x1d5   : > { %v804_v46 = vmul.f32 0.5, %v803_v47 }
 0x1d6   : > { %v942_v51 = vmul.f32 %v6980_v57, %v925_v50  ;;  %v702_v55 = vpop.xlane.xlu1 %701 }
 0x1d7   : > { %v1138_v63 = vpop.f32.mrf.mxu0  ;;  %v805_v52 = vsub.f32 1.5, %v804_v46  ;;  %v726_v60 = vmul.f32 %v702_v55, %v6762_v32  ;;  %v7161_v62 = vpop.eup %6120 }
 0x1d8   : > { %v1207_v8 = vpop.f32.mrf.mxu1  ;;  %v959_v2 = vadd.f32 %v6982_v59, %v942_v51  ;;  %v1276_v9 = vmul.f32 0.17677669, %v1138_v63  ;;  %v812_v54 = vmul.f32 %v7161_v62, %v7153_v38  ;;  %vm818_vm12 = vweird.f32 %v7161_v62 }
 0x1d9   : > { %v6123_v3 = vpop.eup %6122  ;;  %v742_v14 = vadd.f32 1e-05, %v726_v60  ;;  %v806_v56 = vmul.f32 %v6119_v48, %v805_v52  ;;  %v1316_v15 = vpack.c.bf16 %v1207_v8, %v1207_v8  ;;  %vm7196_vm15 = vmor %vm817_vm11, %vm818_vm12 }
 0x1da   : > { %v792_v30 = vmul.f32 %v6123_v3, %v739_v58  ;;  %v7167_v17 = vpack.c.bf16 %v960_v39, %v959_v2  ;;  %v1292_v11 = vpack.c.bf16 %v1276_v9, %v1276_v9  ;;  %v813_v49 = vmul.f32 %v7161_v62, %v812_v54 }
 0x1db   : > { %6124 = vrsqrt.f32 %v742_v14  ;;  %v810_v23 = vsel %vm7169_vm7, %v6119_v48, %v806_v56  ;;  %vm798_vm8 = vweird.f32 %v6123_v3  ;;  %v1420_v28 = vunpack.c.l.b16 %v1316_v15 }
 0x1dc   : > { %v793_v22 = vmul.f32 %v6123_v3, %v792_v30  ;;  %1221 = vmatmul.bf16.gmra.mxu1 %v7167_v17  ;;  %v1372_v41 = vunpack.c.l.b16 %v1292_v11  ;;  %v916_v27 = vmul.f32 %v810_v23, %v7005_v19  ;;  %v814_v29 = vmul.f32 0.5, %v813_v49  ;;  %vm799_vm10 = vmor %vm797_vm9, %vm798_vm8 }
 0x1dd   : > { %vm827_vm13 = vweird.f32 %v742_v14 }
 0x1de   : > { %v794_v12 = vmul.f32 0.5, %v793_v22  ;;  %v933_v18 = vmul.f32 %v6980_v57, %v916_v27  ;;  %v815_v34 = vsub.f32 1.5, %v814_v29 }
 0x1df   : > { %v1140_v6 = vpop.f32.mrf.mxu0 }
 0x1e0   : > { %v1277_v5 = vmul.f32 0.17677669, %v1140_v6  ;;  %v795_v25 = vsub.f32 1.5, %v794_v12  ;;  %v1209_v26 = vpop.f32.mrf.mxu1  ;;  %v950_v38 = vadd.f32 %v6982_v59, %v933_v18  ;;  %v816_v47 = vmul.f32 %v7161_v62, %v815_v34 }
 0x1e1   : > { %v6125_v33 = vpop.eup %6124  ;;  %v1317_v31 = vpack.c.bf16 %v1209_v26, %v1209_v26 }
 0x1e2   : > { %v1293_v4 = vpack.c.bf16 %v1277_v5, %v1277_v5  ;;  %v796_v20 = vmul.f32 %v6123_v3, %v795_v25  ;;  %v822_v7 = vmul.f32 %v6125_v33, %v742_v14  ;;  %vm828_vm14 = vweird.f32 %v6125_v33 }
 0x1e3   : > { %v1421_v43 = vunpack.c.l.b16 %v1317_v31  ;;  %vm829_vm0 = vmor %vm827_vm13, %vm828_vm14  ;;  %v820_v52 = vsel %vm7196_vm15, %v7161_v62, %v816_v47 }
 0x1e4   : > { %v1373_v35 = vunpack.c.l.b16 %v1293_v4  ;;  %v800_v42 = vsel %vm799_vm10, %v6123_v3, %v796_v20  ;;  %v823_v13 = vmul.f32 %v6125_v33, %v822_v7  ;;  %v917_v14 = vmul.f32 %v820_v52, %v7061_v1 }
 0x1e5   : > { %v7180_v45 = vpack.c.b16 %v1421_v43, %v1420_v28  ;;  %v915_v53 = vmul.f32 %v800_v42, %v7080_v16 }
 0x1e6   : > { %v7178_v44 = vpack.c.b16 %v1373_v35, %v1372_v41  ;;  %v824_v19 = vmul.f32 0.5, %v823_v13  ;;  %v934_v21 = vmul.f32 %v6980_v57, %v917_v14 }
 0x1e7   : > { %v1143_v48 = vpop.f32.mrf.mxu0  ;;  %1831 = vrot.lane.b32.xlu1 %v7180_v45, %s6565_s18  ;;  %2858 = vrot.lane.b32.xlu0 %v7180_v45, %s6566_s21  ;;  %v932_v16 = vmul.f32 %v6980_v57, %v915_v53 }
 0x1e8   : > { %2355 = vrot.lane.b32.xlu2 %v7178_v44, %s6564_s17  ;;  %v825_v58 = vsub.f32 1.5, %v824_v19  ;;  %v1212_v61 = vpop.f32.mrf.mxu1  ;;  %v1278_v9 = vmul.f32 0.17677669, %v1143_v48  ;;  %v951_v23 = vadd.f32 %v6982_v59, %v934_v21 }
 0x1e9   : > { %v949_v40 = vadd.f32 %v6982_v59, %v932_v16  ;;  %v1318_v55 = vpack.c.bf16 %v1212_v61, %v1212_v61 }
 0x1ea   : > { %v826_v46 = vmul.f32 %v6125_v33, %v825_v58  ;;  %v1294_v11 = vpack.c.bf16 %v1278_v9, %v1278_v9 }
 0x1eb   : > { %v963_v63 = vpack.c.bf16 %v950_v38, %v949_v40  ;;  %v1422_v62 = vunpack.c.l.b16 %v1318_v55 }
 0x1ec   : > { %v830_v51 = vsel %vm829_vm0, %v6125_v33, %v826_v46  ;;  %v1374_v12 = vunpack.c.l.b16 %v1294_v11 }
 0x1ed   : > { %1147 = vmatmul.bf16.vlgmr.msra.gmra.mxu3 %v963_v63  ;;  %1196 = vmatmul.bf16.gmra.mxu0 %v963_v63  ;;  %v918_v60 = vmul.f32 %v830_v51, %v7112_v37 }
 0x1ee   : > { %1245 = vmatmul.bf16.gmra.mxu2 %v963_v63 }
 0x1ef   : > { %v1145_v0 = vpop.f32.mrf.mxu0  ;;  %2379 = vrot.lane.b32.xlu1 %v7180_v45, %s6564_s17  ;;  %1807 = vrot.lane.b32.xlu0 %v7178_v44, %s6565_s18  ;;  %v935_v56 = vmul.f32 %v6980_v57, %v918_v60 }
 0x1f0   : > { %2834 = vrot.lane.b32.xlu2 %v7178_v44, %s6566_s21  ;;  %v1214_v8 = vpop.f32.mrf.mxu1  ;;  %v1279_v2 = vmul.f32 0.17677669, %v1145_v0 }
 0x1f1   : > { %v1319_v3 = vpack.c.bf16 %v1214_v8, %v1214_v8  ;;  %v952_v1 = vadd.f32 %v6982_v59, %v935_v56 }
 0x1f2   : > { %v1295_v30 = vpack.c.bf16 %v1279_v2, %v1279_v2 }
 0x1f3   : > { %v1423_v39 = vunpack.c.l.b16 %v1319_v3  ;;  %v964_v49 = vpack.c.bf16 %v952_v1, %v951_v23 }
 0x1f4   : > { %v1375_v6 = vunpack.c.l.b16 %v1295_v30 }
 0x1f5   : > { %v7212_v54 = vpack.c.b16 %v1423_v39, %v1422_v62  ;;  %v1474_v62 = vsel %vm1436_vm1, %v7180_v45, 0 }
 0x1f6   : > { %v7223_v5 = vpack.c.b16 %v1375_v6, %v1374_v12 }
 0x1f7   : > { %v7214_v22 = vpop.f32.mrf.mxu0  ;;  %2381 = vrot.lane.b32.xlu0 %v7212_v54, %s6564_s17  ;;  %v1477_v0 = vsel %vm1436_vm1, %v7212_v54, 0 }
 0x1f8   : > { %1833 = vrot.lane.b32.xlu2 %v7212_v54, %s6565_s18  ;;  %v1217_v37 = vpop.f32.mrf.mxu1 }
 0x1f9   : > { %v1320_v26 = vpack.c.bf16 %v1217_v37, %v1217_v37 }
 0x1fb   : > { %v1424_v33 = vunpack.c.l.b16 %v1320_v26 }
 0x1fd   : > { %1152 = vmatmul.bf16.gmra.mxu3 %v964_v49  ;;  %1201 = vmatmul.bf16.gmra.mxu0 %v964_v49 }
 0x1fe   : > { %1250 = vmatmul.bf16.gmra.mxu2 %v964_v49 }
 0x1ff   : > { %v7225_v57 = vpop.f32.mrf.mxu0  ;;  %1809 = vrot.lane.b32.xlu0 %v7223_v5, %s6565_s18 }
 0x200   : > { %2860 = vrot.lane.b32.xlu2 %v7212_v54, %s6566_s21  ;;  %v1219_v15 = vpop.f32.mrf.mxu1 }
 0x201   : > { %v1321_v25 = vpack.c.bf16 %v1219_v15, %v1219_v15 }
 0x203   : > { %v1425_v59 = vunpack.c.l.b16 %v1321_v25 }
 0x205   : > { %v7233_v41 = vpack.c.b16 %v1425_v59, %v1424_v33  ;;  %v1309_v33 = vpack.c.bf16 %v7225_v57, %v7225_v57 }
 0x207   : > { %v1192_v4 = vpop.f32.mrf.mxu0  ;;  %v1480_v40 = vsel %vm1436_vm1, %v7233_v41, 0 }
 0x208   : > { %2357 = vrot.lane.b32.xlu2 %v7223_v5, %s6564_s17  ;;  %v1310_v20 = vpack.c.bf16 %v1192_v4, %v1192_v4 }
 0x20a   : > { %v1414_v7 = vunpack.c.l.b16 %v1310_v20  ;;  %v1308_v20 = vpack.c.bf16 %v7214_v22, %v7214_v22 }
 0x20c   : > { %v1412_v57 = vunpack.c.l.b16 %v1308_v20 }
 0x20d   : > { %1157 = vmatmul.bf16.gmra.mxu3 %v7102_v24 }
 0x20e   : > { %1255 = vmatmul.bf16.gmra.mxu2 %v7102_v24  ;;  %v7249_v24 = vpop.f32.mrf.mxu2 }
 0x20f   : > { %v1194_v31 = vpop.f32.mrf.mxu0 }
 0x210   : > { %v1311_v27 = vpack.c.bf16 %v1194_v31, %v1194_v31  ;;  %2862 = vrot.lane.b32.xlu2 %v7233_v41, %s6566_s21 }
 0x212   : > { %v1415_v29 = vunpack.c.l.b16 %v1311_v27 }
 0x214   : > { %v7239_v35 = vpack.c.b16 %v1415_v29, %v1414_v7 }
 0x216   : > { %v7251_v28 = vpop.f32.mrf.mxu2  ;;  %v1465_v22 = vsel %vm1436_vm1, %v7239_v35, 0 }
 0x218   : > { %1825 = vrot.lane.b32.xlu2 %v7239_v35, %s6565_s18 }
 0x21d   : > { %1162 = vmatmul.bf16.gmra.mxu3 %v7135_v36 }
 0x21e   : > { %1260 = vmatmul.bf16.gmra.mxu2 %v7135_v36  ;;  %v7253_v42 = vpop.f32.mrf.mxu2 }
 0x226   : > { %v7257_v19 = vpop.f32.mrf.mxu2 }
 0x22d   : > { %1167 = vmatmul.bf16.gmra.mxu3 %v7144_v10 }
 0x22e   : > { %1265 = vmatmul.bf16.gmra.mxu2 %v7144_v10 }
 0x23d   : > { %1172 = vmatmul.bf16.gmra.mxu3 %v7167_v17 }
 0x23e   : > { %1270 = vmatmul.bf16.gmra.mxu2 %v7167_v17 }
 0x259   : > { %v1222_v43 = vpop.f32.mrf.mxu1 }
 0x25a   : > { %v1322_v13 = vpack.c.bf16 %v1222_v43, %v1222_v43  ;;  %v1413_v43 = vunpack.c.l.b16 %v1309_v33 }
 0x25c   : > { %v1426_v18 = vunpack.c.l.b16 %v1322_v13  ;;  %v1428_v13 = vpack.c.b16 %v1413_v43, %v1412_v57 }
 0x261   : > { %v1224_v48 = vpop.f32.mrf.mxu1 }
 0x262   : > { %v1323_v53 = vpack.c.bf16 %v1224_v48, %v1224_v48 }
 0x264   : > { %v1427_v36 = vunpack.c.l.b16 %v1323_v53 }
 0x266   : > { %v7255_v34 = vpack.c.b16 %v1427_v36, %v1426_v18 }
 0x268   : > { %2385 = vrot.lane.b32.xlu2 %v7255_v34, %s6564_s17  ;;  %v1483_v17 = vsel %vm1436_vm1, %v7255_v34, 0 }
 0x269   : > { %1485 = vmatpush.bf16.xpose.msrb.mxu3 %v1483_v17 }
 0x26a   : > { %v1197_v10 = vpop.f32.mrf.mxu0 }
 0x26b   : > { %v1312_v1 = vpack.c.bf16 %v1197_v10, %v1197_v10 }
 0x26d   : > { %v1416_v25 = vunpack.c.l.b16 %v1312_v1 }
 0x270   : > { %v1148_v16 = vpop.f32.mrf.mxu3 }
 0x271   : > { %v7263_v58 = vpop.f32.mrf.mxu2  ;;  %1486 = vmatpush.bf16.xpose.msrb.mxu3 %v1480_v40  ;;  %v1280_v38 = vmul.f32 0.17677669, %v1148_v16  ;;  %v1462_v40 = vsel %vm1436_vm1, %v1428_v13, 0 }
 0x272   : > { %v1199_v61 = vpop.f32.mrf.mxu0 }
 0x273   : > { %v1296_v50 = vpack.c.bf16 %v1280_v38, %v1280_v38  ;;  %v1313_v21 = vpack.c.bf16 %v1199_v61, %v1199_v61 }
 0x275   : > { %v1376_v55 = vunpack.c.l.b16 %v1296_v50  ;;  %v1417_v49 = vunpack.c.l.b16 %v1313_v21 }
 0x277   : > { %v7289_v59 = vpack.c.b16 %v1417_v49, %v1416_v25 }
 0x278   : > { %v1150_v47 = vpop.f32.mrf.mxu3 }
 0x279   : > { %v1281_v46 = vmul.f32 0.17677669, %v1150_v47  ;;  %v7267_v63 = vpop.f32.mrf.mxu2  ;;  %1487 = vmatpush.bf16.xpose.msrb.mxu3 %v1477_v0  ;;  %v1468_v7 = vsel %vm1436_vm1, %v7289_v59, 0 }
 0x27a   : > { %v1202_v51 = vpop.f32.mrf.mxu0 }
 0x27b   : > { %v1297_v52 = vpack.c.bf16 %v1281_v46, %v1281_v46  ;;  %v1314_v3 = vpack.c.bf16 %v1202_v51, %v1202_v51 }
 0x27d   : > { %v1377_v60 = vunpack.c.l.b16 %v1297_v52  ;;  %v1418_v56 = vunpack.c.l.b16 %v1314_v3 }
 0x27f   : > { %v7271_v8 = vpack.c.b16 %v1377_v60, %v1376_v55 }
 0x280   : > { %v1153_v2 = vpop.f32.mrf.mxu3 }
 0x281   : > { %v7273_v14 = vpop.f32.mrf.mxu2  ;;  %1811 = vrot.lane.b32.xlu1 %v7271_v8, %s6565_s18  ;;  %1488 = vmatpush.bf16.xpose.msrb.mxu3 %v1474_v62  ;;  %v1282_v30 = vmul.f32 0.17677669, %v1153_v2 }
 0x282   : > { %v1204_v9 = vpop.f32.mrf.mxu0 }
 0x283   : > { %v1315_v39 = vpack.c.bf16 %v1204_v9, %v1204_v9  ;;  %v1298_v6 = vpack.c.bf16 %v1282_v30, %v1282_v30 }
 0x285   : > { %v1419_v54 = vunpack.c.l.b16 %v1315_v39  ;;  %v1378_v4 = vunpack.c.l.b16 %v1298_v6 }
 0x287   : > { %v7279_v11 = vpack.c.b16 %v1419_v54, %v1418_v56 }
 0x288   : > { %v1155_v37 = vpop.f32.mrf.mxu3 }
 0x289   : > { %v1283_v23 = vmul.f32 0.17677669, %v1155_v37  ;;  %v7281_v12 = vpop.f32.mrf.mxu2  ;;  %2836 = vrot.lane.b32.xlu1 %v7223_v5, %s6566_s21  ;;  %2377 = vrot.lane.b32.xlu2 %v7279_v11, %s6564_s17  ;;  %v1471_v45 = vsel %vm1436_vm1, %v7279_v11, 0 }
 0x28a   : > { %1489 = vmatpush.bf16.xpose.msrb.mxu3 %v1471_v45 }
 0x28b   : > { %v1299_v15 = vpack.c.bf16 %v1283_v23, %v1283_v23 }
 0x28d   : > { %v1379_v26 = vunpack.c.l.b16 %v1299_v15 }
 0x28f   : > { %v7293_v31 = vpack.c.b16 %v1379_v26, %v1378_v4 }
 0x290   : > { %v1158_v27 = vpop.f32.mrf.mxu3 }
 0x291   : > { %v7297_v29 = vpop.f32.mrf.mxu2  ;;  %1835 = vrot.lane.b32.xlu1 %v7233_v41, %s6565_s18  ;;  %1813 = vrot.lane.b32.xlu0 %v7293_v31, %s6565_s18  ;;  %v1284_v36 = vmul.f32 0.17677669, %v1158_v27 }
 0x292   : > { %1490 = vmatpush.bf16.xpose.msrb.mxu3 %v1468_v7 }
 0x293   : > { %v1300_v16 = vpack.c.bf16 %v1284_v36, %v1284_v36 }
 0x298   : > { %v1160_v48 = vpop.f32.mrf.mxu3 }
 0x299   : > { %v7305_v53 = vpop.f32.mrf.mxu2  ;;  %1823 = vrot.lane.b32.xlu1 %v1428_v13, %s6565_s18  ;;  %2383 = vrot.lane.b32.xlu0 %v7233_v41, %s6564_s17  ;;  %v1285_v18 = vmul.f32 0.17677669, %v1160_v48  ;;  %v1380_v41 = vunpack.c.l.b16 %v1300_v16 }
 0x29a   : > { %1491 = vmatpush.bf16.xpose.msrb.mxu3 %v1465_v22 }
 0x29b   : > { %v1301_v10 = vpack.c.bf16 %v1285_v18, %v1285_v18 }
 0x29d   : > { %v1381_v38 = vunpack.c.l.b16 %v1301_v10  ;;  %v1333_v10 = vpack.c.bf16 %v7305_v53, %v7305_v53 }
 0x29f   : > { %v7317_v47 = vpack.c.b16 %v1381_v38, %v1380_v41  ;;  %v1727_v41 = vunpack.c.l.b16 %v1333_v10 }
 0x2a0   : > { %v1163_v17 = vpop.f32.mrf.mxu3 }
 0x2a1   : > { %v7312_v61 = vpop.f32.mrf.mxu2  ;;  %2371 = vrot.lane.b32.xlu1 %v1428_v13, %s6564_s17  ;;  %2850 = vrot.lane.b32.xlu0 %v1428_v13, %s6566_s21  ;;  %v1286_v0 = vmul.f32 0.17677669, %v1163_v17 }
 0x2a2   : > { %1492 = vmatpush.bf16.xpose.msrb.mxu3 %v1462_v40  ;;  %v1334_v18 = vpack.c.bf16 %v7312_v61, %v7312_v61  ;;  %v1332_v40 = vpack.c.bf16 %v7297_v29, %v7297_v29  ;;  %v1331_v61 = vpack.c.bf16 %v7281_v12, %v7281_v12  ;;  %v1329_v29 = vpack.c.bf16 %v7267_v63, %v7267_v63 }
 0x2a3   : > { %v1302_v60 = vpack.c.bf16 %v1286_v0, %v1286_v0  ;;  %v1328_v12 = vpack.c.bf16 %v7263_v58, %v7263_v58  ;;  %v1326_v63 = vpack.c.bf16 %v7253_v42, %v7253_v42  ;;  %v1325_v58 = vpack.c.bf16 %v7251_v28, %v7251_v28  ;;  %v1832_v28 = vpop.permute.xlu1 %1831 }
 0x2a4   : > { %v1728_v38 = vunpack.c.l.b16 %v1334_v18  ;;  %v1725_v53 = vunpack.c.l.b16 %v1331_v61 }
 0x2a5   : > { %v1382_v9 = vunpack.c.l.b16 %v1302_v60 }
 0x2a8   : > { %v1165_v50 = vpop.f32.mrf.mxu3 }
 0x2a9   : > { %v1263_v46 = vpop.f32.mrf.mxu2  ;;  %2864 = vrot.lane.b32.xlu1 %v7255_v34, %s6566_s21  ;;  %1815 = vrot.lane.b32.xlu0 %v7317_v47, %s6565_s18  ;;  %v1287_v51 = vmul.f32 0.17677669, %v1165_v50 }
 0x2aa   : > { %5467 = vmatmul.msk.bf16.vlgmr.msrb.gmra.mxu3 %vm1436_vm1, %v7178_v44  ;;  %v1335_v57 = vpack.c.bf16 %v1263_v46, %v1263_v46  ;;  %v1330_v46 = vpack.c.bf16 %v7273_v14, %v7273_v14  ;;  %v7385_v14 = vpop.permute.xlu0 %2858 }
 0x2ab   : > { %v1303_v52 = vpack.c.bf16 %v1287_v51, %v1287_v51  ;;  %v1726_v51 = vunpack.c.l.b16 %v1332_v40 }
 0x2ac   : > { %v1729_v17 = vunpack.c.l.b16 %v1335_v57 }
 0x2ad   : > { %v1383_v3 = vunpack.c.l.b16 %v1303_v52  ;;  %v7378_v0 = vpack.c.b16 %v1727_v41, %v1726_v51  ;;  %v1724_v52 = vunpack.c.l.b16 %v1330_v46 }
 0x2ae   : > { %v7369_v50 = vpack.c.b16 %v1729_v17, %v1728_v38 }
 0x2af   : > { %v7329_v62 = vpack.c.b16 %v1383_v3, %v1382_v9  ;;  %v7389_v60 = vpack.c.b16 %v1725_v53, %v1724_v52  ;;  %v1876_v53 = vsel %vm1436_vm1, %v1832_v28, 0 }
 0x2b0   : > { %v1168_v55 = vpop.f32.mrf.mxu3 }
 0x2b1   : > { %v1266_v2 = vpop.f32.mrf.mxu2  ;;  %2852 = vrot.lane.b32.xlu1 %v7239_v35, %s6566_s21  ;;  %1837 = vrot.lane.b32.xlu0 %v7255_v34, %s6565_s18  ;;  %v1288_v54 = vmul.f32 0.17677669, %v1168_v55  ;;  %v1723_v55 = vunpack.c.l.b16 %v1329_v29 }
 0x2b2   : > { %v1336_v26 = vpack.c.bf16 %v1266_v2, %v1266_v2  ;;  %v1722_v2 = vunpack.c.l.b16 %v1328_v12 }
 0x2b3   : > { %v1304_v6 = vpack.c.bf16 %v1288_v54, %v1288_v54  ;;  %v7413_v54 = vpop.permute.xlu1 %2379 }
 0x2b4   : > { %v1730_v36 = vunpack.c.l.b16 %v1336_v26  ;;  %v7396_v9 = vpack.c.b16 %v1723_v55, %v1722_v2 }
 0x2b5   : > { %v1384_v20 = vunpack.c.l.b16 %v1304_v6 }
 0x2b8   : > { %v1170_v39 = vpop.f32.mrf.mxu3 }
 0x2b9   : > { %v1268_v56 = vpop.f32.mrf.mxu2  ;;  %2373 = vrot.lane.b32.xlu0 %v7239_v35, %s6564_s17  ;;  %1817 = vrot.lane.b32.xlu1 %v7329_v62, %s6565_s18  ;;  %v1289_v34 = vmul.f32 0.17677669, %v1170_v39  ;;  %v1324_v39 = vpack.c.bf16 %v7249_v24, %v7249_v24 }
 0x2ba   : > { %5468 = vmatmul.msk.bf16.gmra.mxu3 %vm1436_vm1, %v7223_v5  ;;  %v1337_v5 = vpack.c.bf16 %v1268_v56, %v1268_v56  ;;  %v1720_v56 = vunpack.c.l.b16 %v1326_v63 }
 0x2bb   : > { %v1305_v1 = vpack.c.bf16 %v1289_v34, %v1289_v34  ;;  %v1718_v42 = vunpack.c.l.b16 %v1324_v39 }
 0x2bc   : > { %v1731_v13 = vunpack.c.l.b16 %v1337_v5  ;;  %v7435_v5 = vpop.permute.xlu2 %2355 }
 0x2bd   : > { %v1385_v25 = vunpack.c.l.b16 %v1305_v1 }
 0x2be   : > { %v7362_v16 = vpack.c.b16 %v1731_v13, %v1730_v36 }
 0x2c0   : > { %v1173_v44 = vpop.f32.mrf.mxu3 }
 0x2c1   : > { %v1271_v30 = vpop.f32.mrf.mxu2  ;;  %2375 = vrot.lane.b32.xlu0 %v7289_v59, %s6564_s17  ;;  %1827 = vrot.lane.b32.xlu1 %v7289_v59, %s6565_s18  ;;  %v1290_v21 = vmul.f32 0.17677669, %v1173_v44 }
 0x2c2   : > { %v1338_v37 = vpack.c.bf16 %v1271_v30, %v1271_v30  ;;  %v7403_v30 = vpop.permute.xlu0 %1807 }
 0x2c3   : > { %v1306_v23 = vpack.c.bf16 %v1290_v21, %v1290_v21 }
 0x2c4   : > { %v1732_v33 = vunpack.c.l.b16 %v1338_v37 }
 0x2c5   : > { %v1386_v7 = vunpack.c.l.b16 %v1306_v23 }
 0x2c8   : > { %v1175_v35 = vpop.f32.mrf.mxu3 }
 0x2c9   : > { %v1291_v45 = vmul.f32 0.17677669, %v1175_v35  ;;  %v1273_v49 = vpop.f32.mrf.mxu2  ;;  %2854 = vrot.lane.b32.xlu0 %v7289_v59, %s6566_s21  ;;  %2856 = vrot.lane.b32.xlu1 %v7279_v11, %s6566_s21  ;;  %v7349_v59 = vpack.c.b16 %v1385_v25, %v1384_v20 }
 0x2ca   : > { %v1339_v15 = vpack.c.bf16 %v1273_v49, %v1273_v49  ;;  %5469 = vmatmul.msk.bf16.gmra.mxu3 %vm1436_vm1, %v7271_v8  ;;  %v7411_v24 = vpop.permute.xlu0 %2381 }
 0x2cb   : > { %v1307_v4 = vpack.c.bf16 %v1291_v45, %v1291_v45 }
 0x2cc   : > { %v1733_v27 = vunpack.c.l.b16 %v1339_v15 }
 0x2cd   : > { %v1387_v43 = vunpack.c.l.b16 %v1307_v4  ;;  %v565_v4 = vlaneseq }
 0x2ce   : > { %v7347_v48 = vpack.c.b16 %v1733_v27, %v1732_v33  ;;  %v7440_v33 = vpop.permute.xlu2 %2834 }
 0x2cf   : > { %v7351_v22 = vpack.c.b16 %v1387_v43, %v1386_v7  ;;  %9803 = vst [vmem:[#allocation20_spill] sm:$0xff] %v7440_v33  ;;  %v7442_v27 = vshrl.u32 %v565_v4, 7  ;;  %v7444_v20 = vand.u32 127, %v565_v4 }
 0x2d0   : > { %1750 = vmatpush.bf16.msra.mxu0 %v7347_v48 }
 0x2d1   : > { %1819 = vrot.lane.b32.xlu0 %v7349_v59, %s6565_s18  ;;  %1821 = vrot.lane.b32.xlu1 %v7351_v22, %s6565_s18  ;;  %vm584_vm2 = vcmp.le.s32.totalorder %v7444_v20, %v7442_v27  ;;  %v7460_v36 = vadd.s32 8, %v7442_v27  ;;  %v7476_v46 = vadd.s32 16, %v7442_v27  ;;  %v7494_v55 = vadd.s32 24, %v7442_v27 }
 0x2d2   : > { %v7417_v21 = vpop.permute.xlu0 %1809  ;;  %v7525_v4 = vadd.s32 40, %v7442_v27 }
 0x2d3   : > { %vm585_vm3 = vcmp.le.s32.totalorder %v7444_v20, %v7460_v36  ;;  %vm586_vm4 = vcmp.le.s32.totalorder %v7444_v20, %v7476_v46  ;;  %vm587_vm5 = vcmp.le.s32.totalorder %v7444_v20, %v7494_v55 }
 0x2d4   : > { %1751 = vmatpush.bf16.msra.mxu0 %v7362_v16  ;;  %vm589_vm7 = vcmp.le.s32.totalorder %v7444_v20, %v7525_v4 }
 0x2d6   : > { %v1834_v10 = vpop.permute.xlu2 %1833 }
 0x2d7   : > { %v1879_v38 = vsel %vm1436_vm1, %v1834_v10, 0 }
 0x2d8   : > { %1752 = vmatpush.bf16.msra.mxu0 %v7369_v50 }
 0x2d9   : > { %1829 = vrot.lane.b32.xlu0 %v7279_v11, %s6565_s18  ;;  %v1327_v11 = vpack.c.bf16 %v7257_v19, %v7257_v19  ;;  %v1719_v19 = vunpack.c.l.b16 %v1325_v58 }
 0x2da   : > { %5470 = vmatmul.msk.bf16.gmra.mxu3 %vm1436_vm1, %v7293_v31 }
 0x2db   : > { %v1721_v3 = vunpack.c.l.b16 %v1327_v11  ;;  %v7406_v34 = vpack.c.b16 %v1719_v19, %v1718_v42 }
 0x2dc   : > { %1753 = vmatpush.bf16.msra.mxu0 %v7378_v0 }
 0x2dd   : > { %v7401_v44 = vpack.c.b16 %v1721_v3, %v1720_v56  ;;  %v7511_v56 = vadd.s32 32, %v7442_v27 }
 0x2de   : > { %v7478_v51 = vpop.permute.xlu2 %2860 }
 0x2df   : > { %vm588_vm6 = vcmp.le.s32.totalorder %v7444_v20, %v7511_v56 }
 0x2e0   : > { %1754 = vmatpush.bf16.msra.mxu0 %v7389_v60 }
 0x2e4   : > { %1755 = vmatpush.bf16.msra.mxu0 %v7396_v9 }
 0x2e6   : > { %v7500_v2 = vpop.permute.xlu2 %2357 }
 0x2e8   : > { %1756 = vmatpush.bf16.msra.mxu0 %v7401_v44 }
 0x2ea   : > { %5471 = vmatmul.msk.bf16.gmra.mxu3 %vm1436_vm1, %v7317_v47 }
 0x2ec   : > { %1757 = vmatpush.bf16.msra.mxu0 %v7406_v34 }
 0x2f3   : > { %v7419_v1 = vpop.permute.xlu1 %1811 }
 0x2fa   : > { %5472 = vmatmul.msk.bf16.gmra.mxu3 %vm1436_vm1, %v7329_v62 }
 0x2fb   : > { %v7425_v35 = vpop.permute.xlu1 %2836 }
 0x2fc   : > { %9802 = vst [vmem:[#allocation19_spill] sm:$0xff] %v7425_v35 }
 0x303   : > { %v7421_v37 = vpop.permute.xlu0 %1813  ;;  %v1836_v45 = vpop.permute.xlu1 %1835 }
 0x304   : > { %v1882_v57 = vsel %vm1436_vm1, %v1836_v45, 0 }
 0x30a   : > { %5473 = vmatmul.msk.bf16.gmra.mxu3 %vm1436_vm1, %v7349_v59 }
 0x30b   : > { %v7427_v6 = vpop.permute.xlu0 %2383  ;;  %v7437_v15 = vpop.permute.xlu1 %1823 }
 0x313   : > { %v7429_v23 = vpop.permute.xlu0 %2850  ;;  %v7446_v7 = vpop.permute.xlu1 %2371 }
 0x31a   : > { %5474 = vmatmul.msk.bf16.gmra.mxu3 %vm1436_vm1, %v7351_v22 }
 0x31b   : > { %v7433_v49 = vpop.permute.xlu0 %1815  ;;  %v7462_v17 = vpop.permute.xlu1 %2864 }
 0x323   : > { %v1838_v25 = vpop.permute.xlu0 %1837  ;;  %v7485_v12 = vpop.permute.xlu1 %2852 }
 0x324   : > { %v1885_v26 = vsel %vm1436_vm1, %v1838_v25, 0  ;;  %v7521_v25 = vpop.permute.xlu2 %2862 }
 0x325   : > { %1887 = vmatpush.bf16.xpose.msrb.mxu1 %v1885_v26 }
 0x32b   : > { %v7448_v43 = vpop.permute.xlu0 %2373  ;;  %v7507_v39 = vpop.permute.xlu1 %1817 }
 0x32d   : > { %v1494_v13 = vpop.f32.mrf.mxu3  ;;  %1888 = vmatpush.bf16.xpose.msrb.mxu1 %v1882_v57 }
 0x32e   : > { %v7456_v18 = vsel %vm584_vm2, %v1494_v13, -1e+30 }
 0x32f   : > { %1550 = vmax.xlane.f32.xlu2 %v7456_v18 }
 0x333   : > { %v7464_v40 = vpop.permute.xlu0 %2375  ;;  %v1828_v26 = vpop.permute.xlu1 %1827 }
 0x334   : > { %v1870_v57 = vsel %vm1436_vm1, %v1828_v26, 0 }
 0x335   : > { %v1496_v61 = vpop.f32.mrf.mxu3  ;;  %1889 = vmatpush.bf16.xpose.msrb.mxu1 %v1879_v38  ;;  %v7537_v38 = vadd.s32 48, %v7442_v27 }
 0x336   : > { %v7472_v41 = vsel %vm585_vm3, %v1496_v61, -1e+30  ;;  %v1826_v61 = vpop.permute.xlu2 %1825 }
 0x337   : > { %1552 = vmax.xlane.f32.xlu0 %v7472_v41  ;;  %vm590_vm8 = vcmp.le.s32.totalorder %v7444_v20, %v7537_v38 }
 0x33b   : > { %v7480_v29 = vpop.permute.xlu0 %2854  ;;  %v7663_v35 = vpop.permute.xlu1 %2856 }
 0x33d   : > { %v1499_v52 = vpop.f32.mrf.mxu3  ;;  %1890 = vmatpush.bf16.xpose.msrb.mxu1 %v1876_v53  ;;  %v1867_v53 = vsel %vm1436_vm1, %v1826_v61, 0  ;;  %v7563_v61 = vadd.s32 64, %v7442_v27 }
 0x33e   : > { %v7490_v11 = vsel %vm586_vm4, %v1499_v52, -1e+30 }
 0x33f   : > { %1554 = vmax.xlane.f32.xlu1 %v7490_v11  ;;  %vm592_vm10 = vcmp.le.s32.totalorder %v7444_v20, %v7563_v61 }
 0x343   : > { %v7496_v63 = vpop.permute.xlu0 %1819 }
 0x345   : > { %v1501_v58 = vpop.f32.mrf.mxu3 }
 0x346   : > { %v7505_v3 = vsel %vm587_vm5, %v1501_v58, -1e+30 }
 0x347   : > { %1556 = vmax.xlane.f32.xlu2 %v7505_v3 }
 0x34b   : > { %v1830_v19 = vpop.permute.xlu0 %1829 }
 0x34c   : > { %v1873_v42 = vsel %vm1436_vm1, %v1830_v19, 0  ;;  %v7549_v19 = vadd.s32 56, %v7442_v27 }
 0x34d   : > { %v1504_v28 = vpop.f32.mrf.mxu3  ;;  %1891 = vmatpush.bf16.xpose.msrb.mxu1 %v1873_v42  ;;  %v2386_v42 = vpop.permute.xlu2 %2385 }
 0x34e   : > { %v7519_v45 = vsel %vm588_vm6, %v1504_v28, -1e+30  ;;  %vm591_vm9 = vcmp.le.s32.totalorder %v7444_v20, %v7549_v19  ;;  %v1864_v28 = vsel %vm1436_vm1, %v7437_v15, 0  ;;  %v2433_v26 = vsel %vm1436_vm1, %v2386_v42, 0 }
 0x34f   : > { %1558 = vmax.xlane.f32.xlu0 %v7519_v45  ;;  %v7578_v42 = vadd.s32 72, %v7442_v27 }
 0x351   : > { %9804 = vst [vmem:[#allocation21_spill] sm:$0xff] %v7578_v42  ;;  %vm593_vm11 = vcmp.le.s32.totalorder %v7444_v20, %v7578_v42 }
 0x355   : > { %v1506_v13 = vpop.f32.mrf.mxu3  ;;  %1892 = vmatpush.bf16.xpose.msrb.mxu1 %v1870_v57 }
 0x356   : > { %v7533_v10 = vsel %vm589_vm7, %v1506_v13, -1e+30 }
 0x357   : > { %1560 = vmax.xlane.f32.xlu1 %v7533_v10 }
 0x35d   : > { %v1509_v52 = vpop.f32.mrf.mxu3  ;;  %1893 = vmatpush.bf16.xpose.msrb.mxu1 %v1867_v53  ;;  %v2430_v53 = vsel %vm1436_vm1, %v7427_v6, 0 }
 0x35e   : > { %v7545_v58 = vsel %vm590_vm8, %v1509_v52, -1e+30 }
 0x35f   : > { %1562 = vmax.xlane.f32.xlu2 %v7545_v58 }
 0x365   : > { %v1511_v57 = vpop.f32.mrf.mxu3  ;;  %1894 = vmatpush.bf16.xpose.msrb.mxu1 %v1864_v28 }
 0x366   : > { %v7559_v13 = vsel %vm591_vm9, %v1511_v57, -1e+30 }
 0x367   : > { %1564 = vmax.xlane.f32.xlu0 %v7559_v13 }
 0x36c   : > { %5475 = vmatmul.msk.bf16.vlgmr.msrb.gmra.mxu1 %vm1436_vm1, %v7403_v30  ;;  %v2427_v30 = vsel %vm1436_vm1, %v7411_v24, 0  ;;  %v2424_v24 = vsel %vm1436_vm1, %v7413_v54, 0 }
 0x36d   : > { %2435 = vmatpush.bf16.xpose.msra.mxu1 %v2433_v26  ;;  %v1514_v15 = vpop.f32.mrf.mxu3  ;;  %v7591_v26 = vadd.s32 80, %v7442_v27 }
 0x36e   : > { %v7574_v52 = vsel %vm592_vm10, %v1514_v15, -1e+30 }
 0x36f   : > { %1566 = vmax.xlane.f32.xlu0 %v7574_v52  ;;  %vm594_vm12 = vcmp.le.s32.totalorder %v7444_v20, %v7591_v26 }
 0x375   : > { %2436 = vmatpush.bf16.xpose.msra.mxu1 %v2430_v53  ;;  %v1516_v28 = vpop.f32.mrf.mxu3  ;;  %v7606_v53 = vadd.s32 88, %v7442_v27 }
 0x376   : > { %v7587_v6 = vsel %vm593_vm11, %v1516_v28, -1e+30  ;;  %v2378_v28 = vpop.permute.xlu2 %2377 }
 0x377   : > { %1568 = vmax.xlane.f32.xlu1 %v7587_v6  ;;  %9805 = vst [vmem:[#allocation22_spill] sm:$0xff] %v7606_v53  ;;  %vm595_vm13 = vcmp.le.s32.totalorder %v7444_v20, %v7606_v53 }
 0x37c   : > { %5476 = vmatmul.msk.bf16.gmra.mxu1 %vm1436_vm1, %v7417_v21 }
 0x37d   : > { %2437 = vmatpush.bf16.xpose.msra.mxu1 %v2427_v30  ;;  %v1519_v57 = vpop.f32.mrf.mxu3  ;;  %v2421_v30 = vsel %vm1436_vm1, %v2378_v28, 0  ;;  %v2418_v28 = vsel %vm1436_vm1, %v7464_v40, 0 }
 0x37e   : > { %v7602_v15 = vsel %vm594_vm12, %v1519_v57, -1e+30  ;;  %v7618_v57 = vadd.s32 96, %v7442_v27 }
 0x37f   : > { %1570 = vmax.xlane.f32.xlu1 %v7602_v15 }
 0x380   : > { %9806 = vst [vmem:[#allocation23_spill] sm:$0xff] %v7618_v57  ;;  %vm9754_vm14 = vcmp.le.s32.totalorder %v7444_v20, %v7618_v57 }
 0x385   : > { %2438 = vmatpush.bf16.xpose.msra.mxu1 %v2424_v24  ;;  %v1521_v21 = vpop.f32.mrf.mxu3 }
 0x386   : > { %v7614_v54 = vsel %vm595_vm13, %v1521_v21, -1e+30 }
 0x387   : > { %1572 = vmax.xlane.f32.xlu2 %v7614_v54 }
 0x38c   : > { %5477 = vmatmul.msk.bf16.gmra.mxu1 %vm1436_vm1, %v7419_v1  ;;  %v2415_v1 = vsel %vm1436_vm1, %v7448_v43, 0  ;;  %v2412_v43 = vsel %vm1436_vm1, %v7446_v7, 0 }
 0x38d   : > { %2439 = vmatpush.bf16.xpose.msra.mxu1 %v2421_v30  ;;  %v1524_v24 = vpop.f32.mrf.mxu3  ;;  %v7633_v30 = vadd.s32 104, %v7442_v27 }
 0x38e   : > { %v7629_v21 = vsel %vm9754_vm14, %v1524_v24, -1e+30  ;;  %v7646_v24 = vadd.s32 112, %v7442_v27 }
 0x38f   : > { %1574 = vmax.xlane.f32.xlu2 %v7629_v21  ;;  %9807 = vst [vmem:[#allocation24_spill] sm:$0xff] %v7633_v30  ;;  %vm9767_vm15 = vcmp.le.s32.totalorder %v7444_v20, %v7633_v30 }
 0x390   : > { %9808 = vst [vmem:[#allocation25_spill] sm:$0xff] %v7646_v24  ;;  %vm598_vm0 = vcmp.le.s32.totalorder %v7444_v20, %v7646_v24 }
 0x395   : > { %2440 = vmatpush.bf16.xpose.msra.mxu1 %v2418_v28  ;;  %v1526_v32 = vpop.f32.mrf.mxu3 }
 0x396   : > { %v7642_v40 = vsel %vm9767_vm15, %v1526_v32, -1e+30 }
 0x397   : > { %1576 = vmax.xlane.f32.xlu0 %v7642_v40 }
 0x39c   : > { %5478 = vmatmul.msk.bf16.gmra.mxu1 %vm1436_vm1, %v7421_v37 }
 0x39d   : > { %2441 = vmatpush.bf16.xpose.msra.mxu1 %v2415_v1  ;;  %v1529_v28 = vpop.f32.mrf.mxu3  ;;  %v7661_v1 = vadd.s32 120, %v7442_v27 }
 0x39e   : > { %v7657_v32 = vsel %vm598_vm0, %v1529_v28, -1e+30 }
 0x39f   : > { %1578 = vmax.xlane.f32.xlu2 %v7657_v32  ;;  %9809 = vst [vmem:[#allocation26_spill] sm:$0xff] %v7661_v1  ;;  %vm599_vm14 = vcmp.le.s32.totalorder %v7444_v20, %v7661_v1 }
 0x3a2   : > { %v1551_v33 = vpop.xlane.xlu2 %1550 }
 0x3a3   : > { %v1582_v37 = vsub.f32 %v7456_v18, %v1551_v33 }
 0x3a5   : > { %2442 = vmatpush.bf16.xpose.msra.mxu1 %v2412_v43  ;;  %v1598_v7 = vmul.f32 1.442695, %v1582_v37  ;;  %v1531_v57 = vpop.f32.mrf.mxu3  ;;  %v1822_v43 = vpop.permute.xlu1 %1821 }
 0x3a6   : > { %v7671_v28 = vsel %vm599_vm14, %v1531_v57, -1e+30 }
 0x3a7   : > { %6126 = vpow2.f32 %v1598_v7  ;;  %1580 = vmax.xlane.f32.xlu2 %v7671_v28 }
 0x3aa   : > { %v1553_v24 = vpop.xlane.xlu0 %1552 }
 0x3ab   : > { %v1583_v53 = vsub.f32 %v7472_v41, %v1553_v24 }
 0x3ac   : > { %5479 = vmatmul.msk.bf16.gmra.mxu1 %vm1436_vm1, %v7433_v49 }
 0x3ad   : > { %v7677_v33 = vpop.eup %6126  ;;  %v1600_v18 = vmul.f32 1.442695, %v1583_v53 }
 0x3ae   : > { %1630 = vadd.xlane.f32.xlu1 %v7677_v33 }
 0x3af   : > { %6128 = vpow2.f32 %v1600_v18 }
 0x3b2   : > { %v1555_v37 = vpop.xlane.xlu1 %1554 }
 0x3b3   : > { %v1584_v57 = vsub.f32 %v7490_v11, %v1555_v37 }
 0x3b5   : > { %v7681_v30 = vpop.eup %6128  ;;  %v1602_v7 = vmul.f32 1.442695, %v1584_v57 }
 0x3b6   : > { %1632 = vadd.xlane.f32.xlu2 %v7681_v30 }
 0x3b7   : > { %6130 = vpow2.f32 %v1602_v7 }
 0x3ba   : > { %v1557_v42 = vpop.xlane.xlu2 %1556 }
 0x3bb   : > { %v1585_v41 = vsub.f32 %v7505_v3, %v1557_v42 }
 0x3bc   : > { %5480 = vmatmul.msk.bf16.gmra.mxu1 %vm1436_vm1, %v7507_v39 }
 0x3bd   : > { %v7687_v49 = vpop.eup %6130  ;;  %v1604_v53 = vmul.f32 1.442695, %v1585_v41 }
 0x3be   : > { %1634 = vadd.xlane.f32.xlu2 %v7687_v49 }
 0x3bf   : > { %6132 = vpow2.f32 %v1604_v53 }
 0x3c2   : > { %v1559_v24 = vpop.xlane.xlu0 %1558 }
 0x3c3   : > { %v1586_v11 = vsub.f32 %v7519_v45, %v1559_v24 }
 0x3c5   : > { %v7691_v18 = vpop.eup %6132  ;;  %v1606_v37 = vmul.f32 1.442695, %v1586_v11 }
 0x3c6   : > { %1636 = vadd.xlane.f32.xlu0 %v7691_v18 }
 0x3c7   : > { %6134 = vpow2.f32 %v1606_v37 }
 0x3ca   : > { %v1561_v42 = vpop.xlane.xlu1 %1560 }
 0x3cc   : > { %5481 = vmatmul.msk.bf16.gmra.mxu1 %vm1436_vm1, %v7496_v63 }
 0x3cd   : > { %v7696_v3 = vpop.eup %6134 }
 0x3ce   : > { %1638 = vadd.xlane.f32.xlu0 %v7696_v3 }
 0x3d6   : > { %2838 = vrot.lane.b32.xlu2 %v7271_v8, %s6566_s21 }
 0x3da   : > { %v1565_v11 = vpop.xlane.xlu0 %1564 }
 0x3dc   : > { %5482 = vmatmul.msk.bf16.gmra.mxu1 %vm1436_vm1, %v1822_v43  ;;  %v1563_v43 = vpop.xlane.xlu2 %1562 }
 0x3de   : > { %2361 = vrot.lane.b32.xlu2 %v7293_v31, %s6564_s17 }
 0x3e2   : > { %2359 = vrot.lane.b32.xlu0 %v7271_v8, %s6564_s17  ;;  %v1587_v8 = vsub.f32 %v7533_v10, %v1561_v42 }
 0x3e4   : > { %v1608_v7 = vmul.f32 1.442695, %v1587_v8 }
 0x3e6   : > { %2840 = vrot.lane.b32.xlu2 %v7293_v31, %s6566_s21  ;;  %6136 = vpow2.f32 %v1608_v7 }
 0x3e9   : > { %v1896_v39 = vpop.f32.mrf.mxu1 }
 0x3ea   : > { %v7711_v63 = vsel %vm584_vm2, %v1896_v39, -1e+30  ;;  %v1569_v31 = vpop.xlane.xlu1 %1568 }
 0x3eb   : > { %1952 = vmax.xlane.f32.xlu1 %v7711_v63  ;;  %v1591_v10 = vsub.f32 %v7587_v6, %v1569_v31 }
 0x3ec   : > { %5515 = vmatmul.msk.bf16.vlgmr.msra.gmra.mxu1 %vm1436_vm1, %v7435_v5  ;;  %v1588_v5 = vsub.f32 %v7545_v58, %v1563_v43  ;;  %v7728_v8 = vpop.eup %6136 }
 0x3ed   : > { %v1616_v39 = vmul.f32 1.442695, %v1591_v10  ;;  %v5885_v10 = vld [vmem:[%s6723_s23] sm:$0xff] }
 0x3ee   : > { %v1610_v37 = vmul.f32 1.442695, %v1588_v5 }
 0x3f0   : > { %6138 = vpow2.f32 %v1610_v37 }
 0x3f1   : > { %v1898_v45 = vpop.f32.mrf.mxu1  ;;  %6140 = vpow2.f32 %v1616_v39 }
 0x3f2   : > { %v1571_v42 = vpop.xlane.xlu1 %1570 }
 0x3f3   : > { %v1592_v6 = vsub.f32 %v7602_v15, %v1571_v42 }
 0x3f6   : > { %v7747_v15 = vpop.eup %6138 }
 0x3f7   : > { %v7750_v37 = vpop.eup %6140 }
 0x3f9   : > { %v1901_v57 = vpop.f32.mrf.mxu1 }
 0x3fa   : > { %v1573_v41 = vpop.xlane.xlu2 %1572  ;;  %v7742_v31 = vsel %vm586_vm4, %v1901_v57, -1e+30 }
 0x3fc   : > { %5516 = vmatmul.msk.bf16.gmra.mxu1 %vm1436_vm1, %v7500_v2  ;;  %v1589_v2 = vsub.f32 %v7559_v13, %v1565_v11  ;;  %v1567_v13 = vpop.xlane.xlu0 %1566  ;;  %v1618_v11 = vmul.f32 1.442695, %v1592_v6 }
 0x3fd   : > { %v1590_v7 = vsub.f32 %v7574_v52, %v1567_v13  ;;  %v1593_v52 = vsub.f32 %v7614_v54, %v1573_v41 }
 0x3fe   : > { %v1612_v58 = vmul.f32 1.442695, %v1589_v2 }
 0x3ff   : > { %v1620_v42 = vmul.f32 1.442695, %v1593_v52 }
 0x400   : > { %6142 = vpow2.f32 %v1612_v58 }
 0x401   : > { %v1903_v53 = vpop.f32.mrf.mxu1  ;;  %6144 = vpow2.f32 %v1618_v11 }
 0x402   : > { %v7722_v24 = vsel %vm587_vm5, %v1903_v53, -1e+30  ;;  %v1575_v1 = vpop.xlane.xlu2 %1574  ;;  %v7734_v53 = vsel %vm585_vm3, %v1898_v45, -1e+30  ;;  %v5886_v45 = vld [vmem:[%s6723_s23 + $0x8] sm:$0xff] }
 0x403   : > { %1958 = vmax.xlane.f32.xlu1 %v7722_v24  ;;  %v1594_v43 = vsub.f32 %v7629_v21, %v1575_v1  ;;  %2312 = vmatpush.bf16.msrb.mxu0 %v5886_v45  ;;  %v1614_v21 = vmul.f32 1.442695, %v1590_v7 }
 0x405   : > { %v1622_v5 = vmul.f32 1.442695, %v1594_v43 }
 0x406   : > { %v7754_v1 = vpop.eup %6142 }
 0x407   : > { %6146 = vpow2.f32 %v1622_v5  ;;  %2313 = vmatpush.bf16.msrb.mxu0 %v5885_v10  ;;  %v7760_v2 = vpop.eup %6144 }
 0x408   : > { %6148 = vpow2.f32 %v1614_v21 }
 0x409   : > { %6150 = vpow2.f32 %v1620_v42  ;;  %v1906_v41 = vpop.f32.mrf.mxu1  ;;  %v2912_v42 = vsel %vm1436_vm1, %v7462_v17, 0 }
 0x40a   : > { %v7777_v7 = vsel %vm588_vm6, %v1906_v41, -1e+30  ;;  %v1577_v5 = vpop.xlane.xlu0 %1576 }
 0x40b   : > { %1640 = vadd.xlane.f32.xlu1 %v7728_v8 }
 0x40c   : > { %1954 = vmax.xlane.f32.xlu0 %v7734_v53 }
 0x40d   : > { %v7762_v39 = vpop.eup %6146 }
 0x40e   : > { %v7766_v58 = vpop.eup %6148 }
 0x40f   : > { %1956 = vmax.xlane.f32.xlu2 %v7742_v31  ;;  %v7771_v43 = vpop.eup %6150 }
 0x412   : > { %v7756_v57 = vpop.xlane.xlu2 %1578 }
 0x413   : > { %1642 = vadd.xlane.f32.xlu1 %v7747_v15 }
 0x414   : > { %1648 = vadd.xlane.f32.xlu0 %v7750_v37 }
 0x417   : > { %1644 = vadd.xlane.f32.xlu2 %v7754_v1 }
 0x41a   : > { %v7769_v6 = vpop.xlane.xlu2 %1580 }
 0x41b   : > { %1650 = vadd.xlane.f32.xlu1 %v7760_v2 }
 0x41c   : > { %1654 = vadd.xlane.f32.xlu0 %v7762_v39 }
 0x41f   : > { %1646 = vadd.xlane.f32.xlu2 %v7766_v58 }
 0x421   : > { %v1631_v13 = vpop.xlane.xlu1 %1630 }
 0x422   : > { %6152 = vrcp.f32 %v1631_v13 }
 0x427   : > { %1652 = vadd.xlane.f32.xlu2 %v7771_v43 }
 0x428   : > { %v6153_v45 = vpop.eup %6152 }
 0x429   : > { %v1633_v54 = vpop.xlane.xlu2 %1632  ;;  %v1678_v10 = vmul.f32 %v6153_v45, %v7677_v33  ;;  %v2909_v33 = vsel %vm1436_vm1, %v7521_v25, 0  ;;  %v1908_v25 = vpop.f32.mrf.mxu1 }
 0x42a   : > { %6154 = vrcp.f32 %v1633_v54 }
 0x42f   : > { %1960 = vmax.xlane.f32.xlu2 %v7777_v7 }
 0x430   : > { %v6155_v11 = vpop.eup %6154  ;;  %2363 = vrot.lane.b32.xlu0 %v7317_v47, %s6564_s17 }
 0x431   : > { %v1679_v21 = vmul.f32 %v6155_v11, %v7681_v30  ;;  %v1635_v13 = vpop.xlane.xlu2 %1634  ;;  %v2906_v11 = vsel %vm1436_vm1, %v7478_v51, 0  ;;  %v2900_v51 = vsel %vm1436_vm1, %v7663_v35, 0 }
 0x432   : > { %6156 = vrcp.f32 %v1635_v13 }
 0x433   : > { %v1694_v52 = vpack.c.bf16 %v1679_v21, %v1678_v10 }
 0x434   : > { %2842 = vrot.lane.b32.xlu1 %v7317_v47, %s6566_s21 }
 0x435   : > { %1758 = vmatmul.bf16.vlgmr.msra.gmra.mxu0 %v1694_v52  ;;  %v7812_v52 = vsel %vm589_vm7, %v1908_v25, -1e+30 }
 0x436   : > { %2914 = vmatpush.bf16.xpose.msra.mxu0 %v2912_v42 }
 0x438   : > { %v6157_v30 = vpop.eup %6156 }
 0x439   : > { %v1637_v54 = vpop.xlane.xlu0 %1636  ;;  %v1680_v47 = vmul.f32 %v6157_v30, %v7687_v49  ;;  %v2903_v49 = vsel %vm1436_vm1, %v7385_v14, 0  ;;  %v7814_v42 = vpop.permute.xlu2 %2838  ;;  %v2897_v14 = vsel %vm1436_vm1, %v7480_v29, 0  ;;  %v1596_v29 = vsub.f32 %v7657_v32, %v7756_v57 }
 0x43a   : > { %6158 = vrcp.f32 %v1637_v54  ;;  %v1595_v54 = vsub.f32 %v7642_v40, %v1577_v5  ;;  %v1597_v40 = vsub.f32 %v7671_v28, %v7769_v6 }
 0x43b   : > { %v1626_v5 = vmul.f32 1.442695, %v1596_v29 }
 0x43c   : > { %2365 = vrot.lane.b32.xlu1 %v7329_v62, %s6564_s17  ;;  %v1624_v30 = vmul.f32 1.442695, %v1595_v54 }
 0x43e   : > { %2915 = vmatpush.bf16.xpose.msra.mxu0 %v2909_v33  ;;  %6160 = vpow2.f32 %v1624_v30 }
 0x43f   : > { %6162 = vpow2.f32 %v1626_v5 }
 0x440   : > { %v6159_v41 = vpop.eup %6158 }
 0x441   : > { %v1681_v45 = vmul.f32 %v6159_v41, %v7691_v18  ;;  %v1639_v10 = vpop.xlane.xlu0 %1638  ;;  %v7804_v18 = vpop.f32.mrf.mxu1  ;;  %v2894_v41 = vsel %vm1436_vm1, %v7485_v12, 0 }
 0x442   : > { %v2362_v33 = vpop.permute.xlu2 %2361 }
 0x443   : > { %v1695_v17 = vpack.c.bf16 %v1681_v45, %v1680_v47  ;;  %v1628_v47 = vmul.f32 1.442695, %v1597_v40  ;;  %v2891_v45 = vsel %vm1436_vm1, %v7429_v23, 0 }
 0x444   : > { %2116 = vrot.lane.b32.xlu1 %v7362_v16, %s6565_s18 }
 0x445   : > { %1763 = vmatmul.bf16.gmra.mxu0 %v1695_v17  ;;  %6164 = vpow2.f32 %v1628_v47 }
 0x446   : > { %2916 = vmatpush.bf16.xpose.msra.mxu0 %v2906_v11  ;;  %v7837_v11 = vpop.eup %6160  ;;  %6166 = vrcp.f32 %v1639_v10 }
 0x447   : > { %2118 = vrot.lane.b32.xlu2 %v7347_v48, %s6565_s18  ;;  %v7840_v12 = vpop.eup %6162 }
 0x449   : > { %v1913_v13 = vpop.f32.mrf.mxu1 }
 0x44a   : > { %v7823_v35 = vsel %vm591_vm9, %v1913_v13, -1e+30  ;;  %v7850_v23 = vpop.permute.xlu2 %2840 }
 0x44b   : > { %v7847_v28 = vpop.eup %6164 }
 0x44c   : > { %2114 = vrot.lane.b32.xlu1 %v7369_v50, %s6565_s18  ;;  %v6167_v25 = vpop.eup %6166 }
 0x44e   : > { %2917 = vmatpush.bf16.xpose.msra.mxu0 %v2903_v49 }
 0x454   : > { %v2360_v21 = vpop.permute.xlu0 %2359 }
 0x455   : > { %5517 = vmatmul.msk.bf16.gmra.mxu1 %vm1436_vm1, %v2360_v21 }
 0x456   : > { %2918 = vmatpush.bf16.xpose.msra.mxu0 %v2900_v51  ;;  %v1682_v51 = vmul.f32 %v6167_v25, %v7696_v3 }
 0x45a   : > { %1962 = vmax.xlane.f32.xlu0 %v7812_v52 }
 0x45e   : > { %2919 = vmatpush.bf16.xpose.msra.mxu0 %v2897_v14  ;;  %v7835_v17 = vpop.xlane.xlu1 %1952 }
 0x462   : > { %1966 = vmax.xlane.f32.xlu0 %v7823_v35 }
 0x465   : > { %5518 = vmatmul.msk.bf16.gmra.mxu1 %vm1436_vm1, %v2362_v33 }
 0x466   : > { %2920 = vmatpush.bf16.xpose.msra.mxu0 %v2894_v41 }
 0x46e   : > { %2921 = vmatpush.bf16.xpose.msra.mxu0 %v2891_v45  ;;  %v1916_v45 = vpop.f32.mrf.mxu1 }
 0x470   : > { %1656 = vadd.xlane.f32.xlu2 %v7837_v11 }
 0x476   : > { %2367 = vrot.lane.b32.xlu0 %v7349_v59, %s6564_s17  ;;  %1658 = vadd.xlane.f32.xlu1 %v7840_v12  ;;  %v7845_v32 = vpop.xlane.xlu1 %1958 }
 0x478   : > { %1660 = vadd.xlane.f32.xlu2 %v7847_v28 }
 0x47e   : > { %v1641_v57 = vpop.xlane.xlu1 %1640 }
 0x47f   : > { %6168 = vrcp.f32 %v1641_v57  ;;  %v1955_v21 = vpop.xlane.xlu0 %1954 }
 0x480   : > { %v1985_v41 = vsub.f32 %v7734_v53, %v1955_v21 }
 0x482   : > { %v7852_v6 = vpop.xlane.xlu2 %1956  ;;  %v2002_v40 = vmul.f32 1.442695, %v1985_v41 }
 0x485   : > { %v6169_v49 = vpop.eup %6168 }
 0x486   : > { %v1683_v14 = vmul.f32 %v6169_v49, %v7728_v8  ;;  %v1643_v54 = vpop.xlane.xlu1 %1642 }
 0x487   : > { %v1649_v10 = vpop.xlane.xlu0 %1648 }
 0x488   : > { %v1696_v13 = vpack.c.bf16 %v1683_v14, %v1682_v51  ;;  %v7871_v51 = vpop.f32.mrf.mxu1 }
 0x48a   : > { %v1645_v33 = vpop.xlane.xlu2 %1644  ;;  %1768 = vmatmul.bf16.gmra.mxu0 %v1696_v13 }
 0x48b   : > { %6170 = vrcp.f32 %v1645_v33  ;;  %v7880_v33 = vsel %vm592_vm10, %v1916_v45, -1e+30 }
 0x48c   : > { %6172 = vrcp.f32 %v1643_v54 }
 0x48d   : > { %6174 = vpow2.f32 %v2002_v40 }
 0x48f   : > { %2112 = vrot.lane.b32.xlu1 %v7378_v0, %s6565_s18  ;;  %v1655_v57 = vpop.xlane.xlu0 %1654 }
 0x490   : > { %2844 = vrot.lane.b32.xlu2 %v7329_v62, %s6566_s21  ;;  %v1651_v62 = vpop.xlane.xlu1 %1650  ;;  %v1921_v41 = vpop.f32.mrf.mxu1 }
 0x491   : > { %v6171_v30 = vpop.eup %6170 }
 0x492   : > { %v1647_v29 = vpop.xlane.xlu2 %1646  ;;  %v6173_v3 = vpop.eup %6172  ;;  %v1685_v8 = vmul.f32 %v6171_v30, %v7754_v1 }
 0x493   : > { %v1684_v5 = vmul.f32 %v6173_v3, %v7747_v15  ;;  %6176 = vrcp.f32 %v1647_v29  ;;  %v7865_v53 = vpop.eup %6174  ;;  %v1984_v3 = vsub.f32 %v7711_v63, %v7835_v17 }
 0x494   : > { %6178 = vrcp.f32 %v1649_v10 }
 0x495   : > { %v1697_v47 = vpack.c.bf16 %v1685_v8, %v1684_v5  ;;  %v2000_v40 = vmul.f32 1.442695, %v1984_v3 }
 0x497   : > { %2110 = vrot.lane.b32.xlu1 %v7389_v60, %s6565_s18 }
 0x498   : > { %v7888_v45 = vpop.f32.mrf.mxu1 }
 0x499   : > { %v6177_v1 = vpop.eup %6176 }
 0x49a   : > { %v1653_v25 = vpop.xlane.xlu2 %1652  ;;  %1773 = vmatmul.bf16.gmra.mxu0 %v1697_v47  ;;  %v6179_v21 = vpop.eup %6178  ;;  %v1686_v14 = vmul.f32 %v6177_v1, %v7766_v58 }
 0x49b   : > { %v1687_v54 = vmul.f32 %v6179_v21, %v7750_v37  ;;  %6180 = vrcp.f32 %v1653_v25  ;;  %v7894_v25 = vsel %vm590_vm8, %v7804_v18, -1e+30 }
 0x49c   : > { %6182 = vrcp.f32 %v1651_v62 }
 0x49d   : > { %v1698_v10 = vpack.c.bf16 %v1687_v54, %v1686_v14  ;;  %6184 = vpow2.f32 %v2000_v40  ;;  %v7919_v54 = vsel %vm594_vm12, %v1921_v41, -1e+30 }
 0x49e   : > { %6186 = vrcp.f32 %v1655_v57 }
 0x4a0   : > { %2034 = vadd.xlane.f32.xlu0 %v7865_v53 }
 0x4a1   : > { %v6181_v58 = vpop.eup %6180 }
 0x4a2   : > { %v7868_v49 = vpop.xlane.xlu2 %1960  ;;  %v2364_v15 = vpop.permute.xlu0 %2363  ;;  %v1689_v8 = vmul.f32 %v6181_v58, %v7771_v43 }
 0x4a3   : > { %5519 = vmatmul.msk.bf16.gmra.mxu1 %vm1436_vm1, %v2364_v15  ;;  %v6183_v37 = vpop.eup %6182  ;;  %v1926_v43 = vpop.f32.mrf.mxu1 }
 0x4a4   : > { %v1688_v47 = vmul.f32 %v6183_v37, %v7760_v2  ;;  %v7899_v2 = vpop.eup %6184 }
 0x4a6   : > { %v7874_v13 = vpop.permute.xlu1 %2842  ;;  %v1699_v62 = vpack.c.bf16 %v1689_v8, %v1688_v47 }
 0x4a8   : > { %1968 = vmax.xlane.f32.xlu0 %v7880_v33 }
 0x4aa   : > { %v2119_v30 = vpop.permute.xlu2 %2118  ;;  %1778 = vmatmul.bf16.gmra.mxu0 %v1698_v10 }
 0x4ab   : > { %2128 = vmatpush.bf16.msrb.mxu2 %v2119_v30  ;;  %v1928_v17 = vpop.f32.mrf.mxu1 }
 0x4ae   : > { %v2366_v29 = vpop.permute.xlu1 %2365 }
 0x4b2   : > { %v1759_v8 = vpop.f32.mrf.mxu0 }
 0x4b3   : > { %5520 = vmatmul.msk.bf16.gmra.mxu1 %vm1436_vm1, %v2366_v29  ;;  %v1931_v18 = vpop.f32.mrf.mxu1 }
 0x4b6   : > { %v2117_v5 = vpop.permute.xlu1 %2116 }
 0x4b7   : > { %2129 = vmatpush.bf16.msrb.mxu2 %v2117_v5 }
 0x4b9   : > { %1964 = vmax.xlane.f32.xlu2 %v7894_v25 }
 0x4ba   : > { %1783 = vmatmul.bf16.gmra.mxu0 %v1699_v62  ;;  %v1761_v47 = vpop.f32.mrf.mxu0 }
 0x4bb   : > { %v1933_v15 = vpop.f32.mrf.mxu1 }
 0x4bc   : > { %2848 = vrot.lane.b32.xlu0 %v7351_v22, %s6566_s21 }
 0x4be   : > { %v2115_v63 = vpop.permute.xlu1 %2114 }
 0x4bf   : > { %2130 = vmatpush.bf16.msrb.mxu2 %v2115_v63 }
 0x4c1   : > { %2032 = vadd.xlane.f32.xlu1 %v7899_v2 }
 0x4c3   : > { %v2444_v29 = vpop.f32.mrf.mxu1 }
 0x4c4   : > { %v7928_v37 = vsel %vm584_vm2, %v2444_v29, -1e+30 }
 0x4cd   : > { %v7904_v1 = vpop.xlane.xlu0 %1962 }
 0x4d1   : > { %2108 = vrot.lane.b32.xlu2 %v7396_v9, %s6565_s18 }
 0x4d5   : > { %v7910_v21 = vpop.xlane.xlu0 %1966 }
 0x4d9   : > { %2846 = vrot.lane.b32.xlu2 %v7349_v59, %s6566_s21  ;;  %v6187_v59 = vpop.eup %6186 }
 0x4da   : > { %2106 = vrot.lane.b32.xlu1 %v7401_v44, %s6565_s18  ;;  %v1690_v57 = vmul.f32 %v6187_v59, %v7762_v39  ;;  %v7934_v39 = vsel %vm599_vm14, %v1933_v15, -1e+30  ;;  %v7943_v15 = vsel %vm593_vm11, %v7871_v51, -1e+30 }
 0x4e1   : > { %2104 = vrot.lane.b32.xlu2 %v7406_v34, %s6565_s18 }
 0x4e2   : > { %2369 = vrot.lane.b32.xlu1 %v7351_v22, %s6564_s17 }
 0x4e3   : > { %v1657_v14 = vpop.xlane.xlu2 %1656 }
 0x4e4   : > { %6188 = vrcp.f32 %v1657_v14 }
 0x4e6   : > { %1972 = vmax.xlane.f32.xlu0 %v7919_v54 }
 0x4e8   : > { %v2368_v10 = vpop.permute.xlu0 %2367 }
 0x4e9   : > { %5521 = vmatmul.msk.bf16.gmra.mxu1 %vm1436_vm1, %v2368_v10  ;;  %v1659_v22 = vpop.xlane.xlu1 %1658  ;;  %v1764_v10 = vpop.f32.mrf.mxu0 }
 0x4ea   : > { %v6189_v30 = vpop.eup %6188  ;;  %6190 = vrcp.f32 %v1659_v22  ;;  %v7959_v22 = vsel %vm595_vm13, %v7888_v45, -1e+30 }
 0x4eb   : > { %v1691_v58 = vmul.f32 %v6189_v30, %v7837_v11  ;;  %v1661_v3 = vpop.xlane.xlu2 %1660 }
 0x4ec   : > { %6192 = vrcp.f32 %v1661_v3  ;;  %v7967_v3 = vsel %vm598_vm0, %v1931_v18, -1e+30 }
 0x4ed   : > { %v1700_v41 = vpack.c.bf16 %v1691_v58, %v1690_v57  ;;  %v1799_v58 = vpack.c.bf16 %v1761_v47, %v1759_v8  ;;  %v9815_v8 = vld [vmem:[#allocation23_spill] sm:$0xff] }
 0x4ee   : > { %2500 = vmax.xlane.f32.xlu0 %v7928_v37 }
 0x4ef   : > { %1788 = vmatmul.bf16.gmra.mxu0 %v1700_v41 }
 0x4f0   : > { %v6191_v40 = vpop.eup %6190 }
 0x4f1   : > { %v1692_v62 = vmul.f32 %v6191_v40, %v7840_v12  ;;  %v1766_v57 = vpop.f32.mrf.mxu0 }
 0x4f2   : > { %v6193_v11 = vpop.eup %6192  ;;  %v1800_v45 = vpack.c.bf16 %v1766_v57, %v1764_v10  ;;  %v1986_v57 = vsub.f32 %v7742_v31, %v7852_v6 }
 0x4f3   : > { %v1693_v63 = vmul.f32 %v6193_v11, %v7847_v28  ;;  %v7951_v28 = vsel %vm9767_vm15, %v1928_v17, -1e+30  ;;  %vm9816_vm15 = vcmp.le.s32.totalorder %v7444_v20, %v9815_v8  ;;  %v2446_v11 = vpop.f32.mrf.mxu1 }
 0x4f4   : > { %v7973_v40 = vsel %vm9816_vm15, %v1926_v43, -1e+30  ;;  %v7982_v18 = vsel %vm585_vm3, %v2446_v11, -1e+30 }
 0x4f5   : > { %v1701_v14 = vpack.c.bf16 %v1693_v63, %v1692_v62  ;;  %v7985_v62 = vpop.permute.xlu2 %2844 }
 0x4f6   : > { %1982 = vmax.xlane.f32.xlu0 %v7934_v39 }
 0x4ff   : > { %1793 = vmatmul.bf16.gmra.mxu0 %v1701_v14 }
 0x501   : > { %v2113_v59 = vpop.permute.xlu1 %2112 }
 0x502   : > { %2131 = vmatpush.bf16.msrb.mxu2 %v2113_v59  ;;  %v2449_v59 = vpop.f32.mrf.mxu1 }
 0x507   : > { %v1769_v41 = vpop.f32.mrf.mxu0 }
 0x509   : > { %v2111_v30 = vpop.permute.xlu1 %2110 }
 0x50a   : > { %1970 = vmax.xlane.f32.xlu2 %v7943_v15  ;;  %2662 = vrot.lane.b32.xlu0 %v7369_v50, %s6564_s17 }
 0x50b   : > { %2132 = vmatpush.bf16.msrb.mxu2 %v2111_v30 }
 0x50c   : > { %1978 = vmax.xlane.f32.xlu1 %v7951_v28 }
 0x50f   : > { %5507 = vmatmul.msk.bf16.vlgmr.msrb.gmra.mxu0 %vm1436_vm1, %v1799_v58  ;;  %v1771_v47 = vpop.f32.mrf.mxu0  ;;  %v7996_v58 = vpop.f32.mrf.mxu1 }
 0x510   : > { %v1801_v14 = vpack.c.bf16 %v1771_v47, %v1769_v41 }
 0x512   : > { %1974 = vmax.xlane.f32.xlu2 %v7959_v22  ;;  %2652 = vrot.lane.b32.xlu0 %v7406_v34, %s6564_s17 }
 0x513   : > { %v2035_v6 = vpop.xlane.xlu0 %2034 }
 0x514   : > { %1980 = vmax.xlane.f32.xlu1 %v7967_v3 }
 0x517   : > { %v1774_v43 = vpop.f32.mrf.mxu0  ;;  %v2454_v47 = vpop.f32.mrf.mxu1 }
 0x51a   : > { %1976 = vmax.xlane.f32.xlu2 %v7973_v40  ;;  %3139 = vrot.lane.b32.xlu0 %v7378_v0, %s6566_s21 }
 0x51f   : > { %5508 = vmatmul.msk.bf16.gmra.mxu0 %vm1436_vm1, %v1800_v45  ;;  %v1776_v10 = vpop.f32.mrf.mxu0  ;;  %v2004_v45 = vmul.f32 1.442695, %v1986_v57  ;;  %v8017_v57 = vsel %vm586_vm4, %v2449_v59, -1e+30 }
 0x520   : > { %v1802_v11 = vpack.c.bf16 %v1776_v10, %v1774_v43  ;;  %v2456_v10 = vpop.f32.mrf.mxu1 }
 0x521   : > { %6194 = vpow2.f32 %v2004_v45 }
 0x522   : > { %2502 = vmax.xlane.f32.xlu2 %v7982_v18 }
 0x527   : > { %v1779_v41 = vpop.f32.mrf.mxu0 }
 0x52c   : > { %v7987_v63 = vpop.xlane.xlu2 %1964 }
 0x52d   : > { %2664 = vrot.lane.b32.xlu1 %v7362_v16, %s6564_s17 }
 0x52f   : > { %5509 = vmatmul.msk.bf16.gmra.mxu0 %vm1436_vm1, %v1801_v14  ;;  %v1781_v43 = vpop.f32.mrf.mxu0 }
 0x534   : > { %v2109_v30 = vpop.permute.xlu2 %2108  ;;  %v2033_v31 = vpop.xlane.xlu1 %2032 }
 0x535   : > { %2133 = vmatpush.bf16.msrb.mxu2 %v2109_v30  ;;  %2660 = vrot.lane.b32.xlu1 %v7378_v0, %s6564_s17  ;;  %v8005_v0 = vpop.eup %6194  ;;  %6196 = vrcp.f32 %v2033_v31  ;;  %v1803_v31 = vpack.c.bf16 %v1781_v43, %v1779_v41  ;;  %v8030_v41 = vsel %vm588_vm6, %v2454_v47, -1e+30  ;;  %v1987_v47 = vsub.f32 %v7722_v24, %v7845_v32 }
 0x536   : > { %6198 = vrcp.f32 %v2035_v6 }
 0x53a   : > { %2666 = vrot.lane.b32.xlu2 %v7347_v48, %s6564_s17 }
 0x53b   : > { %v6197_v30 = vpop.eup %6196 }
 0x53c   : > { %v8010_v14 = vpop.permute.xlu2 %2846  ;;  %v2080_v6 = vmul.f32 %v6197_v30, %v7899_v2  ;;  %v2006_v30 = vmul.f32 1.442695, %v1987_v47  ;;  %v1988_v47 = vsub.f32 %v7777_v7, %v7868_v49  ;;  %v8095_v49 = vsel %vm587_vm5, %v7996_v58, -1e+30 }
 0x53d   : > { %2658 = vrot.lane.b32.xlu1 %v7389_v60, %s6564_s17 }
 0x53e   : > { %6200 = vpow2.f32 %v2006_v30 }
 0x53f   : > { %5510 = vmatmul.msk.bf16.gmra.mxu0 %vm1436_vm1, %v1802_v11  ;;  %v6199_v11 = vpop.eup %6198 }
 0x540   : > { %v2081_v12 = vmul.f32 %v6199_v11, %v7865_v53  ;;  %v1989_v11 = vsub.f32 %v7812_v52, %v7904_v1  ;;  %v1991_v52 = vsub.f32 %v7823_v35, %v7910_v21  ;;  %v2008_v21 = vmul.f32 1.442695, %v1988_v47 }
 0x542   : > { %2656 = vrot.lane.b32.xlu2 %v7396_v9, %s6564_s17  ;;  %v2096_v59 = vpack.c.bf16 %v2081_v12, %v2080_v6  ;;  %v2010_v32 = vmul.f32 1.442695, %v1989_v11  ;;  %v2014_v1 = vmul.f32 1.442695, %v1991_v52 }
 0x544   : > { %2036 = vadd.xlane.f32.xlu0 %v8005_v0  ;;  %v2105_v17 = vpop.permute.xlu2 %2104  ;;  %6202 = vpow2.f32 %v2010_v32 }
 0x545   : > { %2654 = vrot.lane.b32.xlu1 %v7401_v44, %s6564_s17  ;;  %6204 = vpow2.f32 %v2014_v1 }
 0x54a   : > { %3145 = vrot.lane.b32.xlu2 %v7347_v48, %s6566_s21  ;;  %v1784_v48 = vpop.f32.mrf.mxu0 }
 0x54c   : > { %2504 = vmax.xlane.f32.xlu0 %v8017_v57  ;;  %v2107_v45 = vpop.permute.xlu1 %2106 }
 0x54d   : > { %3137 = vrot.lane.b32.xlu1 %v7389_v60, %s6566_s21  ;;  %2134 = vmatpush.bf16.msrb.mxu2 %v2107_v45  ;;  %v2459_v60 = vpop.f32.mrf.mxu1 }
 0x54f   : > { %5511 = vmatmul.msk.bf16.gmra.mxu0 %vm1436_vm1, %v1803_v31 }
 0x551   : > { %2135 = vmatpush.bf16.msrb.mxu2 %v2105_v17  ;;  %v8048_v17 = vsel %vm590_vm8, %v2459_v60, -1e+30 }
 0x552   : > { %3143 = vrot.lane.b32.xlu2 %v7362_v16, %s6566_s21  ;;  %v1786_v43 = vpop.f32.mrf.mxu0  ;;  %v8039_v16 = vsel %vm589_vm7, %v2456_v10, -1e+30 }
 0x553   : > { %v1804_v53 = vpack.c.bf16 %v1786_v43, %v1784_v48 }
 0x554   : > { %2508 = vmax.xlane.f32.xlu0 %v8030_v41  ;;  %v2370_v2 = vpop.permute.xlu1 %2369  ;;  %2136 = vmatmul.bf16.vlgmr.msrb.gmra.mxu2 %v2096_v59  ;;  %v8069_v59 = vpop.eup %6200 }
 0x555   : > { %5522 = vmatmul.msk.bf16.gmra.mxu1 %vm1436_vm1, %v2370_v2  ;;  %v2461_v12 = vpop.f32.mrf.mxu1 }
 0x55a   : > { %3141 = vrot.lane.b32.xlu2 %v7369_v50, %s6566_s21 }
 0x55c   : > { %2510 = vmax.xlane.f32.xlu0 %v8039_v16 }
 0x55d   : > { %v2464_v50 = vpop.f32.mrf.mxu1 }
 0x55e   : > { %v8056_v10 = vsel %vm592_vm10, %v2464_v50, -1e+30 }
 0x55f   : > { %5512 = vmatmul.msk.bf16.gmra.mxu0 %vm1436_vm1, %v1804_v53  ;;  %v8077_v53 = vpop.eup %6202 }
 0x560   : > { %v8082_v32 = vpop.eup %6204 }
 0x562   : > { %3135 = vrot.lane.b32.xlu2 %v7396_v9, %s6566_s21  ;;  %v8059_v9 = vpop.xlane.xlu0 %1968 }
 0x564   : > { %2512 = vmax.xlane.f32.xlu0 %v8048_v17 }
 0x565   : > { %v2466_v31 = vpop.f32.mrf.mxu1 }
 0x566   : > { %v8066_v24 = vsel %vm593_vm11, %v2466_v31, -1e+30 }
 0x56a   : > { %v8071_v60 = vpop.permute.xlu0 %2848 }
 0x56c   : > { %v1789_v45 = vpop.f32.mrf.mxu0  ;;  %2516 = vmax.xlane.f32.xlu0 %v8056_v10 }
 0x572   : > { %v1973_v50 = vpop.xlane.xlu0 %1972 }
 0x574   : > { %v1791_v6 = vpop.f32.mrf.mxu0  ;;  %2518 = vmax.xlane.f32.xlu0 %v8066_v24 }
 0x575   : > { %v1805_v48 = vpack.c.bf16 %v1791_v6, %v1789_v45 }
 0x577   : > { %5513 = vmatmul.msk.bf16.gmra.mxu0 %vm1436_vm1, %v1805_v48  ;;  %2038 = vadd.xlane.f32.xlu1 %v8069_v59 }
 0x57a   : > { %v8088_v52 = vpop.xlane.xlu0 %2500 }
 0x57c   : > { %v1794_v2 = vpop.f32.mrf.mxu0 }
 0x57d   : > { %v1971_v43 = vpop.xlane.xlu2 %1970 }
 0x57e   : > { %v1993_v6 = vsub.f32 %v7943_v15, %v1971_v43 }
 0x57f   : > { %2042 = vadd.xlane.f32.xlu1 %v8077_v53  ;;  %v1979_v45 = vpop.xlane.xlu1 %1978 }
 0x580   : > { %v1997_v7 = vsub.f32 %v7951_v28, %v1979_v45  ;;  %v2018_v1 = vmul.f32 1.442695, %v1993_v6  ;;  %v8105_v28 = vsel %vm591_vm9, %v2461_v12, -1e+30  ;;  %v1994_v45 = vsub.f32 %v7919_v54, %v1973_v50  ;;  %v9817_v6 = vld [vmem:[#allocation20_spill] sm:$0xff] }
 0x581   : > { %v1992_v12 = vsub.f32 %v7880_v33, %v8059_v9 }
 0x582   : > { %v2026_v43 = vmul.f32 1.442695, %v1997_v7 }
 0x584   : > { %v1796_v30 = vpop.f32.mrf.mxu0 }
 0x585   : > { %v1806_v11 = vpack.c.bf16 %v1796_v30, %v1794_v2  ;;  %v1975_v31 = vpop.xlane.xlu2 %1974 }
 0x586   : > { %v1995_v35 = vsub.f32 %v7959_v22, %v1975_v31  ;;  %v1990_v22 = vsub.f32 %v7894_v25, %v7987_v63  ;;  %v2020_v31 = vmul.f32 1.442695, %v1994_v45 }
 0x587   : > { %5514 = vmatmul.msk.bf16.gmra.mxu0 %vm1436_vm1, %v1806_v11  ;;  %2046 = vadd.xlane.f32.xlu1 %v8082_v32  ;;  %v1981_v47 = vpop.xlane.xlu1 %1980  ;;  %v1983_v11 = vpop.xlane.xlu0 %1982 }
 0x588   : > { %v2022_v48 = vmul.f32 1.442695, %v1995_v35  ;;  %v2012_v30 = vmul.f32 1.442695, %v1990_v22  ;;  %v1998_v63 = vsub.f32 %v7967_v3, %v1981_v47 }
 0x58a   : > { %6206 = vpow2.f32 %v2022_v48  ;;  %v2028_v50 = vmul.f32 1.442695, %v1998_v63  ;;  %v2016_v48 = vmul.f32 1.442695, %v1992_v12 }
 0x58b   : > { %2506 = vmax.xlane.f32.xlu2 %v8095_v49  ;;  %6208 = vpow2.f32 %v2008_v21 }
 0x58c   : > { %v8100_v15 = vpop.f32.mrf.mxu0  ;;  %6210 = vpow2.f32 %v2018_v1 }
 0x58d   : > { %v1977_v2 = vpop.xlane.xlu2 %1976  ;;  %6212 = vpow2.f32 %v2026_v43 }
 0x58e   : > { %6214 = vpow2.f32 %v2012_v30  ;;  %v1996_v22 = vsub.f32 %v7973_v40, %v1977_v2  ;;  %v1999_v40 = vsub.f32 %v7934_v39, %v1983_v11  ;;  %v2532_v39 = vsub.f32 %v7928_v37, %v8088_v52 }
 0x58f   : > { %2514 = vmax.xlane.f32.xlu1 %v8105_v28  ;;  %6216 = vpow2.f32 %v2020_v31  ;;  %v2663_v7 = vpop.permute.xlu0 %2662 }
 0x590   : > { %v8108_v58 = vpop.eup %6206  ;;  %6218 = vpow2.f32 %v2028_v50  ;;  %v9818_v50 = vld [vmem:[#allocation19_spill] sm:$0xff] }
 0x591   : > { %2054 = vadd.xlane.f32.xlu0 %v8108_v58  ;;  %v8112_v25 = vpop.eup %6208  ;;  %6220 = vpow2.f32 %v2016_v48 }
 0x592   : > { %v8120_v54 = vpop.eup %6210 }
 0x593   : > { %2040 = vadd.xlane.f32.xlu2 %v8112_v25  ;;  %v8125_v3 = vpop.eup %6212 }
 0x594   : > { %v8118_v35 = vpop.f32.mrf.mxu0  ;;  %v8128_v33 = vpop.eup %6214 }
 0x595   : > { %v2503_v21 = vpop.xlane.xlu2 %2502  ;;  %v8135_v47 = vpop.eup %6216 }
 0x596   : > { %v2533_v9 = vsub.f32 %v7982_v18, %v2503_v21  ;;  %v8138_v63 = vpop.eup %6218  ;;  %v2024_v18 = vmul.f32 1.442695, %v1996_v22 }
 0x597   : > { %5539 = vmatmul.msk.bf16.vlgmr.msra.gmra.mxu0 %vm1436_vm1, %v9817_v6  ;;  %2050 = vadd.xlane.f32.xlu1 %v8120_v54  ;;  %v8141_v12 = vpop.eup %6220  ;;  %v2653_v31 = vpop.permute.xlu0 %2652 }
 0x598   : > { %v2550_v30 = vmul.f32 1.442695, %v2533_v9  ;;  %v2030_v9 = vmul.f32 1.442695, %v1999_v40 }
 0x599   : > { %2058 = vadd.xlane.f32.xlu0 %v8125_v3 }
 0x59a   : > { %6222 = vpow2.f32 %v2550_v30  ;;  %v2548_v30 = vmul.f32 1.442695, %v2532_v39 }
 0x59b   : > { %2044 = vadd.xlane.f32.xlu2 %v8128_v33  ;;  %6224 = vpow2.f32 %v2024_v18 }
 0x59c   : > { %v8133_v1 = vpop.f32.mrf.mxu0  ;;  %6226 = vpow2.f32 %v2030_v9  ;;  %v5888_v9 = vld [vmem:[%s6723_s23 + $0x18] sm:$0xff] }
 0x59d   : > { %v2667_v43 = vpop.permute.xlu2 %2666  ;;  %6228 = vpow2.f32 %v2548_v30  ;;  %2227 = vmatpush.bf16.msra.mxu3 %v5888_v9 }
 0x59e   : > { %2676 = vmatpush.bf16.msrb.mxu1 %v2667_v43  ;;  %5982 = vmatpush.bf16.msra.mxu2 %v2667_v43 }
 0x59f   : > { %v2665_v45 = vpop.permute.xlu1 %2664  ;;  %2052 = vadd.xlane.f32.xlu1 %v8135_v47 }
 0x5a0   : > { %v8149_v48 = vpop.eup %6222 }
 0x5a1   : > { %2060 = vadd.xlane.f32.xlu0 %v8138_v63  ;;  %v8152_v22 = vpop.eup %6224 }
 0x5a2   : > { %2677 = vmatpush.bf16.msrb.mxu1 %v2665_v45  ;;  %5983 = vmatpush.bf16.msra.mxu2 %v2665_v45  ;;  %v8159_v18 = vpop.eup %6226 }
 0x5a3   : > { %2048 = vadd.xlane.f32.xlu2 %v8141_v12 }
 0x5a4   : > { %v8145_v2 = vpop.f32.mrf.mxu0 }
 0x5a5   : > { %v2657_v21 = vpop.permute.xlu2 %2656 }
 0x5a6   : > { %2678 = vmatpush.bf16.msrb.mxu1 %v2663_v7  ;;  %5984 = vmatpush.bf16.msra.mxu2 %v2663_v7  ;;  %v3140_v7 = vpop.permute.xlu0 %3139 }
 0x5a7   : > { %5540 = vmatmul.msk.bf16.gmra.mxu0 %vm1436_vm1, %v9818_v50  ;;  %v2661_v6 = vpop.permute.xlu1 %2660  ;;  %v8166_v50 = vpop.eup %6228 }
 0x5a9   : > { %2582 = vadd.xlane.f32.xlu0 %v8149_v48 }
 0x5aa   : > { %2679 = vmatpush.bf16.msrb.mxu1 %v2661_v6  ;;  %5985 = vmatpush.bf16.msra.mxu2 %v2661_v6 }
 0x5ab   : > { %2056 = vadd.xlane.f32.xlu2 %v8152_v22 }
 0x5ac   : > { %v8157_v11 = vpop.f32.mrf.mxu0 }
 0x5ad   : > { %v3146_v45 = vpop.permute.xlu2 %3145 }
 0x5af   : > { %v2659_v43 = vpop.permute.xlu1 %2658 }
 0x5b0   : > { %2680 = vmatpush.bf16.msrb.mxu1 %v2659_v43  ;;  %5986 = vmatpush.bf16.msra.mxu2 %v2659_v43  ;;  %v5887_v43 = vld [vmem:[%s6723_s23 + $0x10] sm:$0xff] }
 0x5b1   : > { %2228 = vmatpush.bf16.msra.mxu3 %v5887_v43 }
 0x5b3   : > { %2062 = vadd.xlane.f32.xlu2 %v8159_v18 }
 0x5b4   : > { %v8162_v40 = vpop.f32.mrf.mxu0  ;;  %2681 = vmatpush.bf16.msrb.mxu1 %v2657_v21  ;;  %5987 = vmatpush.bf16.msra.mxu2 %v2657_v21 }
 0x5b5   : > { %9819 = vst [vmem:[#allocation26_spill] sm:$0xff] %v8162_v40  ;;  %v3144_v6 = vpop.permute.xlu2 %3143 }
 0x5b7   : > { %5541 = vmatmul.msk.bf16.gmra.mxu0 %vm1436_vm1, %v7814_v42  ;;  %v2037_v37 = vpop.xlane.xlu0 %2036  ;;  %v2655_v52 = vpop.permute.xlu1 %2654 }
 0x5b8   : > { %2682 = vmatpush.bf16.msrb.mxu1 %v2655_v52  ;;  %5988 = vmatpush.bf16.msra.mxu2 %v2655_v52 }
 0x5bb   : > { %2580 = vadd.xlane.f32.xlu2 %v8166_v50 }
 0x5bc   : > { %v8170_v39 = vpop.f32.mrf.mxu0  ;;  %2683 = vmatpush.bf16.msrb.mxu1 %v2653_v31  ;;  %5989 = vmatpush.bf16.msra.mxu2 %v2653_v31 }
 0x5bd   : > { %9820 = vst [vmem:[#allocation21_spill] sm:$0xff] %v8170_v39  ;;  %v3142_v52 = vpop.permute.xlu2 %3141 }
 0x5bf   : > { %v2505_v21 = vpop.xlane.xlu0 %2504  ;;  %v3138_v31 = vpop.permute.xlu1 %3137 }
 0x5c0   : > { %3155 = vmatpush.bf16.msra.mxu1 %v3146_v45  ;;  %v2534_v42 = vsub.f32 %v8017_v57, %v2505_v21 }
 0x5c2   : > { %v2552_v30 = vmul.f32 1.442695, %v2534_v42 }
 0x5c4   : > { %3156 = vmatpush.bf16.msra.mxu1 %v3144_v6  ;;  %6230 = vpow2.f32 %v2552_v30  ;;  %v8174_v40 = vpop.f32.mrf.mxu0 }
 0x5c5   : > { %9821 = vst [vmem:[#allocation22_spill] sm:$0xff] %v8174_v40  ;;  %v3136_v57 = vpop.permute.xlu2 %3135  ;;  %6232 = vrcp.f32 %v2037_v37 }
 0x5c7   : > { %5542 = vmatmul.msk.bf16.gmra.mxu0 %vm1436_vm1, %v7850_v23  ;;  %v8187_v21 = vpop.xlane.xlu0 %2508 }
 0x5c8   : > { %3157 = vmatpush.bf16.msra.mxu1 %v3142_v52 }
 0x5ca   : > { %v8178_v39 = vpop.eup %6230 }
 0x5cb   : > { %2584 = vadd.xlane.f32.xlu1 %v8178_v39  ;;  %v6233_v52 = vpop.eup %6232 }
 0x5cc   : > { %3158 = vmatpush.bf16.msra.mxu1 %v3140_v7  ;;  %v8181_v45 = vpop.f32.mrf.mxu0 }
 0x5cd   : > { %9822 = vst [vmem:[#allocation23_spill] sm:$0xff] %v8181_v45 }
 0x5cf   : > { %v8192_v42 = vpop.xlane.xlu0 %2510 }
 0x5d0   : > { %3159 = vmatpush.bf16.msra.mxu1 %v3138_v31 }
 0x5d4   : > { %3160 = vmatpush.bf16.msra.mxu1 %v3136_v57  ;;  %v8185_v9 = vpop.f32.mrf.mxu0 }
 0x5d5   : > { %9823 = vst [vmem:[#allocation20_spill] sm:$0xff] %v8185_v9 }
 0x5d7   : > { %5543 = vmatmul.msk.bf16.gmra.mxu0 %vm1436_vm1, %v7874_v13  ;;  %v2137_v6 = vpop.f32.mrf.mxu2  ;;  %v8198_v31 = vpop.xlane.xlu0 %2512 }
 0x5dc   : > { %v8189_v43 = vpop.f32.mrf.mxu0 }
 0x5dd   : > { %9824 = vst [vmem:[#allocation19_spill] sm:$0xff] %v8189_v43 }
 0x5df   : > { %v2139_v23 = vpop.f32.mrf.mxu2 }
 0x5e0   : > { %v2177_v7 = vpack.c.bf16 %v2139_v23, %v2137_v6  ;;  %v2082_v6 = vmul.f32 %v6233_v52, %v8005_v0 }
 0x5e2   : > { %5491 = vmatmul.msk.bf16.vlgmr.msra.gmra.mxu3 %vm1436_vm1, %v2177_v7 }
 0x5e4   : > { %v8196_v13 = vpop.f32.mrf.mxu0 }
 0x5e5   : > { %9825 = vst [vmem:[#allocation27_spill] sm:$0xff] %v8196_v13 }
 0x5e7   : > { %5544 = vmatmul.msk.bf16.gmra.mxu0 %vm1436_vm1, %v7985_v62  ;;  %v8206_v62 = vpop.xlane.xlu0 %2516 }
 0x5ea   : > { %v2039_v30 = vpop.xlane.xlu1 %2038 }
 0x5eb   : > { %6234 = vrcp.f32 %v2039_v30 }
 0x5ef   : > { %v8211_v0 = vpop.xlane.xlu0 %2518 }
 0x5f1   : > { %v6235_v57 = vpop.eup %6234 }
 0x5f2   : > { %v2083_v23 = vmul.f32 %v6235_v57, %v8069_v59  ;;  %v2043_v45 = vpop.xlane.xlu1 %2042 }
 0x5f4   : > { %v8202_v43 = vpop.f32.mrf.mxu0  ;;  %v2097_v7 = vpack.c.bf16 %v2083_v23, %v2082_v6 }
 0x5f5   : > { %9826 = vst [vmem:[#allocation28_spill] sm:$0xff] %v8202_v43 }
 0x5f6   : > { %2141 = vmatmul.bf16.gmra.mxu2 %v2097_v7 }
 0x5f7   : > { %5545 = vmatmul.msk.bf16.gmra.mxu0 %vm1436_vm1, %v8010_v14 }
 0x5fa   : > { %v2047_v23 = vpop.xlane.xlu1 %2046 }
 0x5fc   : > { %v8208_v37 = vpop.f32.mrf.mxu0 }
 0x5fd   : > { %9827 = vst [vmem:[#allocation29_spill] sm:$0xff] %v8208_v37 }
 0x5fe   : > { %v2507_v30 = vpop.xlane.xlu2 %2506 }
 0x5ff   : > { %v2535_v13 = vsub.f32 %v8095_v49, %v2507_v30 }
 0x601   : > { %v2554_v9 = vmul.f32 1.442695, %v2535_v13 }
 0x603   : > { %6236 = vpow2.f32 %v2554_v9 }
 0x604   : > { %v8213_v59 = vpop.f32.mrf.mxu0  ;;  %6238 = vrcp.f32 %v2043_v45  ;;  %v2055_v6 = vpop.xlane.xlu0 %2054 }
 0x605   : > { %9828 = vst [vmem:[#allocation30_spill] sm:$0xff] %v8213_v59 }
 0x606   : > { %v2041_v52 = vpop.xlane.xlu2 %2040 }
 0x607   : > { %5546 = vmatmul.msk.bf16.gmra.mxu0 %vm1436_vm1, %v8071_v60  ;;  %6240 = vrcp.f32 %v2041_v52 }
 0x609   : > { %v8217_v14 = vpop.eup %6236 }
 0x60a   : > { %2586 = vadd.xlane.f32.xlu1 %v8217_v14  ;;  %v6239_v57 = vpop.eup %6238 }
 0x60b   : > { %v2085_v45 = vmul.f32 %v6239_v57, %v8077_v53 }
 0x60c   : > { %v8220_v49 = vpop.f32.mrf.mxu0  ;;  %v2059_v59 = vpop.xlane.xlu0 %2058 }
 0x60d   : > { %9829 = vst [vmem:[#allocation31_spill] sm:$0xff] %v8220_v49  ;;  %v6241_v13 = vpop.eup %6240  ;;  %v8230_v49 = vpop.xlane.xlu1 %2514 }
 0x60e   : > { %v2045_v9 = vpop.xlane.xlu2 %2044  ;;  %v2084_v7 = vmul.f32 %v6241_v13, %v8112_v25  ;;  %v2539_v51 = vsub.f32 %v8105_v28, %v8230_v49 }
 0x60f   : > { %6242 = vrcp.f32 %v2045_v9 }
 0x610   : > { %v2098_v30 = vpack.c.bf16 %v2085_v45, %v2084_v7  ;;  %6244 = vrcp.f32 %v2047_v23 }
 0x612   : > { %2146 = vmatmul.bf16.gmra.mxu2 %v2098_v30 }
 0x614   : > { %v2923_v60 = vpop.f32.mrf.mxu0  ;;  %v2061_v23 = vpop.xlane.xlu0 %2060 }
 0x615   : > { %v8227_v52 = vsel %vm584_vm2, %v2923_v60, -1e+30  ;;  %v6243_v43 = vpop.eup %6242  ;;  %v2051_v45 = vpop.xlane.xlu1 %2050  ;;  %vm9830_vm2 = vmmov %vm9816_vm15 }
 0x616   : > { %v2049_v37 = vpop.xlane.xlu2 %2048  ;;  %2979 = vmax.xlane.f32.xlu1 %v8227_v52  ;;  %v6245_v25 = vpop.eup %6244  ;;  %v2086_v57 = vmul.f32 %v6243_v43, %v8128_v33 }
 0x617   : > { %v2087_v9 = vmul.f32 %v6245_v25, %v8082_v32  ;;  %6246 = vrcp.f32 %v2049_v37 }
 0x618   : > { %6248 = vrcp.f32 %v2051_v45 }
 0x619   : > { %v2099_v7 = vpack.c.bf16 %v2087_v9, %v2086_v57 }
 0x61c   : > { %v2925_v13 = vpop.f32.mrf.mxu0  ;;  %v2583_v43 = vpop.xlane.xlu0 %2582 }
 0x61d   : > { %v8235_v53 = vsel %vm585_vm3, %v2925_v13, -1e+30  ;;  %v6247_v33 = vpop.eup %6246  ;;  %6250 = vrcp.f32 %v2583_v43  ;;  %v2053_v57 = vpop.xlane.xlu1 %2052 }
 0x61e   : > { %2981 = vmax.xlane.f32.xlu0 %v8235_v53  ;;  %v2057_v27 = vpop.xlane.xlu2 %2056  ;;  %v6249_v13 = vpop.eup %6248  ;;  %v2088_v37 = vmul.f32 %v6247_v33, %v8141_v12 }
 0x61f   : > { %v2089_v25 = vmul.f32 %v6249_v13, %v8120_v54 }
 0x621   : > { %v2100_v9 = vpack.c.bf16 %v2089_v25, %v2088_v37 }
 0x622   : > { %2151 = vmatmul.bf16.gmra.mxu2 %v2099_v7 }
 0x623   : > { %v6251_v7 = vpop.eup %6250 }
 0x624   : > { %v2928_v30 = vpop.f32.mrf.mxu0  ;;  %v2629_v12 = vmul.f32 %v6251_v7, %v8149_v48 }
 0x625   : > { %v8243_v60 = vsel %vm586_vm4, %v2928_v30, -1e+30 }
 0x626   : > { %v2063_v36 = vpop.xlane.xlu2 %2062  ;;  %2983 = vmax.xlane.f32.xlu1 %v8243_v60 }
 0x62c   : > { %v2930_v40 = vpop.f32.mrf.mxu0 }
 0x62d   : > { %v8249_v32 = vsel %vm587_vm5, %v2930_v40, -1e+30  ;;  %vm9835_vm5 = vmmov %vm9830_vm2 }
 0x62e   : > { %2985 = vmax.xlane.f32.xlu2 %v8249_v32  ;;  %v2581_v46 = vpop.xlane.xlu2 %2580 }
 0x62f   : > { %6252 = vrcp.f32 %v2581_v46 }
 0x630   : > { %6254 = vrcp.f32 %v2053_v57 }
 0x631   : > { %6256 = vrcp.f32 %v2055_v6 }
 0x632   : > { %2156 = vmatmul.bf16.gmra.mxu2 %v2100_v9  ;;  %6258 = vrcp.f32 %v2057_v27  ;;  %v8280_v27 = vpop.f32.mrf.mxu1 }
 0x633   : > { %6260 = vrcp.f32 %v2059_v59 }
 0x634   : > { %v2933_v45 = vpop.f32.mrf.mxu0  ;;  %6262 = vrcp.f32 %v2063_v36 }
 0x635   : > { %v6253_v30 = vpop.eup %6252  ;;  %v8257_v55 = vsel %vm588_vm6, %v2933_v45, -1e+30  ;;  %6264 = vrcp.f32 %v2061_v23  ;;  %v2537_v23 = vsub.f32 %v8039_v16, %v8192_v42 }
 0x636   : > { %v2628_v40 = vmul.f32 %v6253_v30, %v8166_v50  ;;  %2987 = vmax.xlane.f32.xlu1 %v8257_v55  ;;  %v6255_v33 = vpop.eup %6254 }
 0x637   : > { %v6257_v43 = vpop.eup %6256  ;;  %v2090_v56 = vmul.f32 %v6255_v33, %v8135_v47 }
 0x638   : > { %v2644_v54 = vpack.c.bf16 %v2629_v12, %v2628_v40  ;;  %v2091_v48 = vmul.f32 %v6257_v43, %v8108_v58  ;;  %v6259_v4 = vpop.eup %6258  ;;  %v2558_v12 = vmul.f32 1.442695, %v2537_v23 }
 0x639   : > { %v6261_v47 = vpop.eup %6260  ;;  %v2092_v58 = vmul.f32 %v6259_v4, %v8152_v22 }
 0x63a   : > { %2684 = vmatmul.bf16.vlgmr.msrb.gmra.mxu1 %v2644_v54  ;;  %v2101_v6 = vpack.c.bf16 %v2091_v48, %v2090_v56  ;;  %v2093_v57 = vmul.f32 %v6261_v47, %v8125_v3  ;;  %v6263_v22 = vpop.eup %6262  ;;  %v2471_v7 = vpop.f32.mrf.mxu1  ;;  %v2562_v47 = vmul.f32 1.442695, %v2539_v51 }
 0x63b   : > { %v6265_v45 = vpop.eup %6264  ;;  %v8293_v36 = vsel %vm595_vm13, %v2471_v7, -1e+30  ;;  %v2095_v30 = vmul.f32 %v6263_v22, %v8159_v18 }
 0x63c   : > { %v2935_v13 = vpop.f32.mrf.mxu0  ;;  %v2102_v9 = vpack.c.bf16 %v2093_v57, %v2092_v58 }
 0x63d   : > { %v8265_v37 = vsel %vm589_vm7, %v2935_v13, -1e+30 }
 0x63e   : > { %2989 = vmax.xlane.f32.xlu0 %v8265_v37 }
 0x642   : > { %2161 = vmatmul.bf16.gmra.mxu2 %v2101_v6 }
 0x644   : > { %v2938_v50 = vpop.f32.mrf.mxu0 }
 0x645   : > { %v8273_v46 = vsel %vm590_vm8, %v2938_v50, -1e+30  ;;  %v2474_v50 = vpop.f32.mrf.mxu1 }
 0x646   : > { %3133 = vrot.lane.b32.xlu2 %v7401_v44, %s6566_s21  ;;  %2991 = vmax.xlane.f32.xlu1 %v8273_v46  ;;  %v2536_v44 = vsub.f32 %v8030_v41, %v8187_v21  ;;  %v2094_v41 = vmul.f32 %v6265_v45, %v8138_v63  ;;  %v2585_v63 = vpop.xlane.xlu1 %2584  ;;  %v8338_v57 = vsel %vm9830_vm2, %v2474_v50, -1e+30 }
 0x648   : > { %v2556_v3 = vmul.f32 1.442695, %v2536_v44  ;;  %v2103_v21 = vpack.c.bf16 %v2095_v30, %v2094_v41 }
 0x64a   : > { %6266 = vpow2.f32 %v2556_v3 }
 0x64b   : > { %6268 = vpow2.f32 %v2558_v12 }
 0x64c   : > { %v2940_v25 = vpop.f32.mrf.mxu0  ;;  %6270 = vrcp.f32 %v2585_v63 }
 0x64d   : > { %v8309_v18 = vsel %vm591_vm9, %v2940_v25, -1e+30  ;;  %v8360_v63 = vpop.f32.mrf.mxu1 }
 0x650   : > { %v8300_v40 = vpop.eup %6266 }
 0x651   : > { %v8303_v33 = vpop.eup %6268 }
 0x652   : > { %2166 = vmatmul.bf16.gmra.mxu2 %v2102_v9  ;;  %v6271_v29 = vpop.eup %6270 }
 0x653   : > { %v2630_v25 = vmul.f32 %v6271_v29, %v8178_v39 }
 0x654   : > { %v2943_v38 = vpop.f32.mrf.mxu0 }
 0x655   : > { %v8285_v59 = vsel %vm592_vm10, %v2943_v38, -1e+30 }
 0x656   : > { %2995 = vmax.xlane.f32.xlu1 %v8285_v59 }
 0x65c   : > { %v2945_v61 = vpop.f32.mrf.mxu0 }
 0x65d   : > { %v8321_v43 = vsel %vm593_vm11, %v2945_v61, -1e+30 }
 0x65e   : > { %2522 = vmax.xlane.f32.xlu1 %v8293_v36 }
 0x662   : > { %2171 = vmatmul.bf16.gmra.mxu2 %v2103_v21 }
 0x664   : > { %v2948_v54 = vpop.f32.mrf.mxu0 }
 0x665   : > { %v8327_v56 = vsel %vm594_vm12, %v2948_v54, -1e+30 }
 0x666   : > { %2588 = vadd.xlane.f32.xlu1 %v8300_v40 }
 0x66c   : > { %v2950_v16 = vpop.f32.mrf.mxu0 }
 0x66d   : > { %v8315_v42 = vsel %vm595_vm13, %v2950_v16, -1e+30  ;;  %v2538_v16 = vsub.f32 %v8048_v17, %v8198_v31  ;;  %v2479_v31 = vpop.f32.mrf.mxu1 }
 0x66e   : > { %2590 = vadd.xlane.f32.xlu1 %v8303_v33 }
 0x66f   : > { %2993 = vmax.xlane.f32.xlu2 %v8309_v18 }
 0x676   : > { %3001 = vmax.xlane.f32.xlu1 %v8315_v42 }
 0x677   : > { %2997 = vmax.xlane.f32.xlu2 %v8321_v43 }
 0x679   : > { %v2142_v19 = vpop.f32.mrf.mxu2 }
 0x67d   : > { %v2587_v13 = vpop.xlane.xlu1 %2586 }
 0x67e   : > { %6272 = vrcp.f32 %v2587_v13 }
 0x67f   : > { %2999 = vmax.xlane.f32.xlu2 %v8327_v56  ;;  %6274 = vpow2.f32 %v2562_v47 }
 0x681   : > { %v2144_v48 = vpop.f32.mrf.mxu2 }
 0x682   : > { %v2178_v6 = vpack.c.bf16 %v2144_v48, %v2142_v19  ;;  %v2560_v19 = vmul.f32 1.442695, %v2538_v16  ;;  %v8401_v16 = vsel %vm598_vm0, %v2479_v31, -1e+30  ;;  %v5890_v31 = vld [vmem:[%s6723_s23 + $0x28] sm:$0xff] }
 0x683   : > { %2775 = vmatpush.bf16.msrb.mxu3 %v5890_v31 }
 0x684   : > { %v6273_v4 = vpop.eup %6272  ;;  %5492 = vmatmul.msk.bf16.gmra.mxu3 %vm1436_vm1, %v2178_v6 }
 0x685   : > { %v2631_v58 = vmul.f32 %v6273_v4, %v8217_v14  ;;  %v8342_v44 = vpop.eup %6274 }
 0x687   : > { %2524 = vmax.xlane.f32.xlu2 %v8338_v57  ;;  %v2645_v28 = vpack.c.bf16 %v2631_v58, %v2630_v25  ;;  %v2953_v25 = vpop.f32.mrf.mxu0 }
 0x689   : > { %v2980_v49 = vpop.xlane.xlu1 %2979  ;;  %2689 = vmatmul.bf16.gmra.mxu1 %v2645_v28  ;;  %v2481_v28 = vpop.f32.mrf.mxu1 }
 0x68a   : > { %v3011_v9 = vsub.f32 %v8227_v52, %v2980_v49 }
 0x68c   : > { %v3027_v38 = vmul.f32 1.442695, %v3011_v9 }
 0x68e   : > { %6276 = vpow2.f32 %v3027_v38 }
 0x68f   : > { %2594 = vadd.xlane.f32.xlu2 %v8342_v44 }
 0x691   : > { %v2982_v39 = vpop.xlane.xlu0 %2981 }
 0x692   : > { %v3012_v14 = vsub.f32 %v8235_v53, %v2982_v39 }
 0x694   : > { %v8346_v22 = vpop.eup %6276  ;;  %v3029_v7 = vmul.f32 1.442695, %v3012_v14 }
 0x695   : > { %3059 = vadd.xlane.f32.xlu0 %v8346_v22  ;;  %v2147_v3 = vpop.f32.mrf.mxu2 }
 0x696   : > { %6278 = vpow2.f32 %v3029_v7  ;;  %v2955_v7 = vpop.f32.mrf.mxu0 }
 0x699   : > { %v2984_v45 = vpop.xlane.xlu1 %2983 }
 0x69a   : > { %v3013_v30 = vsub.f32 %v8243_v60, %v2984_v45 }
 0x69c   : > { %v8350_v52 = vpop.eup %6278  ;;  %v3031_v61 = vmul.f32 1.442695, %v3013_v30 }
 0x69d   : > { %3061 = vadd.xlane.f32.xlu1 %v8350_v52  ;;  %v2149_v23 = vpop.f32.mrf.mxu2 }
 0x69e   : > { %6280 = vpow2.f32 %v3031_v61  ;;  %v2179_v41 = vpack.c.bf16 %v2149_v23, %v2147_v3  ;;  %v2541_v61 = vsub.f32 %v8066_v24, %v8211_v0 }
 0x6a0   : > { %5493 = vmatmul.msk.bf16.gmra.mxu3 %vm1436_vm1, %v2179_v41  ;;  %v2958_v41 = vpop.f32.mrf.mxu0 }
 0x6a1   : > { %v2986_v53 = vpop.xlane.xlu2 %2985 }
 0x6a2   : > { %v3014_v21 = vsub.f32 %v8249_v32, %v2986_v53 }
 0x6a4   : > { %v8355_v12 = vpop.eup %6280  ;;  %v3033_v54 = vmul.f32 1.442695, %v3014_v21  ;;  %v2566_v21 = vmul.f32 1.442695, %v2541_v61 }
 0x6a5   : > { %3063 = vadd.xlane.f32.xlu1 %v8355_v12  ;;  %v2152_v60 = vpop.f32.mrf.mxu2 }
 0x6a6   : > { %6282 = vpow2.f32 %v3033_v54 }
 0x6a7   : > { %6284 = vpow2.f32 %v2560_v19 }
 0x6a9   : > { %v3134_v13 = vpop.permute.xlu2 %3133  ;;  %3131 = vrot.lane.b32.xlu0 %v7406_v34, %s6566_s21  ;;  %v2988_v51 = vpop.xlane.xlu1 %2987 }
 0x6aa   : > { %v3015_v32 = vsub.f32 %v8257_v55, %v2988_v51  ;;  %3161 = vmatpush.bf16.msra.mxu1 %v3134_v13  ;;  %v8416_v51 = vsel %vm594_vm12, %v8280_v27, -1e+30 }
 0x6ac   : > { %v8365_v48 = vpop.eup %6282  ;;  %v3035_v29 = vmul.f32 1.442695, %v3015_v32 }
 0x6ad   : > { %3065 = vadd.xlane.f32.xlu1 %v8365_v48  ;;  %v2154_v17 = vpop.f32.mrf.mxu2  ;;  %v8370_v34 = vpop.eup %6284 }
 0x6ae   : > { %6286 = vpow2.f32 %v3035_v29  ;;  %v2180_v6 = vpack.c.bf16 %v2154_v17, %v2152_v60  ;;  %v8406_v60 = vsel %vm598_vm0, %v2958_v41, -1e+30 }
 0x6b0   : > { %5494 = vmatmul.msk.bf16.gmra.mxu3 %vm1436_vm1, %v2180_v6 }
 0x6b1   : > { %v2990_v50 = vpop.xlane.xlu0 %2989 }
 0x6b2   : > { %v3016_v4 = vsub.f32 %v8265_v37, %v2990_v50  ;;  %v8382_v37 = vsel %vm599_vm14, %v2481_v28, -1e+30 }
 0x6b4   : > { %v8372_v47 = vpop.eup %6286  ;;  %v3037_v55 = vmul.f32 1.442695, %v3016_v4  ;;  %v5889_v4 = vld [vmem:[%s6723_s23 + $0x20] sm:$0xff] }
 0x6b5   : > { %3067 = vadd.xlane.f32.xlu2 %v8372_v47  ;;  %2592 = vadd.xlane.f32.xlu1 %v8370_v34  ;;  %v2157_v58 = vpop.f32.mrf.mxu2 }
 0x6b6   : > { %6288 = vpow2.f32 %v3037_v55  ;;  %2776 = vmatpush.bf16.msrb.mxu3 %v5889_v4 }
 0x6b9   : > { %v2992_v49 = vpop.xlane.xlu1 %2991 }
 0x6ba   : > { %v3017_v9 = vsub.f32 %v8273_v46, %v2992_v49  ;;  %v9831_v46 = vld [vmem:[#allocation24_spill] sm:$0xff] }
 0x6bb   : > { %vm9832_vm3 = vcmp.le.s32.totalorder %v7444_v20, %v9831_v46 }
 0x6bc   : > { %v8377_v38 = vpop.eup %6288  ;;  %v3039_v39 = vmul.f32 1.442695, %v3017_v9  ;;  %v8392_v30 = vsel %vm9832_vm3, %v2955_v7, -1e+30  ;;  %vm9834_vm4 = vmmov %vm9832_vm3  ;;  %v2540_v7 = vsub.f32 %v8056_v10, %v8206_v62  ;;  %v2685_v62 = vpop.f32.mrf.mxu1 }
 0x6bd   : > { %2530 = vmax.xlane.f32.xlu2 %v8382_v37  ;;  %3069 = vadd.xlane.f32.xlu1 %v8377_v38  ;;  %v2159_v14 = vpop.f32.mrf.mxu2  ;;  %v8428_v26 = vsel %vm9834_vm4, %v8360_v63, -1e+30  ;;  %v8439_v63 = vsel %vm9835_vm5, %v2953_v25, -1e+30 }
 0x6be   : > { %6290 = vpow2.f32 %v3039_v39  ;;  %v2181_v3 = vpack.c.bf16 %v2159_v14, %v2157_v58  ;;  %v2564_v61 = vmul.f32 1.442695, %v2540_v7 }
 0x6bf   : > { %6292 = vpow2.f32 %v2566_v21 }
 0x6c0   : > { %5495 = vmatmul.msk.bf16.gmra.mxu3 %vm1436_vm1, %v2181_v3 }
 0x6c4   : > { %v8387_v45 = vpop.eup %6290 }
 0x6c5   : > { %3071 = vadd.xlane.f32.xlu2 %v8387_v45  ;;  %3005 = vmax.xlane.f32.xlu1 %v8392_v30  ;;  %v2162_v23 = vpop.f32.mrf.mxu2  ;;  %v8419_v29 = vpop.eup %6292 }
 0x6c9   : > { %v2996_v53 = vpop.xlane.xlu1 %2995 }
 0x6ca   : > { %v3019_v24 = vsub.f32 %v8285_v59, %v2996_v53 }
 0x6cc   : > { %v3043_v32 = vmul.f32 1.442695, %v3019_v24 }
 0x6cd   : > { %3007 = vmax.xlane.f32.xlu2 %v8406_v60  ;;  %2528 = vmax.xlane.f32.xlu1 %v8401_v16  ;;  %v2164_v0 = vpop.f32.mrf.mxu2 }
 0x6ce   : > { %v2182_v19 = vpack.c.bf16 %v2164_v0, %v2162_v23  ;;  %6294 = vpow2.f32 %v3043_v32 }
 0x6d0   : > { %5496 = vmatmul.msk.bf16.gmra.mxu3 %vm1436_vm1, %v2182_v19  ;;  %v2960_v19 = vpop.f32.mrf.mxu0 }
 0x6d1   : > { %v2523_v13 = vpop.xlane.xlu1 %2522 }
 0x6d2   : > { %v2543_v59 = vsub.f32 %v8293_v36, %v2523_v13 }
 0x6d3   : > { %2520 = vmax.xlane.f32.xlu0 %v8416_v51 }
 0x6d4   : > { %v2570_v50 = vmul.f32 1.442695, %v2543_v59  ;;  %v8431_v27 = vpop.eup %6294  ;;  %v2687_v59 = vpop.f32.mrf.mxu1 }
 0x6d5   : > { %2598 = vadd.xlane.f32.xlu1 %v8419_v29  ;;  %v2167_v17 = vpop.f32.mrf.mxu2 }
 0x6d6   : > { %6296 = vpow2.f32 %v2570_v50 }
 0x6d9   : > { %v2589_v6 = vpop.xlane.xlu1 %2588 }
 0x6da   : > { %6298 = vrcp.f32 %v2589_v6  ;;  %v2725_v6 = vpack.c.bf16 %v2687_v59, %v2685_v62 }
 0x6db   : > { %2526 = vmax.xlane.f32.xlu0 %v8428_v26 }
 0x6dc   : > { %v8443_v9 = vpop.eup %6296 }
 0x6dd   : > { %3075 = vadd.xlane.f32.xlu1 %v8431_v27  ;;  %v2169_v36 = vpop.f32.mrf.mxu2 }
 0x6de   : > { %v2183_v55 = vpack.c.bf16 %v2169_v36, %v2167_v17 }
 0x6e0   : > { %5497 = vmatmul.msk.bf16.gmra.mxu3 %vm1436_vm1, %v2183_v55  ;;  %v6299_v14 = vpop.eup %6298 }
 0x6e1   : > { %v2591_v58 = vpop.xlane.xlu1 %2590  ;;  %v2632_v25 = vmul.f32 %v6299_v14, %v8300_v40 }
 0x6e2   : > { %6300 = vrcp.f32 %v2591_v58  ;;  %v2994_v28 = vpop.xlane.xlu2 %2993 }
 0x6e3   : > { %v3018_v49 = vsub.f32 %v8309_v18, %v2994_v28  ;;  %3003 = vmax.xlane.f32.xlu0 %v8439_v63 }
 0x6e5   : > { %v3041_v39 = vmul.f32 1.442695, %v3018_v49  ;;  %2602 = vadd.xlane.f32.xlu1 %v8443_v9  ;;  %v2172_v3 = vpop.f32.mrf.mxu2 }
 0x6e7   : > { %6302 = vpow2.f32 %v3041_v39 }
 0x6e8   : > { %v6301_v8 = vpop.eup %6300  ;;  %6304 = vpow2.f32 %v2564_v61 }
 0x6e9   : > { %v2633_v46 = vmul.f32 %v6301_v8, %v8303_v33  ;;  %v8476_v4 = vpop.xlane.xlu1 %3001 }
 0x6ea   : > { %v2998_v18 = vpop.xlane.xlu2 %2997 }
 0x6eb   : > { %v2646_v23 = vpack.c.bf16 %v2633_v46, %v2632_v25  ;;  %v3020_v41 = vsub.f32 %v8321_v43, %v2998_v18 }
 0x6ed   : > { %v8451_v53 = vpop.eup %6302  ;;  %v3045_v21 = vmul.f32 1.442695, %v3020_v41  ;;  %2694 = vmatmul.bf16.vlgmr.msra.gmra.mxu2 %v2646_v23  ;;  %v2174_v54 = vpop.f32.mrf.mxu2 }
 0x6ee   : > { %3073 = vadd.xlane.f32.xlu0 %v8451_v53  ;;  %v2184_v10 = vpack.c.bf16 %v2174_v54, %v2172_v3  ;;  %v8456_v24 = vpop.eup %6304 }
 0x6ef   : > { %6306 = vpow2.f32 %v3045_v21 }
 0x6f0   : > { %5498 = vmatmul.msk.bf16.gmra.mxu3 %vm1436_vm1, %v2184_v10 }
 0x6f2   : > { %v3000_v40 = vpop.xlane.xlu2 %2999 }
 0x6f3   : > { %v3021_v33 = vsub.f32 %v8327_v56, %v3000_v40  ;;  %v8468_v56 = vsel %vm599_vm14, %v2960_v19, -1e+30 }
 0x6f5   : > { %v8458_v0 = vpop.eup %6306  ;;  %v3047_v43 = vmul.f32 1.442695, %v3021_v33 }
 0x6f6   : > { %3077 = vadd.xlane.f32.xlu2 %v8458_v0  ;;  %2596 = vadd.xlane.f32.xlu0 %v8456_v24 }
 0x6f7   : > { %6308 = vpow2.f32 %v3047_v43 }
 0x6fa   : > { %v2525_v13 = vpop.xlane.xlu2 %2524 }
 0x6fb   : > { %v2544_v32 = vsub.f32 %v8338_v57, %v2525_v13 }
 0x6fd   : > { %v8463_v17 = vpop.eup %6308  ;;  %v2572_v31 = vmul.f32 1.442695, %v2544_v32 }
 0x6fe   : > { %3079 = vadd.xlane.f32.xlu2 %v8463_v17  ;;  %3009 = vmax.xlane.f32.xlu0 %v8468_v56 }
 0x6ff   : > { %6310 = vpow2.f32 %v2572_v31 }
 0x700   : > { %5531 = vmatmul.msk.bf16.vlgmr.msrb.gmra.mxu3 %vm1436_vm1, %v2725_v6 }
 0x702   : > { %v2595_v8 = vpop.xlane.xlu2 %2594 }
 0x705   : > { %v8473_v50 = vpop.eup %6310 }
 0x706   : > { %v2690_v57 = vpop.f32.mrf.mxu1  ;;  %2604 = vadd.xlane.f32.xlu1 %v8473_v50 }
 0x708   : > { %v3060_v55 = vpop.xlane.xlu0 %3059 }
 0x70e   : > { %v2692_v36 = vpop.f32.mrf.mxu1 }
 0x70f   : > { %v2726_v20 = vpack.c.bf16 %v2692_v36, %v2690_v57 }
 0x710   : > { %v3062_v5 = vpop.xlane.xlu1 %3061 }
 0x711   : > { %6312 = vrcp.f32 %v3062_v5  ;;  %5532 = vmatmul.msk.bf16.gmra.mxu3 %vm1436_vm1, %v2726_v20 }
 0x712   : > { %6314 = vrcp.f32 %v3060_v55 }
 0x717   : > { %v6313_v58 = vpop.eup %6312 }
 0x718   : > { %v6315_v28 = vpop.eup %6314  ;;  %v3064_v49 = vpop.xlane.xlu1 %3063  ;;  %v3108_v39 = vmul.f32 %v6313_v58, %v8350_v52 }
 0x719   : > { %v3107_v14 = vmul.f32 %v6315_v28, %v8346_v22 }
 0x71b   : > { %v3132_v7 = vpop.permute.xlu0 %3131  ;;  %v3123_v3 = vpack.c.bf16 %v3108_v39, %v3107_v14 }
 0x71c   : > { %3162 = vmatpush.bf16.msra.mxu1 %v3132_v7 }
 0x71f   : > { %3163 = vmatmul.bf16.vlgmr.msra.gmra.mxu1 %v3123_v3 }
 0x720   : > { %v3066_v25 = vpop.xlane.xlu1 %3065 }
 0x721   : > { %6316 = vrcp.f32 %v3066_v25 }
 0x722   : > { %6318 = vrcp.f32 %v3064_v49 }
 0x723   : > { %6320 = vrcp.f32 %v2595_v8 }
 0x727   : > { %v6317_v46 = vpop.eup %6316 }
 0x728   : > { %v6319_v61 = vpop.eup %6318  ;;  %v3068_v18 = vpop.xlane.xlu2 %3067  ;;  %v3110_v41 = vmul.f32 %v6317_v46, %v8365_v48 }
 0x729   : > { %v2593_v23 = vpop.xlane.xlu1 %2592  ;;  %v3109_v52 = vmul.f32 %v6319_v61, %v8355_v12  ;;  %v6321_v22 = vpop.eup %6320 }
 0x72a   : > { %6322 = vrcp.f32 %v2593_v23  ;;  %v2635_v33 = vmul.f32 %v6321_v22, %v8342_v44 }
 0x72b   : > { %v3124_v21 = vpack.c.bf16 %v3110_v41, %v3109_v52 }
 0x72f   : > { %3168 = vmatmul.bf16.gmra.mxu1 %v3124_v21 }
 0x730   : > { %v6323_v54 = vpop.eup %6322  ;;  %v2531_v10 = vpop.xlane.xlu2 %2530 }
 0x731   : > { %v3070_v62 = vpop.xlane.xlu1 %3069  ;;  %v2634_v40 = vmul.f32 %v6323_v54, %v8370_v34 }
 0x732   : > { %6324 = vrcp.f32 %v3070_v62 }
 0x733   : > { %6326 = vrcp.f32 %v3068_v18  ;;  %v2647_v43 = vpack.c.bf16 %v2635_v33, %v2634_v40 }
 0x735   : > { %2699 = vmatmul.bf16.gmra.mxu2 %v2647_v43 }
 0x738   : > { %v6325_v19 = vpop.eup %6324  ;;  %v3072_v48 = vpop.xlane.xlu2 %3071 }
 0x739   : > { %v6327_v13 = vpop.eup %6326  ;;  %v3006_v32 = vpop.xlane.xlu1 %3005  ;;  %v3112_v59 = vmul.f32 %v6325_v19, %v8377_v38  ;;  %v3022_v38 = vsub.f32 %v8315_v42, %v8476_v4 }
 0x73a   : > { %v3024_v12 = vsub.f32 %v8392_v30, %v3006_v32  ;;  %v3111_v6 = vmul.f32 %v6327_v13, %v8372_v47 }
 0x73b   : > { %v3049_v58 = vmul.f32 1.442695, %v3022_v38 }
 0x73c   : > { %v3053_v31 = vmul.f32 1.442695, %v3024_v12  ;;  %v3125_v57 = vpack.c.bf16 %v3112_v59, %v3111_v6 }
 0x73e   : > { %6328 = vpow2.f32 %v3053_v31 }
 0x73f   : > { %3173 = vmatmul.bf16.gmra.mxu1 %v3125_v57 }
 0x740   : > { %v3008_v34 = vpop.xlane.xlu2 %3007 }
 0x741   : > { %v3025_v44 = vsub.f32 %v8406_v60, %v3008_v34  ;;  %v2529_v28 = vpop.xlane.xlu1 %2528 }
 0x743   : > { %v3055_v55 = vmul.f32 1.442695, %v3025_v44 }
 0x744   : > { %v8489_v36 = vpop.eup %6328 }
 0x745   : > { %3085 = vadd.xlane.f32.xlu1 %v8489_v36  ;;  %6330 = vpow2.f32 %v3055_v55 }
 0x746   : > { %v2521_v20 = vpop.xlane.xlu0 %2520 }
 0x747   : > { %v2542_v30 = vsub.f32 %v8416_v51, %v2521_v20  ;;  %v2546_v51 = vsub.f32 %v8401_v16, %v2529_v28 }
 0x749   : > { %v2568_v5 = vmul.f32 1.442695, %v2542_v30  ;;  %v2576_v42 = vmul.f32 1.442695, %v2546_v51  ;;  %v2599_v18 = vpop.xlane.xlu1 %2598 }
 0x74b   : > { %v8495_v47 = vpop.eup %6330  ;;  %6332 = vpow2.f32 %v2568_v5 }
 0x74c   : > { %6334 = vpow2.f32 %v3049_v58 }
 0x74d   : > { %3087 = vadd.xlane.f32.xlu1 %v8495_v47 }
 0x74e   : > { %v2527_v60 = vpop.xlane.xlu0 %2526 }
 0x74f   : > { %v2545_v49 = vsub.f32 %v8428_v26, %v2527_v60  ;;  %v2547_v26 = vsub.f32 %v8382_v37, %v2531_v10 }
 0x751   : > { %v8499_v39 = vpop.eup %6332  ;;  %v2574_v14 = vmul.f32 1.442695, %v2545_v49  ;;  %v2578_v16 = vmul.f32 1.442695, %v2547_v26  ;;  %v3076_v62 = vpop.xlane.xlu1 %3075 }
 0x752   : > { %2600 = vadd.xlane.f32.xlu0 %v8499_v39  ;;  %v8504_v3 = vpop.eup %6334 }
 0x753   : > { %6336 = vpow2.f32 %v2574_v14 }
 0x754   : > { %6338 = vpow2.f32 %v2576_v42 }
 0x756   : > { %v3004_v4 = vpop.xlane.xlu0 %3003 }
 0x757   : > { %v3023_v7 = vsub.f32 %v8439_v63, %v3004_v4  ;;  %v5891_v4 = vld [vmem:[%s6723_s23 + $0x30] sm:$0xff] }
 0x759   : > { %v8506_v8 = vpop.eup %6336  ;;  %v3051_v25 = vmul.f32 1.442695, %v3023_v7  ;;  %v2603_v20 = vpop.xlane.xlu1 %2602 }
 0x75a   : > { %3081 = vadd.xlane.f32.xlu0 %v8504_v3  ;;  %2606 = vadd.xlane.f32.xlu2 %v8506_v8  ;;  %v8511_v46 = vpop.eup %6338 }
 0x75b   : > { %6340 = vpow2.f32 %v3051_v25 }
 0x75c   : > { %6342 = vrcp.f32 %v3072_v48 }
 0x761   : > { %v8513_v61 = vpop.eup %6340  ;;  %v3074_v63 = vpop.xlane.xlu0 %3073 }
 0x762   : > { %6344 = vrcp.f32 %v3074_v63  ;;  %2608 = vadd.xlane.f32.xlu2 %v8511_v46  ;;  %3083 = vadd.xlane.f32.xlu0 %v8513_v61  ;;  %v6343_v23 = vpop.eup %6342 }
 0x763   : > { %6346 = vpow2.f32 %v2578_v16  ;;  %v3113_v21 = vmul.f32 %v6343_v23, %v8387_v45 }
 0x764   : > { %6348 = vrcp.f32 %v2599_v18 }
 0x768   : > { %v6345_v41 = vpop.eup %6344 }
 0x769   : > { %v8517_v52 = vpop.eup %6346  ;;  %v2597_v37 = vpop.xlane.xlu0 %2596  ;;  %v3114_v22 = vmul.f32 %v6345_v41, %v8451_v53 }
 0x76a   : > { %2610 = vadd.xlane.f32.xlu0 %v8517_v52  ;;  %v3078_v54 = vpop.xlane.xlu2 %3077  ;;  %6350 = vrcp.f32 %v2597_v37  ;;  %v6349_v40 = vpop.eup %6348 }
 0x76b   : > { %v3126_v10 = vpack.c.bf16 %v3114_v22, %v3113_v21  ;;  %6352 = vrcp.f32 %v3078_v54  ;;  %v2637_v45 = vmul.f32 %v6349_v40, %v8419_v29  ;;  %v5892_v29 = vld [vmem:[%s6723_s23 + $0x38] sm:$0xff]  ;;  %v8539_v41 = vpop.f32.mrf.mxu3 }
 0x76c   : > { %6354 = vrcp.f32 %v3076_v62  ;;  %3254 = vmatpush.bf16.msrb.mxu2 %v5892_v29 }
 0x76d   : > { %3178 = vmatmul.bf16.gmra.mxu1 %v3126_v10 }
 0x770   : > { %v2695_v33 = vpop.f32.mrf.mxu2  ;;  %v6351_v43 = vpop.eup %6350  ;;  %3255 = vmatpush.bf16.msrb.mxu2 %v5891_v4 }
 0x771   : > { %v3010_v19 = vpop.xlane.xlu0 %3009  ;;  %v2636_v48 = vmul.f32 %v6351_v43, %v8456_v24  ;;  %v6353_v53 = vpop.eup %6352 }
 0x772   : > { %v3026_v13 = vsub.f32 %v8468_v56, %v3010_v19  ;;  %v6355_v59 = vpop.eup %6354  ;;  %v3116_v31 = vmul.f32 %v6353_v53, %v8458_v0 }
 0x773   : > { %v2648_v12 = vpack.c.bf16 %v2637_v45, %v2636_v48  ;;  %v3115_v34 = vmul.f32 %v6355_v59, %v8431_v27  ;;  %v3080_v27 = vpop.xlane.xlu2 %3079  ;;  %v8543_v40 = vpop.f32.mrf.mxu3 }
 0x774   : > { %v3057_v32 = vmul.f32 1.442695, %v3026_v13 }
 0x775   : > { %2704 = vmatmul.bf16.gmra.mxu2 %v2648_v12  ;;  %v3127_v56 = vpack.c.bf16 %v3116_v31, %v3115_v34 }
 0x776   : > { %6356 = vpow2.f32 %v3057_v32 }
 0x777   : > { %6358 = vrcp.f32 %v2603_v20 }
 0x778   : > { %v2697_v6 = vpop.f32.mrf.mxu2 }
 0x779   : > { %v2727_v57 = vpack.c.bf16 %v2697_v6, %v2695_v33  ;;  %v2605_v51 = vpop.xlane.xlu1 %2604 }
 0x77b   : > { %5533 = vmatmul.msk.bf16.gmra.mxu3 %vm1436_vm1, %v2727_v57  ;;  %v8548_v45 = vpop.f32.mrf.mxu3 }
 0x77c   : > { %v8528_v44 = vpop.eup %6356 }
 0x77d   : > { %3183 = vmatmul.bf16.gmra.mxu1 %v3127_v56  ;;  %3089 = vadd.xlane.f32.xlu2 %v8528_v44  ;;  %v6359_v5 = vpop.eup %6358 }
 0x77e   : > { %v2639_v28 = vmul.f32 %v6359_v5, %v8443_v9 }
 0x7b8   : > { %v2700_v24 = vpop.f32.mrf.mxu2  ;;  %v3086_v9 = vpop.xlane.xlu1 %3085 }
 0x7c0   : > { %v2702_v55 = vpop.f32.mrf.mxu2  ;;  %v3088_v13 = vpop.xlane.xlu1 %3087 }
 0x7c1   : > { %v2728_v30 = vpack.c.bf16 %v2702_v55, %v2700_v24 }
 0x7c3   : > { %5534 = vmatmul.msk.bf16.gmra.mxu3 %vm1436_vm1, %v2728_v30 }
 0x7c5   : > { %v2601_v0 = vpop.xlane.xlu0 %2600 }
 0x7c6   : > { %6360 = vrcp.f32 %v2601_v0 }
 0x7c7   : > { %6362 = vrcp.f32 %v3080_v27 }
 0x7cc   : > { %v6361_v38 = vpop.eup %6360 }
 0x7cd   : > { %v3082_v58 = vpop.xlane.xlu0 %3081  ;;  %v2638_v60 = vmul.f32 %v6361_v38, %v8499_v39  ;;  %v2607_v49 = vpop.xlane.xlu2 %2606 }
 0x7ce   : > { %6364 = vrcp.f32 %v3082_v58  ;;  %v6363_v42 = vpop.eup %6362 }
 0x7cf   : > { %v2649_v14 = vpack.c.bf16 %v2639_v28, %v2638_v60  ;;  %6366 = vrcp.f32 %v2607_v49  ;;  %v3117_v26 = vmul.f32 %v6363_v42, %v8463_v17 }
 0x7d0   : > { %6368 = vrcp.f32 %v2605_v51 }
 0x7d1   : > { %2709 = vmatmul.bf16.gmra.mxu2 %v2649_v14 }
 0x7d4   : > { %v6365_v7 = vpop.eup %6364 }
 0x7d5   : > { %v3084_v25 = vpop.xlane.xlu0 %3083  ;;  %v3118_v16 = vmul.f32 %v6365_v7, %v8504_v3  ;;  %v6367_v63 = vpop.eup %6366 }
 0x7d6   : > { %v6369_v18 = vpop.eup %6368  ;;  %6370 = vrcp.f32 %v3084_v25  ;;  %v2641_v23 = vmul.f32 %v6367_v63, %v8506_v8  ;;  %v2609_v10 = vpop.xlane.xlu2 %2608 }
 0x7d7   : > { %v3128_v39 = vpack.c.bf16 %v3118_v16, %v3117_v26  ;;  %6372 = vrcp.f32 %v3086_v9  ;;  %v2640_v37 = vmul.f32 %v6369_v18, %v8473_v50  ;;  %v3164_v3 = vpop.f32.mrf.mxu1 }
 0x7d9   : > { %3188 = vmatmul.bf16.gmra.mxu1 %v3128_v39  ;;  %v2650_v22 = vpack.c.bf16 %v2641_v23, %v2640_v37 }
 0x7dc   : > { %v6371_v54 = vpop.eup %6370 }
 0x7dd   : > { %v2611_v21 = vpop.xlane.xlu0 %2610  ;;  %v6373_v17 = vpop.eup %6372  ;;  %v3119_v62 = vmul.f32 %v6371_v54, %v8513_v61 }
 0x7de   : > { %6374 = vrcp.f32 %v2611_v21  ;;  %v3120_v8 = vmul.f32 %v6373_v17, %v8489_v36  ;;  %v8550_v36 = vpop.f32.mrf.mxu3 }
 0x7df   : > { %6376 = vrcp.f32 %v2609_v10  ;;  %v3166_v53 = vpop.f32.mrf.mxu1 }
 0x7e0   : > { %v3129_v43 = vpack.c.bf16 %v3120_v8, %v3119_v62  ;;  %6378 = vrcp.f32 %v3088_v13  ;;  %v2316_v13 = vadd.f32 %v8100_v15, %v8539_v41 }
 0x7e1   : > { %2714 = vmatmul.bf16.gmra.mxu2 %v2650_v22 }
 0x7e4   : > { %v6375_v33 = vpop.eup %6374 }
 0x7e5   : > { %v6377_v19 = vpop.eup %6376  ;;  %v2643_v50 = vmul.f32 %v6375_v33, %v8517_v52 }
 0x7e6   : > { %v2642_v48 = vmul.f32 %v6377_v19, %v8511_v46  ;;  %v6379_v61 = vpop.eup %6378  ;;  %v3204_v46 = vpack.c.bf16 %v3166_v53, %v3164_v3  ;;  %v8554_v56 = vpop.f32.mrf.mxu3 }
 0x7e7   : > { %v3169_v31 = vpop.f32.mrf.mxu1  ;;  %v3121_v6 = vmul.f32 %v6379_v61, %v8495_v47 }
 0x7e8   : > { %v2651_v32 = vpack.c.bf16 %v2643_v50, %v2642_v48 }
 0x7e9   : > { %3193 = vmatmul.bf16.gmra.mxu1 %v3129_v43 }
 0x7ee   : > { %v8558_v20 = vpop.f32.mrf.mxu3 }
 0x7ef   : > { %v3171_v24 = vpop.f32.mrf.mxu1 }
 0x7f0   : > { %v3090_v12 = vpop.xlane.xlu2 %3089  ;;  %v3205_v0 = vpack.c.bf16 %v3171_v24, %v3169_v31  ;;  %v8593_v31 = vld [vmem:[%s6713_s19] sm:$0xff] }
 0x7f1   : > { %6380 = vrcp.f32 %v3090_v12  ;;  %2719 = vmatmul.bf16.gmra.mxu2 %v2651_v32 }
 0x7f6   : > { %v8561_v47 = vpop.f32.mrf.mxu3 }
 0x7f7   : > { %v6381_v59 = vpop.eup %6380  ;;  %v3174_v30 = vpop.f32.mrf.mxu1 }
 0x7f8   : > { %v3122_v52 = vmul.f32 %v6381_v59, %v8528_v44  ;;  %v2705_v57 = vpop.f32.mrf.mxu2 }
 0x7fa   : > { %v3130_v34 = vpack.c.bf16 %v3122_v52, %v3121_v6  ;;  %v8596_v6 = vperm.slane %v8593_v31, 2  ;;  %v6415_v52 = vld [vmem:[#allocation2 + $0x30] sm:$0xff] }
 0x7fc   : > { %3198 = vmatmul.bf16.gmra.mxu1 %v3130_v34  ;;  %v2318_v34 = vadd.f32 %v8118_v35, %v8543_v40 }
 0x7fe   : > { %v8563_v27 = vpop.f32.mrf.mxu3 }
 0x7ff   : > { %v3176_v44 = vpop.f32.mrf.mxu1 }
 0x800   : > { %v2707_v29 = vpop.f32.mrf.mxu2  ;;  %v3206_v38 = vpack.c.bf16 %v3176_v44, %v3174_v30 }
 0x801   : > { %5555 = vmatmul.msk.bf16.vlgmr.msrb.gmra.mxu2 %vm1436_vm1, %v3204_v46  ;;  %v2729_v55 = vpack.c.bf16 %v2707_v29, %v2705_v57 }
 0x803   : > { %5535 = vmatmul.msk.bf16.gmra.mxu3 %vm1436_vm1, %v2729_v55  ;;  %v6416_v55 = vld [vmem:[#allocation2] sm:$0xff] }
 0x806   : > { %v8566_v58 = vpop.f32.mrf.mxu3 }
 0x807   : > { %v3179_v5 = vpop.f32.mrf.mxu1 }
 0x80e   : > { %v8569_v49 = vpop.f32.mrf.mxu3 }
 0x80f   : > { %v3181_v60 = vpop.f32.mrf.mxu1 }
 0x810   : > { %v3207_v28 = vpack.c.bf16 %v3181_v60, %v3179_v5  ;;  %v6417_v60 = vld [vmem:[#allocation2 + $0x58] sm:$0xff] }
 0x811   : > { %5556 = vmatmul.msk.bf16.gmra.mxu2 %vm1436_vm1, %v3205_v0  ;;  %v2321_v0 = vadd.f32 %v8133_v1, %v8548_v45 }
 0x816   : > { %v8571_v51 = vpop.f32.mrf.mxu3 }
 0x817   : > { %v3184_v14 = vpop.f32.mrf.mxu1 }
 0x81e   : > { %v8574_v7 = vpop.f32.mrf.mxu3 }
 0x81f   : > { %v3186_v42 = vpop.f32.mrf.mxu1 }
 0x820   : > { %v3208_v4 = vpack.c.bf16 %v3186_v42, %v3184_v14  ;;  %v2323_v14 = vadd.f32 %v8145_v2, %v8550_v36 }
 0x821   : > { %5557 = vmatmul.msk.bf16.gmra.mxu2 %vm1436_vm1, %v3206_v38 }
 0x826   : > { %v8576_v25 = vpop.f32.mrf.mxu3 }
 0x82e   : > { %v8578_v63 = vpop.f32.mrf.mxu3 }
 0x831   : > { %5558 = vmatmul.msk.bf16.gmra.mxu2 %vm1436_vm1, %v3207_v28 }
 0x836   : > { %v8582_v37 = vpop.f32.mrf.mxu3 }
 0x83e   : > { %v8584_v17 = vpop.f32.mrf.mxu3 }
 0x841   : > { %5559 = vmatmul.msk.bf16.gmra.mxu2 %vm1436_vm1, %v3208_v4 }
 0x846   : > { %v2778_v33 = vpop.f32.mrf.mxu3 }
 0x847   : > { %v2818_v12 = vadd.f32 %v2778_v33, %v2316_v13  ;;  %v6420_v33 = vld [vmem:[#allocation2 + $0x68] sm:$0xff] }
 0x84e   : > { %v2780_v53 = vpop.f32.mrf.mxu3 }
 0x84f   : > { %v2819_v41 = vadd.f32 %v2780_v53, %v2318_v34 }
 0x854   : > { %v2710_v26 = vpop.f32.mrf.mxu2 }
 0x856   : > { %v3189_v16 = vpop.f32.mrf.mxu1  ;;  %v2783_v46 = vpop.f32.mrf.mxu3 }
 0x857   : > { %v2820_v5 = vadd.f32 %v2783_v46, %v2321_v0 }
 0x85c   : > { %v2712_v39 = vpop.f32.mrf.mxu2 }
 0x85d   : > { %v2730_v18 = vpack.c.bf16 %v2712_v39, %v2710_v26 }
 0x85e   : > { %v3191_v9 = vpop.f32.mrf.mxu1  ;;  %v2785_v38 = vpop.f32.mrf.mxu3 }
 0x85f   : > { %5536 = vmatmul.msk.bf16.gmra.mxu3 %vm1436_vm1, %v2730_v18  ;;  %v3209_v23 = vpack.c.bf16 %v3191_v9, %v3189_v16  ;;  %v2821_v4 = vadd.f32 %v2785_v38, %v2323_v14  ;;  %v6418_v16 = vld [vmem:[#allocation2 + $0x18] sm:$0xff]  ;;  %v2326_v18 = vadd.f32 %v8157_v11, %v8554_v56  ;;  %v6422_v14 = vld [vmem:[#allocation2 + $0x48] sm:$0xff] }
 0x861   : > { %5560 = vmatmul.msk.bf16.gmra.mxu2 %vm1436_vm1, %v3209_v23 }
 0x864   : > { %v2715_v21 = vpop.f32.mrf.mxu2 }
 0x866   : > { %v3194_v22 = vpop.f32.mrf.mxu1  ;;  %v2788_v26 = vpop.f32.mrf.mxu3 }
 0x867   : > { %v2822_v23 = vadd.f32 %v2788_v26, %v2326_v18 }
 0x86c   : > { %v2717_v54 = vpop.f32.mrf.mxu2 }
 0x86d   : > { %v2731_v10 = vpack.c.bf16 %v2717_v54, %v2715_v21  ;;  %v6419_v21 = vld [vmem:[#allocation2 + $0x50] sm:$0xff] }
 0x86e   : > { %v3196_v3 = vpop.f32.mrf.mxu1  ;;  %v2790_v54 = vpop.f32.mrf.mxu3 }
 0x86f   : > { %5537 = vmatmul.msk.bf16.gmra.mxu3 %vm1436_vm1, %v2731_v10  ;;  %v3210_v62 = vpack.c.bf16 %v3196_v3, %v3194_v22  ;;  %v9836_v10 = vld [vmem:[#allocation26_spill] sm:$0xff] }
 0x870   : > { %v2328_v3 = vadd.f32 %v9836_v10, %v8558_v20 }
 0x871   : > { %5561 = vmatmul.msk.bf16.gmra.mxu2 %vm1436_vm1, %v3210_v62 }
 0x874   : > { %v2720_v8 = vpop.f32.mrf.mxu2 }
 0x879   : > { %v3199_v43 = vpop.f32.mrf.mxu1 }
 0x87c   : > { %v2722_v19 = vpop.f32.mrf.mxu2 }
 0x87d   : > { %v2732_v50 = vpack.c.bf16 %v2722_v19, %v2720_v8  ;;  %v2823_v8 = vadd.f32 %v2790_v54, %v2328_v3  ;;  %v2793_v19 = vpop.f32.mrf.mxu3 }
 0x87f   : > { %5538 = vmatmul.msk.bf16.gmra.mxu3 %vm1436_vm1, %v2732_v50  ;;  %v9837_v50 = vld [vmem:[#allocation21_spill] sm:$0xff] }
 0x880   : > { %v2331_v13 = vadd.f32 %v9837_v50, %v8561_v47  ;;  %v9838_v47 = vld [vmem:[#allocation22_spill] sm:$0xff] }
 0x881   : > { %v3201_v48 = vpop.f32.mrf.mxu1  ;;  %v2333_v46 = vadd.f32 %v9838_v47, %v8563_v27  ;;  %v6424_v50 = vld [vmem:[#allocation2 + $0x20] sm:$0xff] }
 0x882   : > { %v3211_v32 = vpack.c.bf16 %v3201_v48, %v3199_v43  ;;  %v2824_v53 = vadd.f32 %v2793_v19, %v2331_v13 }
 0x884   : > { %v3257_v61 = vpop.f32.mrf.mxu2  ;;  %5562 = vmatmul.msk.bf16.gmra.mxu2 %vm1436_vm1, %v3211_v32 }
 0x885   : > { %v3297_v59 = vadd.f32 %v3257_v61, %v2818_v12  ;;  %v6421_v12 = vld [vmem:[#allocation2 + $0x8] sm:$0xff] }
 0x887   : > { %v3313_v57 = vadd.f32 %v6415_v52, %v3297_v59  ;;  %v2795_v52 = vpop.f32.mrf.mxu3 }
 0x889   : > { %v8601_v15 = vadd.f32 %v8596_v6, %v3313_v57 }
 0x88b   : > { %3346 = vadd.xlane.f32.xlu0 %v8601_v15 }
 0x88c   : > { %v3259_v29 = vpop.f32.mrf.mxu2 }
 0x88d   : > { %v3298_v24 = vadd.f32 %v3259_v29, %v2819_v41  ;;  %v9839_v29 = vld [vmem:[#allocation18_spill] sm:$0xff] }
 0x88f   : > { %v3314_v30 = vadd.f32 %v6416_v55, %v3298_v24  ;;  %v2798_v34 = vpop.f32.mrf.mxu3 }
 0x891   : > { %v8607_v44 = vadd.f32 %v8596_v6, %v3314_v30  ;;  %v2825_v30 = vadd.f32 %v2795_v52, %v2333_v46  ;;  %v6425_v46 = vld [vmem:[#allocation2 + $0x10] sm:$0xff] }
 0x893   : > { %3348 = vadd.xlane.f32.xlu1 %v8607_v44 }
 0x894   : > { %v3262_v35 = vpop.f32.mrf.mxu2 }
 0x895   : > { %v3299_v40 = vadd.f32 %v3262_v35, %v2820_v5 }
 0x897   : > { %v3315_v28 = vadd.f32 %v6417_v60, %v3299_v40  ;;  %v2800_v40 = vpop.f32.mrf.mxu3  ;;  %v9840_v60 = vld [vmem:[#allocation23_spill] sm:$0xff] }
 0x899   : > { %v8613_v42 = vadd.f32 %v8596_v6, %v3315_v28  ;;  %v2336_v28 = vadd.f32 %v9840_v60, %v8566_v58 }
 0x89b   : > { %3350 = vadd.xlane.f32.xlu2 %v8613_v42 }
 0x89c   : > { %v3264_v1 = vpop.f32.mrf.mxu2 }
 0x89d   : > { %v3300_v45 = vadd.f32 %v3264_v1, %v2821_v4  ;;  %v2826_v1 = vadd.f32 %v2798_v34, %v2336_v28  ;;  %v9843_v34 = vld [vmem:[#allocation27_spill] sm:$0xff] }
 0x89f   : > { %v3316_v39 = vadd.f32 %v6418_v16, %v3300_v45 }
 0x8a1   : > { %v8619_v9 = vadd.f32 %v8596_v6, %v3316_v39 }
 0x8a3   : > { %3352 = vadd.xlane.f32.xlu0 %v8619_v9 }
 0x8a4   : > { %v3267_v2 = vpop.f32.mrf.mxu2 }
 0x8a5   : > { %v3301_v36 = vadd.f32 %v3267_v2, %v2822_v23  ;;  %v9841_v2 = vld [vmem:[#allocation20_spill] sm:$0xff] }
 0x8a7   : > { %v3317_v22 = vadd.f32 %v6419_v21, %v3301_v36  ;;  %v2338_v36 = vadd.f32 %v9841_v2, %v8569_v49  ;;  %v6423_v21 = vld [vmem:[#allocation2 + $0x40] sm:$0xff] }
 0x8a9   : > { %v8625_v62 = vadd.f32 %v8596_v6, %v3317_v22  ;;  %v2827_v10 = vadd.f32 %v2800_v40, %v2338_v36  ;;  %v9845_v36 = vld [vmem:[#allocation29_spill] sm:$0xff] }
 0x8ab   : > { %3354 = vadd.xlane.f32.xlu1 %v8625_v62 }
 0x8ac   : > { %v3269_v11 = vpop.f32.mrf.mxu2 }
 0x8ad   : > { %v3302_v56 = vadd.f32 %v3269_v11, %v2823_v8 }
 0x8af   : > { %v3318_v43 = vadd.f32 %v6420_v33, %v3302_v56 }
 0x8b1   : > { %v8631_v48 = vadd.f32 %v8596_v6, %v3318_v43  ;;  %v9842_v43 = vld [vmem:[#allocation19_spill] sm:$0xff] }
 0x8b2   : > { %v2341_v19 = vadd.f32 %v9842_v43, %v8571_v51 }
 0x8b3   : > { %3356 = vadd.xlane.f32.xlu2 %v8631_v48 }
 0x8b4   : > { %v3272_v20 = vpop.f32.mrf.mxu2 }
 0x8b5   : > { %v3303_v32 = vadd.f32 %v3272_v20, %v2824_v53 }
 0x8b7   : > { %v3319_v61 = vadd.f32 %v6421_v12, %v3303_v32 }
 0x8b9   : > { %v8635_v59 = vadd.f32 %v8596_v6, %v3319_v61 }
 0x8bb   : > { %3358 = vadd.xlane.f32.xlu2 %v8635_v59 }
 0x8bc   : > { %v3274_v57 = vpop.f32.mrf.mxu2 }
 0x8bd   : > { %v3304_v5 = vadd.f32 %v3274_v57, %v2825_v30 }
 0x8bf   : > { %v3320_v4 = vadd.f32 %v6422_v14, %v3304_v5 }
 0x8c1   : > { %v8655_v18 = vadd.f32 %v8596_v6, %v3320_v4 }
 0x8c4   : > { %v3277_v55 = vpop.f32.mrf.mxu2 }
 0x8c5   : > { %v3305_v16 = vadd.f32 %v3277_v55, %v2826_v1 }
 0x8c7   : > { %v3321_v22 = vadd.f32 %v6423_v21, %v3305_v16  ;;  %v2348_v21 = vadd.f32 %v9845_v36, %v8578_v63  ;;  %v5920_v36 = vld [vmem:[%s6728_s0 + $0xd4] sm:$0xf0] }
 0x8c9   : > { %v8667_v33 = vadd.f32 %v8596_v6, %v3321_v22 }
 0x8cc   : > { %v3279_v26 = vpop.f32.mrf.mxu2 }
 0x8cd   : > { %v3306_v11 = vadd.f32 %v3279_v26, %v2827_v10 }
 0x8cf   : > { %v3322_v13 = vadd.f32 %v6424_v50, %v3306_v11 }
 0x8d1   : > { %v8679_v57 = vadd.f32 %v8596_v6, %v3322_v13  ;;  %v9846_v13 = vld [vmem:[#allocation30_spill] sm:$0xff] }
 0x8e2   : > { %v2803_v58 = vpop.f32.mrf.mxu3 }
 0x8e3   : > { %v2828_v53 = vadd.f32 %v2803_v58, %v2341_v19 }
 0x8e4   : > { %v3282_v8 = vpop.f32.mrf.mxu2 }
 0x8e5   : > { %v3307_v61 = vadd.f32 %v3282_v8, %v2828_v53  ;;  %v2351_v53 = vadd.f32 %v9846_v13, %v8582_v37  ;;  %v5677_v37 = vld [vmem:[%s6728_s0 + $0xe0] sm:$0xf]  ;;  %v5653_v13 = vld [vmem:[%s6728_s0 + $0xa8] sm:$0xf] }
 0x8ea   : > { %v2805_v32 = vpop.f32.mrf.mxu3 }
 0x8ec   : > { %v3284_v51 = vpop.f32.mrf.mxu2 }
 0x8f4   : > { %v3287_v14 = vpop.f32.mrf.mxu2 }
 0x8fe   : > { %v3347_v41 = vpop.xlane.xlu0 %3346 }
 0x8ff   : > { %v3378_v24 = vmul.f32 %v3347_v41, %v9839_v29  ;;  %v2343_v41 = vadd.f32 %v9843_v34, %v8574_v7  ;;  %v9844_v7 = vld [vmem:[#allocation28_spill] sm:$0xff] }
 0x900   : > { %v2346_v28 = vadd.f32 %v9844_v7, %v8576_v25 }
 0x901   : > { %v8642_v0 = vsub.f32 %v8601_v15, %v3378_v24  ;;  %v3323_v24 = vadd.f32 %v6425_v46, %v3307_v61  ;;  %v2829_v55 = vadd.f32 %v2805_v32, %v2343_v41  ;;  %v6429_v41 = vld [vmem:[#allocation2 + $0x78] sm:$0xff] }
 0x903   : > { %v3410_v35 = vmul.f32 %v8642_v0, %v8642_v0  ;;  %v3308_v40 = vadd.f32 %v3284_v51, %v2829_v55  ;;  %v8691_v60 = vadd.f32 %v8596_v6, %v3323_v24  ;;  %v5923_v24 = vld [vmem:[%s6728_s0 + $0xec] sm:$0xf0]  ;;  %v5921_v55 = vld [vmem:[%s6728_s0 + $0xe4] sm:$0xf] }
 0x905   : > { %3426 = vadd.xlane.f32.xlu0 %v3410_v35  ;;  %v2808_v35 = vpop.f32.mrf.mxu3 }
 0x906   : > { %v3349_v38 = vpop.xlane.xlu1 %3348  ;;  %v2830_v26 = vadd.f32 %v2808_v35, %v2346_v28  ;;  %v5679_v35 = vld [vmem:[%s6728_s0 + $0xf0] sm:$0xf0] }
 0x907   : > { %v3379_v27 = vmul.f32 %v3349_v38, %v9839_v29  ;;  %v5682_v7 = vor.u32 %v5921_v55, %v5679_v35  ;;  %v5631_v55 = vld [vmem:[%s6728_s0 + $0x90] sm:$0xf0]  ;;  %v5912_v35 = vld [vmem:[%s6728_s0 + $0x94] sm:$0xf0] }
 0x908   : > { %v3309_v58 = vadd.f32 %v3287_v14, %v2830_v26  ;;  %v5922_v14 = vld [vmem:[%s6728_s0 + $0xec] sm:$0xf]  ;;  %v5919_v26 = vld [vmem:[%s6728_s0 + $0xcc] sm:$0xf0] }
 0x909   : > { %v8650_v45 = vsub.f32 %v8607_v44, %v3379_v27  ;;  %v6426_v27 = vld [vmem:[#allocation2 + $0x38] sm:$0xff]  ;;  %3959 = vmatpush.bf16.msrb.mxu0 %v5682_v7  ;;  %v5910_v7 = vld [vmem:[%s6728_s0 + $0x8c] sm:$0xf] }
 0x90a   : > { %v3324_v1 = vadd.f32 %v6426_v27, %v3308_v40  ;;  %v5685_v40 = vld [vmem:[%s6728_s0 + $0xe8] sm:$0xf] }
 0x90b   : > { %v3411_v39 = vmul.f32 %v8650_v45, %v8650_v45 }
 0x90c   : > { %v8703_v2 = vadd.f32 %v8596_v6, %v3324_v1  ;;  %v5661_v1 = vld [vmem:[%s6728_s0 + $0xc0] sm:$0xf] }
 0x90d   : > { %3428 = vadd.xlane.f32.xlu1 %v3411_v39  ;;  %3360 = vadd.xlane.f32.xlu0 %v8655_v18  ;;  %v2810_v25 = vpop.f32.mrf.mxu3 }
 0x90e   : > { %v3351_v23 = vpop.xlane.xlu2 %3350  ;;  %v2831_v8 = vadd.f32 %v2810_v25, %v2348_v21  ;;  %v5669_v25 = vld [vmem:[%s6728_s0 + $0xc8] sm:$0xf] }
 0x90f   : > { %v3380_v54 = vmul.f32 %v3351_v23, %v9839_v29 }
 0x911   : > { %v8662_v3 = vsub.f32 %v8613_v42, %v3380_v54  ;;  %v6427_v54 = vld [vmem:[#allocation2 + $0x60] sm:$0xff] }
 0x912   : > { %v3325_v10 = vadd.f32 %v6427_v54, %v3309_v58  ;;  %v5662_v58 = vor.u32 %v5919_v26, %v5661_v1  ;;  %v5918_v54 = vld [vmem:[%s6728_s0 + $0xcc] sm:$0xf]  ;;  %v5905_v1 = vld [vmem:[%s6728_s0 + $0x64] sm:$0xf] }
 0x913   : > { %v3412_v56 = vmul.f32 %v8662_v3, %v8662_v3 }
 0x914   : > { %v8715_v50 = vadd.f32 %v8596_v6, %v3325_v10  ;;  %v5671_v10 = vld [vmem:[%s6728_s0 + $0xd8] sm:$0xf0] }
 0x915   : > { %3430 = vadd.xlane.f32.xlu1 %v3412_v56  ;;  %3362 = vadd.xlane.f32.xlu0 %v8667_v33  ;;  %v3289_v56 = vpop.f32.mrf.mxu2  ;;  %v2813_v63 = vpop.f32.mrf.mxu3 }
 0x916   : > { %v3353_v49 = vpop.xlane.xlu0 %3352  ;;  %v3310_v19 = vadd.f32 %v3289_v56, %v2831_v8  ;;  %v5674_v8 = vor.u32 %v5918_v54, %v5671_v10  ;;  %v5915_v56 = vld [vmem:[%s6728_s0 + $0xac] sm:$0xf0]  ;;  %v5597_v10 = vld [vmem:[%s6728_s0 + $0x40] sm:$0xf] }
 0x917   : > { %v3381_v20 = vmul.f32 %v3353_v49, %v9839_v29 }
 0x919   : > { %v8674_v12 = vsub.f32 %v8619_v9, %v3381_v20  ;;  %v6428_v20 = vld [vmem:[#allocation2 + $0x70] sm:$0xff] }
 0x91a   : > { %v3326_v32 = vadd.f32 %v6428_v20, %v3310_v19  ;;  %v5913_v19 = vld [vmem:[%s6728_s0 + $0xa4] sm:$0xf] }
 0x91b   : > { %v3413_v52 = vmul.f32 %v8674_v12, %v8674_v12 }
 0x91c   : > { %v8721_v34 = vadd.f32 %v8596_v6, %v3326_v32 }
 0x91d   : > { %3432 = vadd.xlane.f32.xlu2 %v3413_v52  ;;  %3364 = vadd.xlane.f32.xlu1 %v8679_v57  ;;  %v3292_v61 = vpop.f32.mrf.mxu2  ;;  %v2832_v52 = vadd.f32 %v2813_v63, %v2351_v53  ;;  %v5647_v63 = vld [vmem:[%s6728_s0 + $0xb0] sm:$0xf0]  ;;  %v5916_v53 = vld [vmem:[%s6728_s0 + $0xb4] sm:$0xf0] }
 0x91e   : > { %v3355_v47 = vpop.xlane.xlu1 %3354  ;;  %v5650_v20 = vor.u32 %v5913_v19, %v5647_v63  ;;  %v5654_v32 = vor.u32 %v5916_v53, %v5653_v13  ;;  %v5599_v19 = vld [vmem:[%s6728_s0 + $0x50] sm:$0xf0]  ;;  %v5904_v63 = vld [vmem:[%s6728_s0 + $0x54] sm:$0xf0] }
 0x91f   : > { %v3382_v30 = vmul.f32 %v3355_v47, %v9839_v29  ;;  %v3311_v51 = vadd.f32 %v3292_v61, %v2832_v52  ;;  %v5914_v61 = vld [vmem:[%s6728_s0 + $0xac] sm:$0xf]  ;;  %v5655_v52 = vld [vmem:[%s6728_s0 + $0xb8] sm:$0xf0] }
 0x921   : > { %v8686_v5 = vsub.f32 %v8625_v62, %v3382_v30  ;;  %v3327_v47 = vadd.f32 %v6429_v41, %v3311_v51  ;;  %v5678_v30 = vor.u32 %v5923_v24, %v5677_v37  ;;  %v5658_v51 = vor.u32 %v5914_v61, %v5655_v52  ;;  %v5629_v41 = vld [vmem:[%s6728_s0 + $0x80] sm:$0xf]  ;;  %v5909_v37 = vld [vmem:[%s6728_s0 + $0x84] sm:$0xf] }
 0x922   : > { %v5581_v52 = vld [vmem:[%s6728_s0 + $0x20] sm:$0xf] }
 0x923   : > { %v3414_v38 = vmul.f32 %v8686_v5, %v8686_v5  ;;  %v8725_v46 = vadd.f32 %v8596_v6, %v3327_v47  ;;  %3910 = vmatpush.bf16.msra.mxu3 %v5678_v30  ;;  %v5911_v47 = vld [vmem:[%s6728_s0 + $0x8c] sm:$0xf0]  ;;  %v5637_v30 = vld [vmem:[%s6728_s0 + $0x88] sm:$0xf] }
 0x924   : > { %v5630_v24 = vor.u32 %v5911_v47, %v5629_v41  ;;  %v5897_v41 = vld [vmem:[%s6728_s0 + $0x24] sm:$0xf] }
 0x925   : > { %3434 = vadd.xlane.f32.xlu2 %v3414_v38  ;;  %3366 = vadd.xlane.f32.xlu1 %v8691_v60  ;;  %v5924_v38 = vld [vmem:[%s6728_s0 + $0xf4] sm:$0xf0] }
 0x926   : > { %v3357_v4 = vpop.xlane.xlu2 %3356  ;;  %v5686_v28 = vor.u32 %v5924_v38, %v5685_v40  ;;  %v5634_v40 = vor.u32 %v5909_v37, %v5631_v55  ;;  %v5638_v38 = vor.u32 %v5912_v35, %v5637_v30  ;;  %v5583_v37 = vld [vmem:[%s6728_s0 + $0x30] sm:$0xf0]  ;;  %v5900_v55 = vld [vmem:[%s6728_s0 + $0x34] sm:$0xf0] }
 0x927   : > { %v3383_v16 = vmul.f32 %v3357_v4, %v9839_v29  ;;  %v5687_v4 = vld [vmem:[%s6728_s0 + $0xf8] sm:$0xf0]  ;;  %3911 = vmatpush.bf16.msra.mxu3 %v5662_v58  ;;  %v5621_v58 = vld [vmem:[%s6728_s0 + $0x68] sm:$0xf]  ;;  %v5586_v35 = vor.u32 %v5897_v41, %v5583_v37 }
 0x928   : > { %v5690_v27 = vor.u32 %v5922_v14, %v5687_v4  ;;  %4008 = vmatpush.bf16.msrb.mxu1 %v5686_v28  ;;  %v5639_v28 = vld [vmem:[%s6728_s0 + $0x98] sm:$0xf0]  ;;  %v5613_v4 = vld [vmem:[%s6728_s0 + $0x60] sm:$0xf] }
 0x929   : > { %v8698_v39 = vsub.f32 %v8631_v48, %v3383_v16  ;;  %v5917_v16 = vld [vmem:[%s6728_s0 + $0xc4] sm:$0xf]  ;;  %v5642_v14 = vor.u32 %v5910_v7, %v5639_v28  ;;  %v5591_v7 = vld [vmem:[%s6728_s0 + $0x38] sm:$0xf0] }
 0x92a   : > { %4057 = vmatpush.bf16.msra.mxu2 %v5690_v27  ;;  %v5907_v27 = vld [vmem:[%s6728_s0 + $0x6c] sm:$0xf0] }
 0x92b   : > { %v3415_v23 = vmul.f32 %v8698_v39, %v8698_v39  ;;  %v5614_v26 = vor.u32 %v5907_v27, %v5613_v4  ;;  %v5565_v4 = vld [vmem:[%s6728_s0] sm:$0xf]  ;;  %v5895_v27 = vld [vmem:[%s6728_s0 + $0xc] sm:$0xf0] }
 0x92d   : > { %3436 = vadd.xlane.f32.xlu0 %v3415_v23  ;;  %3368 = vadd.xlane.f32.xlu2 %v8703_v2  ;;  %v5663_v23 = vld [vmem:[%s6728_s0 + $0xd0] sm:$0xf0] }
 0x92e   : > { %v3359_v22 = vpop.xlane.xlu2 %3358  ;;  %v5666_v21 = vor.u32 %v5917_v16, %v5663_v23  ;;  %4058 = vmatpush.bf16.msra.mxu2 %v5674_v8  ;;  %v5615_v16 = vld [vmem:[%s6728_s0 + $0x70] sm:$0xf0]  ;;  %v5908_v23 = vld [vmem:[%s6728_s0 + $0x74] sm:$0xf0]  ;;  %v5903_v8 = vld [vmem:[%s6728_s0 + $0x4c] sm:$0xf0] }
 0x92f   : > { %v3384_v11 = vmul.f32 %v3359_v22, %v9839_v29  ;;  %v5670_v22 = vor.u32 %v5920_v36, %v5669_v25  ;;  %v5618_v25 = vor.u32 %v5905_v1, %v5615_v16  ;;  %v5622_v36 = vor.u32 %v5908_v23, %v5621_v58  ;;  %v5893_v1 = vld [vmem:[%s6728_s0 + $0x4] sm:$0xf]  ;;  %v5567_v58 = vld [vmem:[%s6728_s0 + $0x10] sm:$0xf0]  ;;  %v5573_v23 = vld [vmem:[%s6728_s0 + $0x8] sm:$0xf] }
 0x930   : > { %3960 = vmatpush.bf16.msrb.mxu0 %v5666_v21  ;;  %v5906_v21 = vld [vmem:[%s6728_s0 + $0x6c] sm:$0xf]  ;;  %v5566_v16 = vor.u32 %v5895_v27, %v5565_v4 }
 0x931   : > { %v8710_v43 = vsub.f32 %v8635_v59, %v3384_v11  ;;  %4009 = vmatpush.bf16.msrb.mxu1 %v5670_v22  ;;  %v5645_v11 = vld [vmem:[%s6728_s0 + $0xa0] sm:$0xf]  ;;  %v5623_v22 = vld [vmem:[%s6728_s0 + $0x78] sm:$0xf0] }
 0x932   : > { %4059 = vmatpush.bf16.msra.mxu2 %v5658_v51  ;;  %v5626_v54 = vor.u32 %v5906_v21, %v5623_v22  ;;  %v5899_v51 = vld [vmem:[%s6728_s0 + $0x2c] sm:$0xf0]  ;;  %v5894_v21 = vld [vmem:[%s6728_s0 + $0xc] sm:$0xf]  ;;  %v5575_v22 = vld [vmem:[%s6728_s0 + $0x18] sm:$0xf0] }
 0x933   : > { %v3416_v49 = vmul.f32 %v8710_v43, %v8710_v43  ;;  %v5582_v47 = vor.u32 %v5899_v51, %v5581_v52 }
 0x934   : > { %3961 = vmatpush.bf16.msrb.mxu0 %v5650_v20  ;;  %v5902_v20 = vld [vmem:[%s6728_s0 + $0x4c] sm:$0xf] }
 0x935   : > { %3438 = vadd.xlane.f32.xlu0 %v3416_v49  ;;  %3370 = vadd.xlane.f32.xlu2 %v8715_v50  ;;  %v5646_v49 = vor.u32 %v5915_v56, %v5645_v11  ;;  %v5901_v11 = vld [vmem:[%s6728_s0 + $0x44] sm:$0xf]  ;;  %v5598_v56 = vor.u32 %v5903_v8, %v5597_v10  ;;  %v5578_v10 = vor.u32 %v5894_v21, %v5575_v22 }
 0x936   : > { %4010 = vmatpush.bf16.msrb.mxu1 %v5654_v32  ;;  %4060 = vmatpush.bf16.msra.mxu2 %v5642_v14  ;;  %v5602_v13 = vor.u32 %v5901_v11, %v5599_v19  ;;  %v5607_v32 = vld [vmem:[%s6728_s0 + $0x58] sm:$0xf0] }
 0x937   : > { %3912 = vmatpush.bf16.msra.mxu3 %v5646_v49  ;;  %v5605_v49 = vld [vmem:[%s6728_s0 + $0x48] sm:$0xf]  ;;  %v5610_v61 = vor.u32 %v5902_v20, %v5607_v32 }
 0x938   : > { %3962 = vmatpush.bf16.msrb.mxu0 %v5634_v40  ;;  %v5606_v53 = vor.u32 %v5904_v63, %v5605_v49 }
 0x93a   : > { %4011 = vmatpush.bf16.msrb.mxu1 %v5638_v38  ;;  %4061 = vmatpush.bf16.msra.mxu2 %v5626_v54  ;;  %v5898_v38 = vld [vmem:[%s6728_s0 + $0x2c] sm:$0xf] }
 0x93b   : > { %3913 = vmatpush.bf16.msra.mxu3 %v5630_v24  ;;  %v5589_v24 = vld [vmem:[%s6728_s0 + $0x28] sm:$0xf]  ;;  %v5594_v14 = vor.u32 %v5898_v38, %v5591_v7 }
 0x93c   : > { %3963 = vmatpush.bf16.msrb.mxu0 %v5618_v25  ;;  %v5590_v40 = vor.u32 %v5900_v55, %v5589_v24  ;;  %v5570_v25 = vor.u32 %v5893_v1, %v5567_v58 }
 0x93d   : > { %3372 = vadd.xlane.f32.xlu0 %v8721_v34 }
 0x93e   : > { %4012 = vmatpush.bf16.msrb.mxu1 %v5622_v36  ;;  %4062 = vmatpush.bf16.msra.mxu2 %v5610_v61  ;;  %v5896_v36 = vld [vmem:[%s6728_s0 + $0x14] sm:$0xf0]  ;;  %v2815_v61 = vpop.f32.mrf.mxu3 }
 0x93f   : > { %3914 = vmatpush.bf16.msra.mxu3 %v5614_v26  ;;  %v5574_v54 = vor.u32 %v5896_v36, %v5573_v23  ;;  %v6430_v36 = vld [vmem:[#allocation2 + $0x28] sm:$0xff] }
 0x940   : > { %3964 = vmatpush.bf16.msrb.mxu0 %v5602_v13 }
 0x942   : > { %4013 = vmatpush.bf16.msrb.mxu1 %v5606_v53  ;;  %4063 = vmatpush.bf16.msra.mxu2 %v5594_v14 }
 0x943   : > { %3915 = vmatpush.bf16.msra.mxu3 %v5598_v56 }
 0x944   : > { %3965 = vmatpush.bf16.msrb.mxu0 %v5586_v35 }
 0x945   : > { %3374 = vadd.xlane.f32.xlu0 %v8725_v46 }
 0x946   : > { %4014 = vmatpush.bf16.msrb.mxu1 %v5590_v40  ;;  %4064 = vmatpush.bf16.msra.mxu2 %v5578_v10 }
 0x947   : > { %3916 = vmatpush.bf16.msra.mxu3 %v5582_v47  ;;  %v9847_v47 = vld [vmem:[#allocation31_spill] sm:$0xff] }
 0x948   : > { %3966 = vmatpush.bf16.msrb.mxu0 %v5570_v25  ;;  %v2353_v37 = vadd.f32 %v9847_v47, %v8584_v17 }
 0x94a   : > { %4015 = vmatpush.bf16.msrb.mxu1 %v5574_v54  ;;  %v2833_v38 = vadd.f32 %v2815_v61, %v2353_v37 }
 0x94b   : > { %3917 = vmatpush.bf16.msra.mxu3 %v5566_v16 }
 0x978   : > { %v3427_v30 = vpop.xlane.xlu0 %3426 }
 0x979   : > { %v3458_v28 = vmul.f32 %v3427_v30, %v9839_v29  ;;  %v3294_v30 = vpop.f32.mrf.mxu2 }
 0x97a   : > { %v3312_v27 = vadd.f32 %v3294_v30, %v2833_v38 }
 0x97b   : > { %v3474_v26 = vadd.f32 1e-05, %v3458_v28 }
 0x97c   : > { %v3328_v21 = vadd.f32 %v6430_v36, %v3312_v27 }
 0x97d   : > { %6382 = vrsqrt.f32 %v3474_v26  ;;  %vm3496_vm6 = vweird.f32 %v3474_v26 }
 0x980   : > { %v3429_v8 = vpop.xlane.xlu1 %3428  ;;  %v3361_v11 = vpop.xlane.xlu0 %3360 }
 0x981   : > { %v3459_v56 = vmul.f32 %v3429_v8, %v9839_v29  ;;  %v3385_v19 = vmul.f32 %v3361_v11, %v9839_v29  ;;  %v8812_v11 = vperm.slane %v8593_v31, 3 }
 0x983   : > { %v6383_v49 = vpop.eup %6382  ;;  %v3475_v63 = vadd.f32 1e-05, %v3459_v56  ;;  %v8796_v13 = vsub.f32 %v8655_v18, %v3385_v19 }
 0x984   : > { %v3491_v53 = vmul.f32 %v6383_v49, %v3474_v26  ;;  %vm3497_vm1 = vweird.f32 %v6383_v49 }
 0x985   : > { %6384 = vrsqrt.f32 %v3475_v63  ;;  %v3417_v20 = vmul.f32 %v8796_v13, %v8796_v13  ;;  %vm3498_vm7 = vmor %vm3496_vm6, %vm3497_vm1  ;;  %vm3506_vm9 = vweird.f32 %v3475_v63 }
 0x986   : > { %v3492_v32 = vmul.f32 %v6383_v49, %v3491_v53 }
 0x987   : > { %3440 = vadd.xlane.f32.xlu1 %v3417_v20 }
 0x988   : > { %v3493_v52 = vmul.f32 0.5, %v3492_v32  ;;  %v3431_v51 = vpop.xlane.xlu1 %3430  ;;  %v3363_v41 = vpop.xlane.xlu0 %3362  ;;  %v8821_v32 = vadd.f32 %v8596_v6, %v3328_v21 }
 0x989   : > { %v3460_v24 = vmul.f32 %v3431_v51, %v9839_v29  ;;  %v3386_v55 = vmul.f32 %v3363_v41, %v9839_v29  ;;  %v8824_v51 = vperm.slane %v8593_v31, 4 }
 0x98a   : > { %v3494_v35 = vsub.f32 1.5, %v3493_v52 }
 0x98b   : > { %v6385_v40 = vpop.eup %6384  ;;  %v3476_v7 = vadd.f32 1e-05, %v3460_v24  ;;  %v8805_v28 = vsub.f32 %v8667_v33, %v3386_v55 }
 0x98c   : > { %v3495_v14 = vmul.f32 %v6383_v49, %v3494_v35  ;;  %v3501_v4 = vmul.f32 %v6385_v40, %v3475_v63  ;;  %vm3507_vm8 = vweird.f32 %v6385_v40 }
 0x98d   : > { %6386 = vrsqrt.f32 %v3476_v7  ;;  %v3418_v17 = vmul.f32 %v8805_v28, %v8805_v28  ;;  %vm3508_vm10 = vmor %vm3506_vm9, %vm3507_vm8  ;;  %vm3516_vm12 = vweird.f32 %v3476_v7 }
 0x98e   : > { %v3502_v1 = vmul.f32 %v6385_v40, %v3501_v4  ;;  %v3499_v16 = vsel %vm3498_vm7, %v6383_v49, %v3495_v14 }
 0x98f   : > { %3442 = vadd.xlane.f32.xlu1 %v3418_v17  ;;  %v3650_v26 = vmul.f32 %v3499_v16, %v8642_v0 }
 0x990   : > { %v3503_v58 = vmul.f32 0.5, %v3502_v1  ;;  %v3433_v23 = vpop.xlane.xlu2 %3432  ;;  %v3365_v25 = vpop.xlane.xlu1 %3364 }
 0x991   : > { %v3461_v22 = vmul.f32 %v3433_v23, %v9839_v29  ;;  %v3387_v54 = vmul.f32 %v3365_v25, %v9839_v29  ;;  %v3667_v0 = vmul.f32 %v8812_v11, %v3650_v26 }
 0x992   : > { %v3504_v10 = vsub.f32 1.5, %v3503_v58 }
 0x993   : > { %v6387_v8 = vpop.eup %6386  ;;  %v3477_v56 = vadd.f32 1e-05, %v3461_v22  ;;  %v8816_v19 = vsub.f32 %v8679_v57, %v3387_v54  ;;  %v3684_v31 = vadd.f32 %v8824_v51, %v3667_v0 }
 0x994   : > { %v3505_v49 = vmul.f32 %v6385_v40, %v3504_v10  ;;  %v3511_v53 = vmul.f32 %v6387_v8, %v3476_v7  ;;  %vm3517_vm11 = vweird.f32 %v6387_v8 }
 0x995   : > { %6388 = vrsqrt.f32 %v3477_v56  ;;  %v3419_v20 = vmul.f32 %v8816_v19, %v8816_v19  ;;  %vm3518_vm13 = vmor %vm3516_vm12, %vm3517_vm11  ;;  %vm3526_vm15 = vweird.f32 %v3477_v56 }
 0x996   : > { %v3509_v61 = vsel %vm3508_vm10, %v6385_v40, %v3505_v49  ;;  %v3512_v52 = vmul.f32 %v6387_v8, %v3511_v53 }
 0x997   : > { %v3651_v41 = vmul.f32 %v3509_v61, %v8650_v45  ;;  %3444 = vadd.xlane.f32.xlu2 %v3419_v20  ;;  %3376 = vadd.xlane.f32.xlu1 %v8821_v32 }
 0x998   : > { %v3513_v63 = vmul.f32 0.5, %v3512_v52  ;;  %v3435_v47 = vpop.xlane.xlu2 %3434  ;;  %v3367_v37 = vpop.xlane.xlu1 %3366 }
 0x999   : > { %v3668_v24 = vmul.f32 %v8812_v11, %v3651_v41  ;;  %v3462_v6 = vmul.f32 %v3435_v47, %v9839_v29  ;;  %v3388_v55 = vmul.f32 %v3367_v37, %v9839_v29 }
 0x99a   : > { %v3514_v30 = vsub.f32 1.5, %v3513_v63 }
 0x99b   : > { %v6389_v35 = vpop.eup %6388  ;;  %v3685_v40 = vadd.f32 %v8824_v51, %v3668_v24  ;;  %v3478_v38 = vadd.f32 1e-05, %v3462_v6  ;;  %v8835_v45 = vsub.f32 %v8691_v60, %v3388_v55 }
 0x99c   : > { %v3515_v14 = vmul.f32 %v6387_v8, %v3514_v30  ;;  %v3521_v4 = vmul.f32 %v6389_v35, %v3477_v56  ;;  %vm3527_vm14 = vweird.f32 %v6389_v35 }
 0x99d   : > { %6390 = vrsqrt.f32 %v3478_v38  ;;  %v3700_v27 = vpack.c.bf16 %v3685_v40, %v3684_v31  ;;  %v3420_v17 = vmul.f32 %v8835_v45, %v8835_v45  ;;  %vm3528_vm0 = vmor %vm3526_vm15, %vm3527_vm14  ;;  %vm3536_vm3 = vweird.f32 %v3478_v38 }
 0x99e   : > { %v3522_v1 = vmul.f32 %v6389_v35, %v3521_v4  ;;  %v3519_v16 = vsel %vm3518_vm13, %v6387_v8, %v3515_v14 }
 0x99f   : > { %3967 = vmatmul.bf16.vlgmr.msrb.gmra.mxu0 %v3700_v27  ;;  %4016 = vmatmul.bf16.vlgmr.msrb.gmra.mxu1 %v3700_v27  ;;  %v3652_v7 = vmul.f32 %v3519_v16, %v8662_v3 }
 0x9a0   : > { %v3523_v58 = vmul.f32 0.5, %v3522_v1  ;;  %4065 = vmatmul.bf16.vlgmr.msra.gmra.mxu2 %v3700_v27  ;;  %3446 = vadd.xlane.f32.xlu2 %v3420_v17  ;;  %v3437_v23 = vpop.xlane.xlu0 %3436  ;;  %v3369_v25 = vpop.xlane.xlu2 %3368 }
 0x9a1   : > { %3918 = vmatmul.bf16.vlgmr.msra.gmra.mxu3 %v3700_v27  ;;  %v3463_v36 = vmul.f32 %v3437_v23, %v9839_v29  ;;  %v3389_v21 = vmul.f32 %v3369_v25, %v9839_v29  ;;  %v3669_v0 = vmul.f32 %v8812_v11, %v3652_v7 }
 0x9a2   : > { %v3524_v22 = vsub.f32 1.5, %v3523_v58 }
 0x9a3   : > { %v6391_v54 = vpop.eup %6390  ;;  %v3479_v10 = vadd.f32 1e-05, %v3463_v36  ;;  %v8843_v26 = vsub.f32 %v8703_v2, %v3389_v21  ;;  %v3686_v55 = vadd.f32 %v8824_v51, %v3669_v0 }
 0x9a4   : > { %v3525_v8 = vmul.f32 %v6389_v35, %v3524_v22  ;;  %v3531_v49 = vmul.f32 %v6391_v54, %v3478_v38  ;;  %vm3537_vm2 = vweird.f32 %v6391_v54 }
 0x9a5   : > { %6392 = vrsqrt.f32 %v3479_v10  ;;  %v3421_v53 = vmul.f32 %v8843_v26, %v8843_v26  ;;  %vm3538_vm4 = vmor %vm3536_vm3, %vm3537_vm2  ;;  %vm3546_vm1 = vweird.f32 %v3479_v10 }
 0x9a6   : > { %v3529_v20 = vsel %vm3528_vm0, %v6389_v35, %v3525_v8  ;;  %v3532_v61 = vmul.f32 %v6391_v54, %v3531_v49 }
 0x9a7   : > { %v3653_v52 = vmul.f32 %v3529_v20, %v8674_v12  ;;  %3448 = vadd.xlane.f32.xlu0 %v3421_v53 }
 0x9a8   : > { %v3533_v3 = vmul.f32 0.5, %v3532_v61  ;;  %v3439_v41 = vpop.xlane.xlu0 %3438  ;;  %v3371_v63 = vpop.xlane.xlu2 %3370 }
 0x9a9   : > { %v3390_v47 = vmul.f32 %v3371_v63, %v9839_v29  ;;  %v3670_v56 = vmul.f32 %v8812_v11, %v3653_v52 }
 0x9aa   : > { %v3534_v37 = vsub.f32 1.5, %v3533_v3 }
 0x9ab   : > { %v6393_v24 = vpop.eup %6392  ;;  %v8852_v6 = vsub.f32 %v8715_v50, %v3390_v47  ;;  %v3687_v30 = vadd.f32 %v8824_v51, %v3670_v56 }
 0x9ac   : > { %v3535_v12 = vmul.f32 %v6391_v54, %v3534_v37  ;;  %v3541_v35 = vmul.f32 %v6393_v24, %v3479_v10  ;;  %vm3547_vm5 = vweird.f32 %v6393_v24 }
 0x9ad   : > { %v3701_v31 = vpack.c.bf16 %v3687_v30, %v3686_v55  ;;  %v3422_v40 = vmul.f32 %v8852_v6, %v8852_v6  ;;  %vm3548_vm6 = vmor %vm3546_vm1, %vm3547_vm5 }
 0x9ae   : > { %v3542_v14 = vmul.f32 %v6393_v24, %v3541_v35  ;;  %v3539_v4 = vsel %vm3538_vm4, %v6391_v54, %v3535_v12 }
 0x9af   : > { %3972 = vmatmul.bf16.gmra.mxu0 %v3701_v31  ;;  %4021 = vmatmul.bf16.gmra.mxu1 %v3701_v31  ;;  %v3654_v58 = vmul.f32 %v3539_v4, %v8686_v5 }
 0x9b0   : > { %v3543_v27 = vmul.f32 0.5, %v3542_v14  ;;  %4070 = vmatmul.bf16.gmra.mxu2 %v3701_v31  ;;  %3450 = vadd.xlane.f32.xlu1 %v3422_v40  ;;  %v3373_v17 = vpop.xlane.xlu0 %3372 }
 0x9b1   : > { %3923 = vmatmul.bf16.gmra.mxu3 %v3701_v31  ;;  %v3391_v1 = vmul.f32 %v3373_v17, %v9839_v29  ;;  %v3671_v22 = vmul.f32 %v8812_v11, %v3654_v58 }
 0x9b2   : > { %v3544_v16 = vsub.f32 1.5, %v3543_v27 }
 0x9b3   : > { %v8861_v23 = vsub.f32 %v8721_v34, %v3391_v1  ;;  %v3688_v10 = vadd.f32 %v8824_v51, %v3671_v22 }
 0x9b4   : > { %v3545_v38 = vmul.f32 %v6393_v24, %v3544_v16 }
 0x9b5   : > { %v3423_v25 = vmul.f32 %v8861_v23, %v8861_v23 }
 0x9b6   : > { %v3549_v36 = vsel %vm3548_vm6, %v6393_v24, %v3545_v38 }
 0x9b7   : > { %v3655_v21 = vmul.f32 %v3549_v36, %v8698_v39  ;;  %3452 = vadd.xlane.f32.xlu2 %v3423_v25  ;;  %v3464_v39 = vmul.f32 %v3439_v41, %v9839_v29 }
 0x9b8   : > { %v3375_v54 = vpop.xlane.xlu0 %3374 }
 0x9b9   : > { %v3392_v7 = vmul.f32 %v3375_v54, %v9839_v29  ;;  %v3672_v5 = vmul.f32 %v8812_v11, %v3655_v21  ;;  %v3480_v61 = vadd.f32 1e-05, %v3464_v39 }
 0x9bb   : > { %v8870_v8 = vsub.f32 %v8725_v46, %v3392_v7  ;;  %v3689_v49 = vadd.f32 %v8824_v51, %v3672_v5  ;;  %6394 = vrsqrt.f32 %v3480_v61  ;;  %vm3556_vm8 = vweird.f32 %v3480_v61 }
 0x9bd   : > { %v3702_v53 = vpack.c.bf16 %v3689_v49, %v3688_v10  ;;  %v3424_v20 = vmul.f32 %v8870_v8, %v8870_v8 }
 0x9bf   : > { %3977 = vmatmul.bf16.gmra.mxu0 %v3702_v53  ;;  %4026 = vmatmul.bf16.gmra.mxu1 %v3702_v53 }
 0x9c0   : > { %4075 = vmatmul.bf16.gmra.mxu2 %v3702_v53  ;;  %3454 = vadd.xlane.f32.xlu0 %v3424_v20 }
 0x9c1   : > { %3928 = vmatmul.bf16.gmra.mxu3 %v3702_v53  ;;  %v6395_v52 = vpop.eup %6394 }
 0x9c2   : > { %v3551_v0 = vmul.f32 %v6395_v52, %v3480_v61  ;;  %vm3557_vm7 = vweird.f32 %v6395_v52 }
 0x9c3   : > { %vm3558_vm9 = vmor %vm3556_vm8, %vm3557_vm7 }
 0x9c4   : > { %v3552_v3 = vmul.f32 %v6395_v52, %v3551_v0 }
 0x9c6   : > { %v3553_v37 = vmul.f32 0.5, %v3552_v3 }
 0x9c8   : > { %v3554_v24 = vsub.f32 1.5, %v3553_v37 }
 0x9ca   : > { %v3555_v31 = vmul.f32 %v6395_v52, %v3554_v24 }
 0x9cc   : > { %v3559_v14 = vsel %vm3558_vm9, %v6395_v52, %v3555_v31 }
 0x9cd   : > { %v3656_v25 = vmul.f32 %v3559_v14, %v8710_v43 }
 0x9cf   : > { %v3673_v53 = vmul.f32 %v8812_v11, %v3656_v25 }
 0x9d1   : > { %v3690_v3 = vadd.f32 %v8824_v51, %v3673_v53 }
 0x9fa   : > { %v3441_v63 = vpop.xlane.xlu1 %3440 }
 0x9fb   : > { %v3465_v47 = vmul.f32 %v3441_v63, %v9839_v29 }
 0x9fd   : > { %v3481_v56 = vadd.f32 1e-05, %v3465_v47 }
 0x9ff   : > { %6396 = vrsqrt.f32 %v3481_v56  ;;  %vm3566_vm11 = vweird.f32 %v3481_v56 }
 0xa02   : > { %v3443_v55 = vpop.xlane.xlu1 %3442 }
 0xa03   : > { %v3466_v30 = vmul.f32 %v3443_v55, %v9839_v29 }
 0xa05   : > { %v6397_v12 = vpop.eup %6396  ;;  %v3482_v35 = vadd.f32 1e-05, %v3466_v30 }
 0xa06   : > { %v3561_v41 = vmul.f32 %v6397_v12, %v3481_v56  ;;  %vm3567_vm10 = vweird.f32 %v6397_v12 }
 0xa07   : > { %6398 = vrsqrt.f32 %v3482_v35  ;;  %vm3568_vm12 = vmor %vm3566_vm11, %vm3567_vm10  ;;  %vm3576_vm14 = vweird.f32 %v3482_v35 }
 0xa08   : > { %v3562_v40 = vmul.f32 %v6397_v12, %v3561_v41 }
 0xa0a   : > { %v3563_v4 = vmul.f32 0.5, %v3562_v40  ;;  %v3445_v27 = vpop.xlane.xlu2 %3444  ;;  %v3377_v17 = vpop.xlane.xlu1 %3376 }
 0xa0b   : > { %v3467_v1 = vmul.f32 %v3445_v27, %v9839_v29  ;;  %v3393_v16 = vmul.f32 %v3377_v17, %v9839_v29 }
 0xa0c   : > { %v3564_v58 = vsub.f32 1.5, %v3563_v4 }
 0xa0d   : > { %v6399_v38 = vpop.eup %6398  ;;  %v3483_v36 = vadd.f32 1e-05, %v3467_v1  ;;  %v8883_v21 = vsub.f32 %v8821_v32, %v3393_v16 }
 0xa0e   : > { %v3565_v22 = vmul.f32 %v6397_v12, %v3564_v58  ;;  %v3571_v54 = vmul.f32 %v6399_v38, %v3482_v35  ;;  %vm3577_vm13 = vweird.f32 %v6399_v38 }
 0xa0f   : > { %6400 = vrsqrt.f32 %v3483_v36  ;;  %v3425_v7 = vmul.f32 %v8883_v21, %v8883_v21  ;;  %vm3578_vm15 = vmor %vm3576_vm14, %vm3577_vm13  ;;  %vm3586_vm2 = vweird.f32 %v3483_v36 }
 0xa10   : > { %v3569_v5 = vsel %vm3568_vm12, %v6397_v12, %v3565_v22  ;;  %v3572_v10 = vmul.f32 %v6399_v38, %v3571_v54 }
 0xa11   : > { %v3657_v49 = vmul.f32 %v3569_v5, %v8796_v13  ;;  %3456 = vadd.xlane.f32.xlu1 %v3425_v7 }
 0xa12   : > { %v3573_v43 = vmul.f32 0.5, %v3572_v10 }
 0xa13   : > { %v3447_v20 = vpop.xlane.xlu2 %3446  ;;  %v3674_v39 = vmul.f32 %v8812_v11, %v3657_v49 }
 0xa14   : > { %v3574_v61 = vsub.f32 1.5, %v3573_v43  ;;  %v3468_v52 = vmul.f32 %v3447_v20, %v9839_v29 }
 0xa15   : > { %v6401_v0 = vpop.eup %6400  ;;  %v3691_v63 = vadd.f32 %v8824_v51, %v3674_v39 }
 0xa16   : > { %v3581_v47 = vmul.f32 %v6401_v0, %v3483_v36  ;;  %v3484_v56 = vadd.f32 1e-05, %v3468_v52  ;;  %v3575_v37 = vmul.f32 %v6399_v38, %v3574_v61  ;;  %vm3587_vm0 = vweird.f32 %v6401_v0 }
 0xa17   : > { %v3703_v13 = vpack.c.bf16 %v3691_v63, %v3690_v3  ;;  %vm3588_vm3 = vmor %vm3586_vm2, %vm3587_vm0 }
 0xa18   : > { %v3582_v24 = vmul.f32 %v6401_v0, %v3581_v47  ;;  %6402 = vrsqrt.f32 %v3484_v56  ;;  %v3579_v12 = vsel %vm3578_vm15, %v6399_v38, %v3575_v37  ;;  %vm3596_vm5 = vweird.f32 %v3484_v56 }
 0xa19   : > { %3933 = vmatmul.bf16.gmra.mxu3 %v3703_v13  ;;  %3982 = vmatmul.bf16.gmra.mxu0 %v3703_v13  ;;  %v3658_v4 = vmul.f32 %v3579_v12, %v8805_v28  ;;  %v5948_v12 = vld [vmem:[%s6738_s30 + $0xb8] sm:$0xff] }
 0xa1a   : > { %v3583_v55 = vmul.f32 0.5, %v3582_v24  ;;  %4031 = vmatmul.bf16.gmra.mxu1 %v3703_v13  ;;  %4080 = vmatmul.bf16.gmra.mxu2 %v3703_v13  ;;  %v3449_v30 = vpop.xlane.xlu0 %3448  ;;  %v5932_v13 = vld [vmem:[%s6738_s30 + $0x38] sm:$0xff] }
 0xa1b   : > { %v3469_v31 = vmul.f32 %v3449_v30, %v9839_v29  ;;  %v3675_v58 = vmul.f32 %v8812_v11, %v3658_v4  ;;  %v5956_v24 = vld [vmem:[%s6738_s30 + $0xf8] sm:$0xff]  ;;  %4459 = vmatpush.bf16.msrb.mxu3 %v5932_v13  ;;  %4557 = vmatpush.bf16.msra.mxu1 %v5948_v12  ;;  %v5939_v4 = vld [vmem:[%s6738_s30 + $0x70] sm:$0xff] }
 0xa1c   : > { %v3584_v41 = vsub.f32 1.5, %v3583_v55  ;;  %v5940_v55 = vld [vmem:[%s6738_s30 + $0x78] sm:$0xff]  ;;  %4606 = vmatpush.bf16.msrb.mxu2 %v5956_v24  ;;  %v5953_v24 = vld [vmem:[%s6738_s30 + $0xe0] sm:$0xff] }
 0xa1d   : > { %v3485_v40 = vadd.f32 1e-05, %v3469_v31  ;;  %v3692_v49 = vadd.f32 %v8824_v51, %v3675_v58  ;;  %4508 = vmatpush.bf16.msra.mxu0 %v5940_v55  ;;  %v5937_v55 = vld [vmem:[%s6738_s30 + $0x60] sm:$0xff] }
 0xa1e   : > { %v6403_v14 = vpop.eup %6402  ;;  %v3585_v27 = vmul.f32 %v6401_v0, %v3584_v41 }
 0xa1f   : > { %v3591_v35 = vmul.f32 %v6403_v14, %v3484_v56  ;;  %6404 = vrsqrt.f32 %v3485_v40  ;;  %vm3597_vm4 = vweird.f32 %v6403_v14  ;;  %vm3606_vm7 = vweird.f32 %v3485_v40 }
 0xa20   : > { %v3589_v17 = vsel %vm3588_vm3, %v6401_v0, %v3585_v27  ;;  %vm3598_vm1 = vmor %vm3596_vm5, %vm3597_vm4  ;;  %v5947_v27 = vld [vmem:[%s6738_s30 + $0xb0] sm:$0xff] }
 0xa21   : > { %v3659_v1 = vmul.f32 %v3589_v17, %v8816_v19  ;;  %v3592_v16 = vmul.f32 %v6403_v14, %v3591_v35  ;;  %4509 = vmatpush.bf16.msra.mxu0 %v5939_v4  ;;  %4558 = vmatpush.bf16.msra.mxu1 %v5947_v27  ;;  %v8943_v4 = vpop.f32.mrf.mxu0 }
 0xa23   : > { %v3593_v38 = vmul.f32 0.5, %v3592_v16  ;;  %v3451_v25 = vpop.xlane.xlu1 %3450  ;;  %v3676_v22 = vmul.f32 %v8812_v11, %v3659_v1 }
 0xa24   : > { %v3470_v54 = vmul.f32 %v3451_v25, %v9839_v29  ;;  %v8945_v27 = vpop.f32.mrf.mxu3 }
 0xa25   : > { %v6405_v7 = vpop.eup %6404  ;;  %v3594_v5 = vsub.f32 1.5, %v3593_v38  ;;  %v3693_v28 = vadd.f32 %v8824_v51, %v3676_v22 }
 0xa26   : > { %v3601_v36 = vmul.f32 %v6405_v7, %v3485_v40  ;;  %v3486_v10 = vadd.f32 1e-05, %v3470_v54  ;;  %vm3607_vm6 = vweird.f32 %v6405_v7  ;;  %v5931_v40 = vld [vmem:[%s6738_s30 + $0x30] sm:$0xff] }
 0xa27   : > { %v3595_v53 = vmul.f32 %v6403_v14, %v3594_v5  ;;  %v3704_v43 = vpack.c.bf16 %v3693_v28, %v3692_v49  ;;  %vm3608_vm8 = vmor %vm3606_vm7, %vm3607_vm6  ;;  %4460 = vmatpush.bf16.msrb.mxu3 %v5931_v40  ;;  %v5928_v40 = vld [vmem:[%s6738_s30 + $0x18] sm:$0xff] }
 0xa28   : > { %v3602_v19 = vmul.f32 %v6405_v7, %v3601_v36  ;;  %6406 = vrsqrt.f32 %v3486_v10  ;;  %vm3616_vm10 = vweird.f32 %v3486_v10 }
 0xa29   : > { %3938 = vmatmul.bf16.gmra.mxu3 %v3704_v43  ;;  %3987 = vmatmul.bf16.gmra.mxu0 %v3704_v43  ;;  %v3599_v61 = vsel %vm3598_vm1, %v6403_v14, %v3595_v53  ;;  %v5955_v14 = vld [vmem:[%s6738_s30 + $0xf0] sm:$0xff] }
 0xa2a   : > { %v3603_v20 = vmul.f32 0.5, %v3602_v19  ;;  %v3453_v39 = vpop.xlane.xlu2 %3452  ;;  %4036 = vmatmul.bf16.gmra.mxu1 %v3704_v43  ;;  %4085 = vmatmul.bf16.gmra.mxu2 %v3704_v43  ;;  %v3660_v47 = vmul.f32 %v3599_v61, %v8835_v45 }
 0xa2b   : > { %v3471_v52 = vmul.f32 %v3453_v39, %v9839_v29  ;;  %4607 = vmatpush.bf16.msrb.mxu2 %v5955_v14  ;;  %v5936_v14 = vld [vmem:[%s6738_s30 + $0x58] sm:$0xff] }
 0xa2c   : > { %v3604_v0 = vsub.f32 1.5, %v3603_v20  ;;  %v3677_v45 = vmul.f32 %v8812_v11, %v3660_v47  ;;  %v5946_v47 = vld [vmem:[%s6738_s30 + $0xa8] sm:$0xff] }
 0xa2d   : > { %v3487_v3 = vadd.f32 1e-05, %v3471_v52  ;;  %4559 = vmatpush.bf16.msra.mxu1 %v5946_v47 }
 0xa2e   : > { %v6407_v63 = vpop.eup %6406  ;;  %v3605_v56 = vmul.f32 %v6405_v7, %v3604_v0  ;;  %v3694_v38 = vadd.f32 %v8824_v51, %v3677_v45  ;;  %v5930_v0 = vld [vmem:[%s6738_s30 + $0x28] sm:$0xff]  ;;  %v5944_v45 = vld [vmem:[%s6738_s30 + $0x98] sm:$0xff] }
 0xa2f   : > { %v3611_v37 = vmul.f32 %v6407_v63, %v3486_v10  ;;  %6408 = vrsqrt.f32 %v3487_v3  ;;  %vm3617_vm9 = vweird.f32 %v6407_v63  ;;  %vm3626_vm13 = vweird.f32 %v3487_v3  ;;  %4461 = vmatpush.bf16.msrb.mxu3 %v5930_v0  ;;  %v5949_v0 = vld [vmem:[%s6738_s30 + $0xc0] sm:$0xff] }
 0xa30   : > { %v3609_v30 = vsel %vm3608_vm8, %v6405_v7, %v3605_v56  ;;  %vm3618_vm11 = vmor %vm3616_vm10, %vm3617_vm9 }
 0xa31   : > { %v3661_v31 = vmul.f32 %v3609_v30, %v8843_v26  ;;  %v3612_v41 = vmul.f32 %v6407_v63, %v3611_v37  ;;  %v5929_v37 = vld [vmem:[%s6738_s30 + $0x20] sm:$0xff] }
 0xa32   : > { %v5945_v30 = vld [vmem:[%s6738_s30 + $0xa0] sm:$0xff] }
 0xa33   : > { %v3613_v35 = vmul.f32 0.5, %v3612_v41  ;;  %v3678_v17 = vmul.f32 %v8812_v11, %v3661_v31  ;;  %4462 = vmatpush.bf16.msrb.mxu3 %v5929_v37  ;;  %4560 = vmatpush.bf16.msra.mxu1 %v5945_v30 }
 0xa35   : > { %v6409_v1 = vpop.eup %6408  ;;  %v3614_v16 = vsub.f32 1.5, %v3613_v35  ;;  %v3695_v58 = vadd.f32 %v8824_v51, %v3678_v17  ;;  %v5952_v35 = vld [vmem:[%s6738_s30 + $0xd8] sm:$0xff]  ;;  %v8948_v17 = vpop.f32.mrf.mxu1 }
 0xa36   : > { %v3621_v26 = vmul.f32 %v6409_v1, %v3487_v3  ;;  %vm3627_vm12 = vweird.f32 %v6409_v1  ;;  %v5954_v3 = vld [vmem:[%s6738_s30 + $0xe8] sm:$0xff] }
 0xa37   : > { %v3615_v25 = vmul.f32 %v6407_v63, %v3614_v16  ;;  %v3705_v54 = vpack.c.bf16 %v3695_v58, %v3694_v38  ;;  %vm3628_vm14 = vmor %vm3626_vm13, %vm3627_vm12  ;;  %4608 = vmatpush.bf16.msrb.mxu2 %v5954_v3  ;;  %4463 = vmatpush.bf16.msrb.mxu3 %v5928_v40  ;;  %v5927_v58 = vld [vmem:[%s6738_s30 + $0x10] sm:$0xff] }
 0xa38   : > { %v3622_v22 = vmul.f32 %v6409_v1, %v3621_v26  ;;  %4561 = vmatpush.bf16.msra.mxu1 %v5944_v45  ;;  %v5935_v26 = vld [vmem:[%s6738_s30 + $0x50] sm:$0xff]  ;;  %v3740_v45 = vld [vmem:[%s6733_s1] sm:$0xf] }
 0xa39   : > { %v3619_v7 = vsel %vm3618_vm11, %v6407_v63, %v3615_v25  ;;  %3943 = vmatmul.bf16.gmra.mxu3 %v3705_v54  ;;  %3992 = vmatmul.bf16.gmra.mxu0 %v3705_v54  ;;  %v5938_v63 = vld [vmem:[%s6738_s30 + $0x68] sm:$0xff]  ;;  %v5943_v38 = vld [vmem:[%s6738_s30 + $0x90] sm:$0xff] }
 0xa3a   : > { %v3623_v5 = vmul.f32 0.5, %v3622_v22  ;;  %4041 = vmatmul.bf16.gmra.mxu1 %v3705_v54  ;;  %4090 = vmatmul.bf16.gmra.mxu2 %v3705_v54  ;;  %v3662_v36 = vmul.f32 %v3619_v7, %v8852_v6  ;;  %v3455_v6 = vpop.xlane.xlu0 %3454  ;;  %v5951_v25 = vld [vmem:[%s6738_s30 + $0xd0] sm:$0xff]  ;;  %v5926_v54 = vld [vmem:[%s6738_s30 + $0x8] sm:$0xff] }
 0xa3b   : > { %4510 = vmatpush.bf16.msra.mxu0 %v5938_v63  ;;  %4609 = vmatpush.bf16.msrb.mxu2 %v5953_v24  ;;  %v5934_v7 = vld [vmem:[%s6738_s30 + $0x48] sm:$0xff] }
 0xa3c   : > { %v3624_v28 = vsub.f32 1.5, %v3623_v5  ;;  %v3679_v19 = vmul.f32 %v8812_v11, %v3662_v36  ;;  %4464 = vmatpush.bf16.msrb.mxu3 %v5927_v58  ;;  %4562 = vmatpush.bf16.msra.mxu1 %v5943_v38  ;;  %v5942_v5 = vld [vmem:[%s6738_s30 + $0x88] sm:$0xff]  ;;  %v8979_v38 = vperm.slane %v3740_v45, 2 }
 0xa3e   : > { %v3625_v49 = vmul.f32 %v6409_v1, %v3624_v28  ;;  %v3696_v20 = vadd.f32 %v8824_v51, %v3679_v19  ;;  %v5950_v28 = vld [vmem:[%s6738_s30 + $0xc8] sm:$0xff] }
 0xa3f   : > { %4511 = vmatpush.bf16.msra.mxu0 %v5937_v55  ;;  %4610 = vmatpush.bf16.msrb.mxu2 %v5952_v35 }
 0xa40   : > { %v3629_v53 = vsel %vm3628_vm14, %v6409_v1, %v3625_v49  ;;  %v8950_v1 = vpop.f32.mrf.mxu2  ;;  %4465 = vmatpush.bf16.msrb.mxu3 %v5926_v54  ;;  %v3970_v49 = vpop.f32.mrf.mxu0  ;;  %4563 = vmatpush.bf16.msra.mxu1 %v5942_v5 }
 0xa41   : > { %v3663_v10 = vmul.f32 %v3629_v53, %v8861_v23  ;;  %v3472_v23 = vmul.f32 %v3455_v6, %v9839_v29  ;;  %v3921_v53 = vpop.f32.mrf.mxu3 }
 0xa43   : > { %v3680_v43 = vmul.f32 %v8812_v11, %v3663_v10  ;;  %v8923_v52 = vadd.f32 1e-05, %v3472_v23  ;;  %4512 = vmatpush.bf16.msra.mxu0 %v5936_v14  ;;  %4611 = vmatpush.bf16.msrb.mxu2 %v5951_v25  ;;  %v5941_v23 = vld [vmem:[%s6738_s30 + $0x80] sm:$0xff] }
 0xa44   : > { %4564 = vmatpush.bf16.msra.mxu1 %v5941_v23 }
 0xa45   : > { %v3697_v39 = vadd.f32 %v8824_v51, %v3680_v43  ;;  %6410 = vrsqrt.f32 %v8923_v52  ;;  %v4019_v43 = vpop.f32.mrf.mxu1  ;;  %vm3636_vm0 = vweird.f32 %v8923_v52 }
 0xa47   : > { %v3706_v61 = vpack.c.bf16 %v3697_v39, %v3696_v20  ;;  %4513 = vmatpush.bf16.msra.mxu0 %v5935_v26  ;;  %4612 = vmatpush.bf16.msrb.mxu2 %v5950_v28  ;;  %v5925_v39 = vld [vmem:[%s6738_s30] sm:$0xff]  ;;  %v8975_v26 = vperm.slane %v3740_v45, 1  ;;  %v4018_v28 = vadd.f32 %v8948_v17, %v8979_v38 }
 0xa48   : > { %v4068_v20 = vpop.f32.mrf.mxu2  ;;  %4466 = vmatpush.bf16.msrb.mxu3 %v5925_v39 }
 0xa49   : > { %3948 = vmatmul.bf16.gmra.mxu3 %v3706_v61  ;;  %3997 = vmatmul.bf16.gmra.mxu0 %v3706_v61  ;;  %v3924_v24 = vpop.f32.mrf.mxu3 }
 0xa4a   : > { %4046 = vmatmul.bf16.gmra.mxu1 %v3706_v61  ;;  %4095 = vmatmul.bf16.gmra.mxu2 %v3706_v61  ;;  %v5933_v61 = vld [vmem:[%s6738_s30 + $0x40] sm:$0xff] }
 0xa4b   : > { %v8930_v56 = vpop.eup %6410  ;;  %4514 = vmatpush.bf16.msra.mxu0 %v5934_v7  ;;  %4613 = vmatpush.bf16.msrb.mxu2 %v5949_v0  ;;  %v3969_v7 = vadd.f32 %v8943_v4, %v8975_v26  ;;  %v4108_v4 = vmax.f32 %v4018_v28, 0.0 }
 0xa4c   : > { %v3631_v13 = vmul.f32 %v8930_v56, %v8923_v52  ;;  %vm3637_vm15 = vweird.f32 %v8930_v56  ;;  %v3973_v52 = vpop.f32.mrf.mxu0 }
 0xa4d   : > { %vm3638_vm2 = vmor %vm3636_vm0, %vm3637_vm15  ;;  %v4022_v30 = vpop.f32.mrf.mxu1 }
 0xa4e   : > { %v3632_v12 = vmul.f32 %v8930_v56, %v3631_v13 }
 0xa4f   : > { %4515 = vmatpush.bf16.msra.mxu0 %v5933_v61  ;;  %v4107_v61 = vmax.f32 %v3969_v7, 0.0 }
 0xa54   : > { %v3975_v35 = vpop.f32.mrf.mxu0 }
 0xa5c   : > { %v3978_v39 = vpop.f32.mrf.mxu0 }
 0xa64   : > { %v3980_v17 = vpop.f32.mrf.mxu0 }
 0xa84   : > { %v3457_v31 = vpop.xlane.xlu1 %3456 }
 0xa85   : > { %v3473_v41 = vmul.f32 %v3457_v31, %v9839_v29  ;;  %v3633_v29 = vmul.f32 0.5, %v3632_v12  ;;  %v4071_v12 = vpop.f32.mrf.mxu2 }
 0xa87   : > { %v3489_v16 = vadd.f32 1e-05, %v3473_v41  ;;  %v3634_v22 = vsub.f32 1.5, %v3633_v29  ;;  %v4024_v29 = vpop.f32.mrf.mxu1 }
 0xa89   : > { %6412 = vrsqrt.f32 %v3489_v16  ;;  %v3635_v10 = vmul.f32 %v8930_v56, %v3634_v22  ;;  %vm3646_vm4 = vweird.f32 %v3489_v16  ;;  %v4020_v22 = vadd.f32 %v4019_v43, %v8979_v38 }
 0xa8b   : > { %v3639_v3 = vsel %vm3638_vm2, %v8930_v56, %v3635_v10 }
 0xa8c   : > { %v3664_v37 = vmul.f32 %v3639_v3, %v8870_v8 }
 0xa8d   : > { %v4073_v58 = vpop.f32.mrf.mxu2 }
 0xa8e   : > { %v3681_v56 = vmul.f32 %v8812_v11, %v3664_v37  ;;  %v3976_v37 = vadd.f32 %v3975_v35, %v8975_v26 }
 0xa8f   : > { %v6413_v36 = vpop.eup %6412 }
 0xa90   : > { %v3641_v19 = vmul.f32 %v6413_v36, %v3489_v16  ;;  %vm3647_vm3 = vweird.f32 %v6413_v36  ;;  %v3698_v40 = vadd.f32 %v8824_v51, %v3681_v56  ;;  %v3926_v16 = vpop.f32.mrf.mxu3  ;;  %v4025_v56 = vadd.f32 %v4024_v29, %v8979_v38 }
 0xa91   : > { %vm3648_vm5 = vmor %vm3646_vm4, %vm3647_vm3 }
 0xa92   : > { %v3642_v6 = vmul.f32 %v6413_v36, %v3641_v19  ;;  %v4112_v19 = vmax.f32 %v4020_v22, 0.0  ;;  %v4120_v22 = vmax.f32 %v4025_v56, 0.0 }
 0xa94   : > { %v3643_v63 = vmul.f32 0.5, %v3642_v6  ;;  %v4027_v6 = vpop.f32.mrf.mxu1 }
 0xa95   : > { %v4076_v23 = vpop.f32.mrf.mxu2 }
 0xa96   : > { %v3644_v47 = vsub.f32 1.5, %v3643_v63  ;;  %v4172_v63 = vpack.c.bf16 %v4112_v19, %v4108_v4  ;;  %v3983_v28 = vpop.f32.mrf.mxu0  ;;  %v3979_v4 = vadd.f32 %v3978_v39, %v8975_v26 }
 0xa98   : > { %v3645_v13 = vmul.f32 %v6413_v36, %v3644_v47  ;;  %v3929_v43 = vpop.f32.mrf.mxu3  ;;  %v4123_v56 = vmax.f32 %v3979_v4, 0.0 }
 0xa9a   : > { %v3649_v55 = vsel %vm3648_vm5, %v6413_v36, %v3645_v13 }
 0xa9b   : > { %v3665_v31 = vmul.f32 %v3649_v55, %v8883_v21  ;;  %v8977_v21 = vperm.slane %v3740_v45, 0 }
 0xa9c   : > { %v4029_v55 = vpop.f32.mrf.mxu1 }
 0xa9d   : > { %v3682_v41 = vmul.f32 %v8812_v11, %v3665_v31  ;;  %v8981_v11 = vperm.slane %v3740_v45, 3  ;;  %v3922_v25 = vadd.f32 %v3921_v53, %v8977_v21  ;;  %v3920_v5 = vadd.f32 %v8945_v27, %v8977_v21  ;;  %v4078_v31 = vpop.f32.mrf.mxu2 }
 0xa9e   : > { %v3927_v13 = vadd.f32 %v3926_v16, %v8977_v21  ;;  %v4030_v19 = vadd.f32 %v4029_v55, %v8979_v38 }
 0xa9f   : > { %v3699_v14 = vadd.f32 %v8824_v51, %v3682_v41  ;;  %v3971_v51 = vadd.f32 %v3970_v49, %v8975_v26  ;;  %v4069_v54 = vadd.f32 %v4068_v20, %v8981_v11  ;;  %v4067_v36 = vadd.f32 %v8950_v1, %v8981_v11 }
 0xaa0   : > { %v4110_v49 = vmax.f32 %v3922_v25, 0.0  ;;  %v4106_v20 = vmax.f32 %v3920_v5, 0.0  ;;  %v3931_v1 = vpop.f32.mrf.mxu3  ;;  %v4074_v41 = vadd.f32 %v4073_v58, %v8981_v11  ;;  %v4072_v45 = vadd.f32 %v4071_v12, %v8981_v11 }
 0xaa1   : > { %v3707_v8 = vpack.c.bf16 %v3699_v14, %v3698_v40  ;;  %v4111_v10 = vmax.f32 %v3971_v51, 0.0  ;;  %v4113_v53 = vmax.f32 %v4069_v54, 0.0  ;;  %v4109_v0 = vmax.f32 %v4067_v36, 0.0 }
 0xaa2   : > { %v4170_v27 = vpack.c.bf16 %v4110_v49, %v4106_v20  ;;  %v3974_v40 = vadd.f32 %v3973_v52, %v8975_v26  ;;  %v3925_v14 = vadd.f32 %v3924_v24, %v8977_v21  ;;  %v4119_v51 = vmax.f32 %v3976_v37, 0.0 }
 0xaa3   : > { %3953 = vmatmul.bf16.gmra.mxu3 %v3707_v8  ;;  %4002 = vmatmul.bf16.gmra.mxu0 %v3707_v8  ;;  %v4171_v3 = vpack.c.bf16 %v4111_v10, %v4107_v61  ;;  %v4173_v47 = vpack.c.bf16 %v4113_v53, %v4109_v0  ;;  %v4118_v25 = vmax.f32 %v3927_v13, 0.0  ;;  %v4121_v35 = vmax.f32 %v4074_v41, 0.0  ;;  %v3985_v61 = vpop.f32.mrf.mxu0 }
 0xaa4   : > { %4051 = vmatmul.bf16.gmra.mxu1 %v3707_v8  ;;  %4100 = vmatmul.bf16.gmra.mxu2 %v3707_v8  ;;  %v4023_v8 = vadd.f32 %v4022_v30, %v8979_v38  ;;  %v4115_v54 = vmax.f32 %v3974_v40, 0.0  ;;  %v4114_v16 = vmax.f32 %v3925_v14, 0.0  ;;  %v4117_v5 = vmax.f32 %v4072_v45, 0.0  ;;  %v4032_v36 = vpop.f32.mrf.mxu1 }
 0xaa5   : > { %v4081_v58 = vpop.f32.mrf.mxu2  ;;  %v3981_v30 = vadd.f32 %v3980_v17, %v8975_v26  ;;  %v3932_v12 = vadd.f32 %v3931_v1, %v8977_v21  ;;  %v4079_v53 = vadd.f32 %v4078_v31, %v8981_v11  ;;  %v3930_v0 = vadd.f32 %v3929_v43, %v8977_v21 }
 0xaa6   : > { %v4116_v7 = vmax.f32 %v4023_v8, 0.0  ;;  %v4174_v10 = vpack.c.bf16 %v4118_v25, %v4114_v16  ;;  %v4175_v52 = vpack.c.bf16 %v4119_v51, %v4115_v54  ;;  %v4177_v24 = vpack.c.bf16 %v4121_v35, %v4117_v5 }
 0xaa7   : > { %v4127_v37 = vmax.f32 %v3981_v30, 0.0  ;;  %v4126_v17 = vmax.f32 %v3932_v12, 0.0  ;;  %v4128_v13 = vmax.f32 %v4030_v19, 0.0  ;;  %v4129_v1 = vmax.f32 %v4079_v53, 0.0 }
 0xaa8   : > { %v3934_v29 = vpop.f32.mrf.mxu3  ;;  %v4176_v49 = vpack.c.bf16 %v4120_v22, %v4116_v7  ;;  %v4122_v55 = vmax.f32 %v3930_v0, 0.0  ;;  %v3986_v51 = vadd.f32 %v3985_v61, %v8975_v26  ;;  %v3984_v54 = vadd.f32 %v3983_v28, %v8975_v26 }
 0xaa9   : > { %v4179_v14 = vpack.c.bf16 %v4127_v37, %v4123_v56  ;;  %v3935_v16 = vadd.f32 %v3934_v29, %v8977_v21  ;;  %v4033_v7 = vadd.f32 %v4032_v36, %v8979_v38  ;;  %v4082_v5 = vadd.f32 %v4081_v58, %v8981_v11 }
 0xaaa   : > { %v4178_v40 = vpack.c.bf16 %v4126_v17, %v4122_v55  ;;  %v4131_v19 = vmax.f32 %v3984_v54, 0.0 }
 0xaab   : > { %v3988_v43 = vpop.f32.mrf.mxu0  ;;  %v4130_v53 = vmax.f32 %v3935_v16, 0.0  ;;  %v4132_v4 = vmax.f32 %v4033_v7, 0.0  ;;  %v4133_v0 = vmax.f32 %v4082_v5, 0.0 }
 0xaac   : > { %v3989_v56 = vadd.f32 %v3988_v43, %v8975_v26 }
 0xab0   : > { %v3936_v20 = vpop.f32.mrf.mxu3 }
 0xab1   : > { %v3937_v25 = vadd.f32 %v3936_v20, %v8977_v21 }
 0xab3   : > { %4467 = vmatmul.bf16.vlgmr.msrb.gmra.mxu3 %v4170_v27  ;;  %4516 = vmatmul.bf16.vlgmr.msra.gmra.mxu0 %v4171_v3  ;;  %v4034_v3 = vpop.f32.mrf.mxu1  ;;  %v4083_v27 = vpop.f32.mrf.mxu2 }
 0xab4   : > { %4565 = vmatmul.bf16.vlgmr.msra.gmra.mxu1 %v4172_v63  ;;  %4614 = vmatmul.bf16.vlgmr.msrb.gmra.mxu2 %v4173_v47  ;;  %v4028_v63 = vadd.f32 %v4027_v6, %v8979_v38  ;;  %v4077_v47 = vadd.f32 %v4076_v23, %v8981_v11  ;;  %v4035_v22 = vadd.f32 %v4034_v3, %v8979_v38  ;;  %v3990_v30 = vpop.f32.mrf.mxu0 }
 0xab5   : > { %v4084_v35 = vadd.f32 %v4083_v27, %v8981_v11 }
 0xab6   : > { %v4124_v41 = vmax.f32 %v4028_v63, 0.0  ;;  %v4125_v31 = vmax.f32 %v4077_v47, 0.0  ;;  %v3991_v63 = vadd.f32 %v3990_v30, %v8975_v26 }
 0xab8   : > { %v4180_v8 = vpack.c.bf16 %v4128_v13, %v4124_v41  ;;  %v4181_v39 = vpack.c.bf16 %v4129_v1, %v4125_v31  ;;  %v3939_v45 = vpop.f32.mrf.mxu3 }
 0xab9   : > { %v3940_v55 = vadd.f32 %v3939_v45, %v8977_v21 }
 0xabb   : > { %v4037_v6 = vpop.f32.mrf.mxu1  ;;  %v4086_v23 = vpop.f32.mrf.mxu2 }
 0xabc   : > { %v3993_v36 = vpop.f32.mrf.mxu0  ;;  %v4038_v41 = vadd.f32 %v4037_v6, %v8979_v38  ;;  %v4087_v31 = vadd.f32 %v4086_v23, %v8981_v11 }
 0xabd   : > { %v3994_v30 = vadd.f32 %v3993_v36, %v8975_v26 }
 0xac0   : > { %v3941_v12 = vpop.f32.mrf.mxu3 }
 0xac1   : > { %v3942_v47 = vadd.f32 %v3941_v12, %v8977_v21 }
 0xac3   : > { %4472 = vmatmul.bf16.gmra.mxu3 %v4174_v10  ;;  %4521 = vmatmul.bf16.gmra.mxu0 %v4175_v52  ;;  %v4135_v10 = vmax.f32 %v3986_v51, 0.0  ;;  %v4134_v52 = vmax.f32 %v3937_v25, 0.0  ;;  %v4039_v61 = vpop.f32.mrf.mxu1  ;;  %v4088_v20 = vpop.f32.mrf.mxu2  ;;  %v4139_v51 = vmax.f32 %v3989_v56, 0.0  ;;  %v4138_v25 = vmax.f32 %v3940_v55, 0.0 }
 0xac4   : > { %4570 = vmatmul.bf16.gmra.mxu1 %v4176_v49  ;;  %4619 = vmatmul.bf16.gmra.mxu2 %v4177_v24  ;;  %v4136_v49 = vmax.f32 %v4035_v22, 0.0  ;;  %v4137_v24 = vmax.f32 %v4084_v35, 0.0  ;;  %v4040_v13 = vadd.f32 %v4039_v61, %v8979_v38  ;;  %v4089_v1 = vadd.f32 %v4088_v20, %v8981_v11 }
 0xac5   : > { %v4182_v3 = vpack.c.bf16 %v4134_v52, %v4130_v53  ;;  %v4183_v28 = vpack.c.bf16 %v4135_v10, %v4131_v19  ;;  %v4140_v22 = vmax.f32 %v4038_v41, 0.0  ;;  %v4141_v35 = vmax.f32 %v4087_v31, 0.0  ;;  %v3995_v10 = vpop.f32.mrf.mxu0 }
 0xac6   : > { %v4184_v27 = vpack.c.bf16 %v4136_v49, %v4132_v4  ;;  %v4185_v29 = vpack.c.bf16 %v4137_v24, %v4133_v0  ;;  %v3996_v6 = vadd.f32 %v3995_v10, %v8975_v26 }
 0xac8   : > { %v3944_v58 = vpop.f32.mrf.mxu3  ;;  %v4151_v4 = vmax.f32 %v3996_v6, 0.0 }
 0xac9   : > { %v3945_v12 = vadd.f32 %v3944_v58, %v8977_v21 }
 0xacb   : > { %v4042_v37 = vpop.f32.mrf.mxu1  ;;  %v4091_v17 = vpop.f32.mrf.mxu2 }
 0xacc   : > { %v4043_v19 = vadd.f32 %v4042_v37, %v8979_v38  ;;  %v4092_v53 = vadd.f32 %v4091_v17, %v8981_v11 }
 0xacd   : > { %v3998_v61 = vpop.f32.mrf.mxu0 }
 0xad0   : > { %v3946_v43 = vpop.f32.mrf.mxu3 }
 0xad1   : > { %v3947_v23 = vadd.f32 %v3946_v43, %v8977_v21 }
 0xad3   : > { %4477 = vmatmul.bf16.gmra.mxu3 %v4178_v40  ;;  %4526 = vmatmul.bf16.gmra.mxu0 %v4179_v14  ;;  %v4143_v40 = vmax.f32 %v3991_v63, 0.0  ;;  %v4142_v14 = vmax.f32 %v3942_v47, 0.0  ;;  %v4044_v52 = vpop.f32.mrf.mxu1  ;;  %v4093_v45 = vpop.f32.mrf.mxu2  ;;  %v4150_v0 = vmax.f32 %v3947_v23, 0.0  ;;  %v4147_v63 = vmax.f32 %v3994_v30, 0.0 }
 0xad4   : > { %4575 = vmatmul.bf16.gmra.mxu1 %v4180_v8  ;;  %4624 = vmatmul.bf16.gmra.mxu2 %v4181_v39  ;;  %v4144_v8 = vmax.f32 %v4040_v13, 0.0  ;;  %v4145_v39 = vmax.f32 %v4089_v1, 0.0  ;;  %v4045_v49 = vadd.f32 %v4044_v52, %v8979_v38  ;;  %v4094_v24 = vadd.f32 %v4093_v45, %v8981_v11 }
 0xad5   : > { %v4187_v54 = vpack.c.bf16 %v4143_v40, %v4139_v51  ;;  %v4186_v16 = vpack.c.bf16 %v4142_v14, %v4138_v25  ;;  %v4146_v47 = vmax.f32 %v3945_v12, 0.0  ;;  %v4148_v13 = vmax.f32 %v4043_v19, 0.0  ;;  %v4000_v37 = vpop.f32.mrf.mxu0 }
 0xad6   : > { %v4188_v7 = vpack.c.bf16 %v4144_v8, %v4140_v22  ;;  %v4189_v5 = vpack.c.bf16 %v4145_v39, %v4141_v35  ;;  %v4149_v1 = vmax.f32 %v4092_v53, 0.0  ;;  %v4191_v56 = vpack.c.bf16 %v4151_v4, %v4147_v63 }
 0xad7   : > { %v4190_v36 = vpack.c.bf16 %v4150_v0, %v4146_v47  ;;  %v4001_v40 = vadd.f32 %v4000_v37, %v8975_v26  ;;  %v3999_v51 = vadd.f32 %v3998_v61, %v8975_v26 }
 0xad8   : > { %v3949_v20 = vpop.f32.mrf.mxu3 }
 0xad9   : > { %v3950_v25 = vadd.f32 %v3949_v20, %v8977_v21  ;;  %v4155_v10 = vmax.f32 %v3999_v51, 0.0 }
 0xadb   : > { %v4154_v43 = vmax.f32 %v3950_v25, 0.0 }
 0xae0   : > { %v3951_v17 = vpop.f32.mrf.mxu3 }
 0xae1   : > { %v3952_v14 = vadd.f32 %v3951_v17, %v8977_v21 }
 0xae3   : > { %4482 = vmatmul.bf16.gmra.mxu3 %v4182_v3  ;;  %4531 = vmatmul.bf16.gmra.mxu0 %v4183_v28  ;;  %v4047_v3 = vpop.f32.mrf.mxu1  ;;  %v4096_v28 = vpop.f32.mrf.mxu2 }
 0xae4   : > { %4580 = vmatmul.bf16.gmra.mxu1 %v4184_v27  ;;  %4629 = vmatmul.bf16.gmra.mxu2 %v4185_v29  ;;  %v4152_v27 = vmax.f32 %v4045_v49, 0.0  ;;  %v4153_v29 = vmax.f32 %v4094_v24, 0.0  ;;  %v4048_v22 = vadd.f32 %v4047_v3, %v8979_v38  ;;  %v4097_v35 = vadd.f32 %v4096_v28, %v8981_v11 }
 0xae6   : > { %v4192_v55 = vpack.c.bf16 %v4152_v27, %v4148_v13  ;;  %v4193_v58 = vpack.c.bf16 %v4153_v29, %v4149_v1  ;;  %v4156_v52 = vmax.f32 %v4048_v22, 0.0  ;;  %v4157_v45 = vmax.f32 %v4097_v35, 0.0 }
 0xaeb   : > { %v4049_v41 = vpop.f32.mrf.mxu1  ;;  %v4098_v31 = vpop.f32.mrf.mxu2 }
 0xaec   : > { %v4050_v8 = vadd.f32 %v4049_v41, %v8979_v38  ;;  %v4099_v39 = vadd.f32 %v4098_v31, %v8981_v11 }
 0xaf3   : > { %4487 = vmatmul.bf16.gmra.mxu3 %v4186_v16  ;;  %4536 = vmatmul.bf16.gmra.mxu0 %v4187_v54  ;;  %v4159_v54 = vmax.f32 %v4001_v40, 0.0  ;;  %v4158_v16 = vmax.f32 %v3952_v14, 0.0 }
 0xaf4   : > { %4585 = vmatmul.bf16.gmra.mxu1 %v4188_v7  ;;  %4634 = vmatmul.bf16.gmra.mxu2 %v4189_v5  ;;  %v4160_v7 = vmax.f32 %v4050_v8, 0.0  ;;  %v4161_v5 = vmax.f32 %v4099_v39, 0.0  ;;  %v6431_v39 = vld [vmem:[%s6713_s19] sm:$0xff] }
 0xaf5   : > { %v4195_v6 = vpack.c.bf16 %v4159_v54, %v4155_v10  ;;  %v4194_v23 = vpack.c.bf16 %v4158_v16, %v4154_v43  ;;  %v9052_v51 = vperm.slane %v6431_v39, 5 }
 0xaf6   : > { %v4196_v49 = vpack.c.bf16 %v4160_v7, %v4156_v52  ;;  %v4197_v24 = vpack.c.bf16 %v4161_v5, %v4157_v45 }
 0xb03   : > { %4492 = vmatmul.bf16.gmra.mxu3 %v4190_v36  ;;  %4541 = vmatmul.bf16.gmra.mxu0 %v4191_v56 }
 0xb04   : > { %4590 = vmatmul.bf16.gmra.mxu1 %v4192_v55  ;;  %4639 = vmatmul.bf16.gmra.mxu2 %v4193_v58 }
 0xb13   : > { %4497 = vmatmul.bf16.gmra.mxu3 %v4194_v23  ;;  %4546 = vmatmul.bf16.gmra.mxu0 %v4195_v6 }
 0xb14   : > { %4595 = vmatmul.bf16.gmra.mxu1 %v4196_v49  ;;  %4644 = vmatmul.bf16.gmra.mxu2 %v4197_v24 }
 0xb20   : > { %v4003_v30 = vpop.f32.mrf.mxu0 }
 0xb21   : > { %v4052_v12 = vpop.f32.mrf.mxu1  ;;  %v4004_v53 = vadd.f32 %v4003_v30, %v8975_v26 }
 0xb22   : > { %v4053_v20 = vadd.f32 %v4052_v12, %v8979_v38 }
 0xb23   : > { %v4163_v27 = vmax.f32 %v4004_v53, 0.0 }
 0xb24   : > { %v4164_v63 = vmax.f32 %v4053_v20, 0.0 }
 0xb26   : > { %v3954_v19 = vpop.f32.mrf.mxu3 }
 0xb27   : > { %v4101_v61 = vpop.f32.mrf.mxu2  ;;  %v3955_v13 = vadd.f32 %v3954_v19, %v8977_v21 }
 0xb28   : > { %v4005_v4 = vpop.f32.mrf.mxu0  ;;  %v4102_v56 = vadd.f32 %v4101_v61, %v8981_v11 }
 0xb29   : > { %v4006_v0 = vadd.f32 %v4005_v4, %v8975_v26  ;;  %v4054_v3 = vpop.f32.mrf.mxu1  ;;  %v4162_v17 = vmax.f32 %v3955_v13, 0.0 }
 0xb2a   : > { %v4055_v28 = vadd.f32 %v4054_v3, %v8979_v38  ;;  %v4165_v40 = vmax.f32 %v4102_v56, 0.0 }
 0xb2b   : > { %v4167_v29 = vmax.f32 %v4006_v0, 0.0 }
 0xb2c   : > { %v4168_v47 = vmax.f32 %v4055_v28, 0.0 }
 0xb2d   : > { %v4199_v1 = vpack.c.bf16 %v4167_v29, %v4163_v27 }
 0xb2e   : > { %v4200_v36 = vpack.c.bf16 %v4168_v47, %v4164_v63  ;;  %v3956_v55 = vpop.f32.mrf.mxu3 }
 0xb2f   : > { %v3957_v58 = vadd.f32 %v3956_v55, %v8977_v21  ;;  %v4103_v37 = vpop.f32.mrf.mxu2  ;;  %4551 = vmatmul.bf16.gmra.mxu0 %v4199_v1 }
 0xb30   : > { %v4104_v26 = vadd.f32 %v4103_v37, %v8981_v11  ;;  %4600 = vmatmul.bf16.gmra.mxu1 %v4200_v36  ;;  %v4517_v38 = vpop.f32.mrf.mxu0 }
 0xb31   : > { %v4166_v41 = vmax.f32 %v3957_v58, 0.0  ;;  %v4566_v31 = vpop.f32.mrf.mxu1 }
 0xb32   : > { %v4169_v14 = vmax.f32 %v4104_v26, 0.0 }
 0xb33   : > { %v4198_v8 = vpack.c.bf16 %v4166_v41, %v4162_v17 }
 0xb34   : > { %v4201_v25 = vpack.c.bf16 %v4169_v14, %v4165_v40 }
 0xb35   : > { %4502 = vmatmul.bf16.gmra.mxu3 %v4198_v8 }
 0xb36   : > { %4649 = vmatmul.bf16.gmra.mxu2 %v4201_v25  ;;  %v4468_v22 = vpop.f32.mrf.mxu3 }
 0xb37   : > { %v4469_v21 = vadd.f32 %v4468_v22, %v9052_v51  ;;  %v4615_v35 = vpop.f32.mrf.mxu2 }
 0xb38   : > { %v4519_v54 = vpop.f32.mrf.mxu0 }
 0xb39   : > { %v4518_v11 = vadd.f32 %v4517_v38, %v4469_v21  ;;  %v4568_v16 = vpop.f32.mrf.mxu1 }
 0xb3b   : > { %v4567_v7 = vadd.f32 %v4566_v31, %v4518_v11 }
 0xb3d   : > { %v4616_v5 = vadd.f32 %v4615_v35, %v4567_v7 }
 0xb3e   : > { %v4470_v10 = vpop.f32.mrf.mxu3 }
 0xb3f   : > { %v9056_v43 = vadd.f32 %v4616_v5, %v8601_v15  ;;  %v4471_v52 = vadd.f32 %v4470_v10, %v9052_v51  ;;  %v4617_v45 = vpop.f32.mrf.mxu2 }
 0xb40   : > { %v4522_v6 = vpop.f32.mrf.mxu0 }
 0xb41   : > { %4671 = vst [vmem:[#allocation2 + $0x30] sm:$0xff] %v9056_v43  ;;  %v4520_v23 = vadd.f32 %v4519_v54, %v4471_v52  ;;  %v4571_v49 = vpop.f32.mrf.mxu1 }
 0xb43   : > { %v4569_v24 = vadd.f32 %v4568_v16, %v4520_v23 }
 0xb45   : > { %v4618_v30 = vadd.f32 %v4617_v45, %v4569_v24 }
 0xb46   : > { %v4473_v12 = vpop.f32.mrf.mxu3 }
 0xb47   : > { %v9061_v19 = vadd.f32 %v4618_v30, %v8607_v44  ;;  %v4474_v53 = vadd.f32 %v4473_v12, %v9052_v51  ;;  %v4620_v61 = vpop.f32.mrf.mxu2 }
 0xb48   : > { %v4524_v20 = vpop.f32.mrf.mxu0 }
 0xb49   : > { %4672 = vst [vmem:[#allocation2] sm:$0xff] %v9061_v19  ;;  %v4523_v15 = vadd.f32 %v4522_v6, %v4474_v53  ;;  %v4573_v4 = vpop.f32.mrf.mxu1 }
 0xb4b   : > { %v4572_v0 = vadd.f32 %v4571_v49, %v4523_v15 }
 0xb4d   : > { %v4621_v3 = vadd.f32 %v4620_v61, %v4572_v0 }
 0xb4e   : > { %v4475_v28 = vpop.f32.mrf.mxu3 }
 0xb4f   : > { %v9066_v27 = vadd.f32 %v4621_v3, %v8613_v42  ;;  %v4476_v29 = vadd.f32 %v4475_v28, %v9052_v51  ;;  %v4622_v63 = vpop.f32.mrf.mxu2 }
 0xb50   : > { %v4527_v47 = vpop.f32.mrf.mxu0 }
 0xb51   : > { %4673 = vst [vmem:[#allocation2 + $0x58] sm:$0xff] %v9066_v27  ;;  %v4525_v44 = vadd.f32 %v4524_v20, %v4476_v29  ;;  %v4576_v13 = vpop.f32.mrf.mxu1 }
 0xb53   : > { %v4574_v1 = vadd.f32 %v4573_v4, %v4525_v44 }
 0xb55   : > { %v4623_v56 = vadd.f32 %v4622_v63, %v4574_v1 }
 0xb56   : > { %v4478_v36 = vpop.f32.mrf.mxu3 }
 0xb57   : > { %v9071_v55 = vadd.f32 %v4623_v56, %v8619_v9  ;;  %v4479_v58 = vadd.f32 %v4478_v36, %v9052_v51  ;;  %v4625_v37 = vpop.f32.mrf.mxu2 }
 0xb58   : > { %v4529_v26 = vpop.f32.mrf.mxu0 }
 0xb59   : > { %4674 = vst [vmem:[#allocation2 + $0x18] sm:$0xff] %v9071_v55  ;;  %v4528_v42 = vadd.f32 %v4527_v47, %v4479_v58  ;;  %v4578_v38 = vpop.f32.mrf.mxu1 }
 0xb5b   : > { %v4577_v17 = vadd.f32 %v4576_v13, %v4528_v42 }
 0xb5d   : > { %v4626_v41 = vadd.f32 %v4625_v37, %v4577_v17 }
 0xb5e   : > { %v4480_v31 = vpop.f32.mrf.mxu3 }
 0xb5f   : > { %v9076_v40 = vadd.f32 %v4626_v41, %v8625_v62  ;;  %v4481_v14 = vadd.f32 %v4480_v31, %v9052_v51  ;;  %v4627_v8 = vpop.f32.mrf.mxu2 }
 0xb60   : > { %v4532_v39 = vpop.f32.mrf.mxu0 }
 0xb61   : > { %4675 = vst [vmem:[#allocation2 + $0x50] sm:$0xff] %v9076_v40  ;;  %v4530_v9 = vadd.f32 %v4529_v26, %v4481_v14  ;;  %v4581_v25 = vpop.f32.mrf.mxu1 }
 0xb63   : > { %v4579_v22 = vadd.f32 %v4578_v38, %v4530_v9 }
 0xb65   : > { %v4628_v21 = vadd.f32 %v4627_v8, %v4579_v22 }
 0xb66   : > { %v4483_v35 = vpop.f32.mrf.mxu3 }
 0xb67   : > { %v9081_v54 = vadd.f32 %v4628_v21, %v8631_v48  ;;  %v4484_v11 = vadd.f32 %v4483_v35, %v9052_v51  ;;  %v4630_v16 = vpop.f32.mrf.mxu2 }
 0xb68   : > { %v4534_v7 = vpop.f32.mrf.mxu0 }
 0xb69   : > { %4676 = vst [vmem:[#allocation2 + $0x68] sm:$0xff] %v9081_v54  ;;  %v4533_v62 = vadd.f32 %v4532_v39, %v4484_v11  ;;  %v4583_v5 = vpop.f32.mrf.mxu1 }
 0xb6b   : > { %v4582_v10 = vadd.f32 %v4581_v25, %v4533_v62 }
 0xb6d   : > { %v4631_v52 = vadd.f32 %v4630_v16, %v4582_v10 }
 0xb6e   : > { %v4485_v45 = vpop.f32.mrf.mxu3 }
 0xb6f   : > { %v9086_v6 = vadd.f32 %v4631_v52, %v8635_v59  ;;  %v4486_v23 = vadd.f32 %v4485_v45, %v9052_v51  ;;  %v4632_v49 = vpop.f32.mrf.mxu2 }
 0xb70   : > { %v4537_v24 = vpop.f32.mrf.mxu0 }
 0xb71   : > { %4677 = vst [vmem:[#allocation2 + $0x8] sm:$0xff] %v9086_v6  ;;  %v4535_v48 = vadd.f32 %v4534_v7, %v4486_v23  ;;  %v4586_v30 = vpop.f32.mrf.mxu1 }
 0xb73   : > { %v4584_v12 = vadd.f32 %v4583_v5, %v4535_v48 }
 0xb75   : > { %v4633_v53 = vadd.f32 %v4632_v49, %v4584_v12 }
 0xb76   : > { %v4488_v61 = vpop.f32.mrf.mxu3 }
 0xb77   : > { %v9091_v20 = vadd.f32 %v4633_v53, %v8655_v18  ;;  %v4489_v15 = vadd.f32 %v4488_v61, %v9052_v51  ;;  %v4635_v4 = vpop.f32.mrf.mxu2 }
 0xb78   : > { %v4539_v0 = vpop.f32.mrf.mxu0 }
 0xb79   : > { %4678 = vst [vmem:[#allocation2 + $0x48] sm:$0xff] %v9091_v20  ;;  %v4538_v59 = vadd.f32 %v4537_v24, %v4489_v15  ;;  %v4588_v3 = vpop.f32.mrf.mxu1 }
 0xb7b   : > { %v4587_v28 = vadd.f32 %v4586_v30, %v4538_v59 }
 0xb7d   : > { %v4636_v29 = vadd.f32 %v4635_v4, %v4587_v28 }
 0xb7e   : > { %v4490_v63 = vpop.f32.mrf.mxu3 }
 0xb7f   : > { %v9096_v47 = vadd.f32 %v4636_v29, %v8667_v33  ;;  %v4491_v44 = vadd.f32 %v4490_v63, %v9052_v51  ;;  %v4637_v13 = vpop.f32.mrf.mxu2 }
 0xb80   : > { %v4542_v1 = vpop.f32.mrf.mxu0 }
 0xb81   : > { %4679 = vst [vmem:[#allocation2 + $0x40] sm:$0xff] %v9096_v47  ;;  %v4540_v18 = vadd.f32 %v4539_v0, %v4491_v44  ;;  %v4591_v36 = vpop.f32.mrf.mxu1 }
 0xb83   : > { %v4589_v56 = vadd.f32 %v4588_v3, %v4540_v18 }
 0xb85   : > { %v4638_v58 = vadd.f32 %v4637_v13, %v4589_v56 }
 0xb86   : > { %v4493_v37 = vpop.f32.mrf.mxu3 }
 0xb87   : > { %v9101_v26 = vadd.f32 %v4638_v58, %v8679_v57  ;;  %v4494_v42 = vadd.f32 %v4493_v37, %v9052_v51  ;;  %v4640_v38 = vpop.f32.mrf.mxu2 }
 0xb88   : > { %v4544_v41 = vpop.f32.mrf.mxu0 }
 0xb89   : > { %4680 = vst [vmem:[#allocation2 + $0x20] sm:$0xff] %v9101_v26  ;;  %v4543_v33 = vadd.f32 %v4542_v1, %v4494_v42  ;;  %v4593_v14 = vpop.f32.mrf.mxu1 }
 0xb8b   : > { %v4592_v17 = vadd.f32 %v4591_v36, %v4543_v33 }
 0xb8d   : > { %v4641_v31 = vadd.f32 %v4640_v38, %v4592_v17 }
 0xb8e   : > { %v4495_v8 = vpop.f32.mrf.mxu3 }
 0xb8f   : > { %v9106_v39 = vadd.f32 %v4641_v31, %v8691_v60  ;;  %v4496_v9 = vadd.f32 %v4495_v8, %v9052_v51  ;;  %v4642_v25 = vpop.f32.mrf.mxu2 }
 0xb90   : > { %v4547_v35 = vpop.f32.mrf.mxu0 }
 0xb91   : > { %4681 = vst [vmem:[#allocation2 + $0x10] sm:$0xff] %v9106_v39  ;;  %v4545_v57 = vadd.f32 %v4544_v41, %v4496_v9  ;;  %v4596_v62 = vpop.f32.mrf.mxu1 }
 0xb93   : > { %v4594_v22 = vadd.f32 %v4593_v14, %v4545_v57 }
 0xb95   : > { %v4643_v21 = vadd.f32 %v4642_v25, %v4594_v22 }
 0xb96   : > { %v4498_v11 = vpop.f32.mrf.mxu3 }
 0xb97   : > { %v9111_v16 = vadd.f32 %v4643_v21, %v8703_v2  ;;  %v4499_v7 = vadd.f32 %v4498_v11, %v9052_v51  ;;  %v4645_v5 = vpop.f32.mrf.mxu2 }
 0xb98   : > { %v4549_v24 = vpop.f32.mrf.mxu0 }
 0xb99   : > { %4682 = vst [vmem:[#allocation2 + $0x38] sm:$0xff] %v9111_v16  ;;  %v4548_v60 = vadd.f32 %v4547_v35, %v4499_v7  ;;  %v4598_v30 = vpop.f32.mrf.mxu1 }
 0xb9b   : > { %v4597_v10 = vadd.f32 %v4596_v62, %v4548_v60 }
 0xb9d   : > { %v4646_v52 = vadd.f32 %v4645_v5, %v4597_v10 }
 0xb9e   : > { %v4500_v45 = vpop.f32.mrf.mxu3 }
 0xb9f   : > { %v4667_v23 = vadd.f32 %v4646_v52, %v8715_v50  ;;  %v4501_v49 = vadd.f32 %v4500_v45, %v9052_v51  ;;  %v4647_v12 = vpop.f32.mrf.mxu2 }
 0xba1   : > { %4683 = vst [vmem:[#allocation2 + $0x60] sm:$0xff] %v4667_v23  ;;  %v4550_v48 = vadd.f32 %v4549_v24, %v4501_v49 }
 0xba3   : > { %v4599_v2 = vadd.f32 %v4598_v30, %v4550_v48 }
 0xba5   : > { %v4648_v53 = vadd.f32 %v4647_v12, %v4599_v2 }
 0xba7   : > { %v4668_v61 = vadd.f32 %v4648_v53, %v8721_v34 }
 0xba9   : > { %4684 = vst [vmem:[#allocation2 + $0x70] sm:$0xff] %v4668_v61 }
 0xbac   : > { %v4552_v15 = vpop.f32.mrf.mxu0 }
 0xbad   : > { %v4601_v59 = vpop.f32.mrf.mxu1 }
 0xbb4   : > { %v4554_v18 = vpop.f32.mrf.mxu0 }
 0xbb5   : > { %v4603_v1 = vpop.f32.mrf.mxu1 }
 0xbb8   : > { %v4503_v4 = vpop.f32.mrf.mxu3 }
 0xbb9   : > { %v4504_v0 = vadd.f32 %v4503_v4, %v9052_v51  ;;  %v4650_v28 = vpop.f32.mrf.mxu2 }
 0xbbb   : > { %v4553_v3 = vadd.f32 %v4552_v15, %v4504_v0 }
 0xbbd   : > { %v4602_v50 = vadd.f32 %v4601_v59, %v4553_v3 }
 0xbbf   : > { %v4651_v29 = vadd.f32 %v4650_v28, %v4602_v50 }
 0xbc0   : > { %v4505_v63 = vpop.f32.mrf.mxu3 }
 0xbc1   : > { %v9120_v44 = vadd.f32 %v4651_v29, %v8725_v46  ;;  %v4506_v13 = vadd.f32 %v4505_v63, %v9052_v51  ;;  %v4652_v36 = vpop.f32.mrf.mxu2 }
 0xbc3   : > { %4685 = vst [vmem:[#allocation2 + $0x78] sm:$0xff] %v9120_v44  ;;  %v4555_v34 = vadd.f32 %v4554_v18, %v4506_v13 }
 0xbc5   : > { %v4604_v56 = vadd.f32 %v4603_v1, %v4555_v34 }
 0xbc7   : > { %v4653_v58 = vadd.f32 %v4652_v36, %v4604_v56  ;;  %4690 = sbr.rel (%p5819_p1) target bundleno = 3472 (0xd90), region = 72 }
 0xbc9   : > { %v9125_v37 = vadd.f32 %v4653_v58, %v8821_v32 }
 0xbcb   : > { %4686 = vst [vmem:[#allocation2 + $0x28] sm:$0xff] %v9125_v37 }
 0xbcc   : > { %4693 = vadd.xlane.f32.xlu2 %v9056_v43  ;;  %4717 = vadd.xlane.f32.xlu1 %v4667_v23  ;;  %v9848_v51 = vld [vmem:[#allocation18_spill] sm:$0xff] }
 0xbcd   : > { %4709 = vadd.xlane.f32.xlu0 %v9096_v47 }
 0xbd4   : > { %4695 = vadd.xlane.f32.xlu2 %v9061_v19  ;;  %4719 = vadd.xlane.f32.xlu1 %v4668_v61 }
 0xbd5   : > { %4711 = vadd.xlane.f32.xlu0 %v9101_v26 }
 0xbdc   : > { %4713 = vadd.xlane.f32.xlu2 %v9106_v39  ;;  %4703 = vadd.xlane.f32.xlu1 %v9081_v54 }
 0xbdd   : > { %4701 = vadd.xlane.f32.xlu0 %v9076_v40 }
 0xbe4   : > { %4723 = vadd.xlane.f32.xlu2 %v9125_v37  ;;  %4721 = vadd.xlane.f32.xlu1 %v9120_v44 }
 0xbe5   : > { %4715 = vadd.xlane.f32.xlu0 %v9111_v16 }
 0xbec   : > { %4705 = vadd.xlane.f32.xlu2 %v9086_v6  ;;  %4699 = vadd.xlane.f32.xlu1 %v9071_v55 }
 0xbed   : > { %4697 = vadd.xlane.f32.xlu0 %v9066_v27 }
 0xbf5   : > { %4707 = vadd.xlane.f32.xlu0 %v9091_v20 }
 0xc3f   : > { %v4694_v46 = vpop.xlane.xlu2 %4693  ;;  %v4718_v32 = vpop.xlane.xlu1 %4717 }
 0xc40   : > { %v4737_v42 = vmul.f32 %v4718_v32, %v9848_v51  ;;  %v4710_v38 = vpop.xlane.xlu0 %4709  ;;  %v4725_v60 = vmul.f32 %v4694_v46, %v9848_v51 }
 0xc41   : > { %v4733_v33 = vmul.f32 %v4710_v38, %v9848_v51  ;;  %v5964_v38 = vld [vmem:[%s9734_s9 + $0x38] sm:$0xff] }
 0xc42   : > { %v9145_v17 = vsub.f32 %v4667_v23, %v4737_v42  ;;  %v9174_v45 = vsub.f32 %v9056_v43, %v4725_v60  ;;  %5991 = vmatpush.bf16.msra.mxu2 %v5964_v38  ;;  %5992 = vmatpush.bf16.msra.mxu3 %v5964_v38 }
 0xc43   : > { %v9148_v41 = vsub.f32 %v9096_v47, %v4733_v33  ;;  %5127 = vmatpush.bf16.msra.mxu0 %v5964_v38  ;;  %5990 = vmatpush.bf16.msra.mxu1 %v5964_v38  ;;  %v5961_v33 = vld [vmem:[%s9734_s9 + $0x20] sm:$0xff] }
 0xc44   : > { %v4769_v31 = vmul.f32 %v9145_v17, %v9145_v17  ;;  %v4757_v2 = vmul.f32 %v9174_v45, %v9174_v45 }
 0xc45   : > { %v4765_v14 = vmul.f32 %v9148_v41, %v9148_v41 }
 0xc46   : > { %4797 = vadd.xlane.f32.xlu0 %v4769_v31  ;;  %v5960_v31 = vld [vmem:[%s9734_s9 + $0x18] sm:$0xff] }
 0xc47   : > { %4789 = vadd.xlane.f32.xlu1 %v4765_v14  ;;  %v4696_v8 = vpop.xlane.xlu2 %4695  ;;  %v4720_v9 = vpop.xlane.xlu1 %4719  ;;  %v5959_v14 = vld [vmem:[%s9734_s9 + $0x10] sm:$0xff] }
 0xc48   : > { %v4726_v25 = vmul.f32 %v4696_v8, %v9848_v51  ;;  %v4738_v57 = vmul.f32 %v4720_v9, %v9848_v51  ;;  %v4712_v22 = vpop.xlane.xlu0 %4711 }
 0xc49   : > { %v4734_v21 = vmul.f32 %v4712_v22, %v9848_v51 }
 0xc4a   : > { %v9158_v47 = vsub.f32 %v9061_v19, %v4726_v25  ;;  %v9160_v35 = vsub.f32 %v4668_v61, %v4738_v57 }
 0xc4b   : > { %v9163_v11 = vsub.f32 %v9101_v26, %v4734_v21  ;;  %v5958_v21 = vld [vmem:[%s9734_s9 + $0x8] sm:$0xff] }
 0xc4c   : > { %v4758_v7 = vmul.f32 %v9158_v47, %v9158_v47  ;;  %v4770_v62 = vmul.f32 %v9160_v35, %v9160_v35 }
 0xc4d   : > { %v4766_v5 = vmul.f32 %v9163_v11, %v9163_v11 }
 0xc4e   : > { %4775 = vadd.xlane.f32.xlu0 %v4758_v7 }
 0xc4f   : > { %4799 = vadd.xlane.f32.xlu1 %v4770_v62  ;;  %4791 = vadd.xlane.f32.xlu2 %v4766_v5  ;;  %v4714_v19 = vpop.xlane.xlu2 %4713  ;;  %v4704_v10 = vpop.xlane.xlu1 %4703  ;;  %v5957_v62 = vld [vmem:[%s9734_s9] sm:$0xff] }
 0xc50   : > { %v4735_v52 = vmul.f32 %v4714_v19, %v9848_v51  ;;  %v4702_v26 = vpop.xlane.xlu0 %4701  ;;  %v4730_v48 = vmul.f32 %v4704_v10, %v9848_v51 }
 0xc51   : > { %v4729_v23 = vmul.f32 %v4702_v26, %v9848_v51 }
 0xc52   : > { %v9178_v49 = vsub.f32 %v9106_v39, %v4735_v52  ;;  %v9191_v39 = vsub.f32 %v9081_v54, %v4730_v48 }
 0xc53   : > { %v9181_v24 = vsub.f32 %v9076_v40, %v4729_v23 }
 0xc54   : > { %v4767_v30 = vmul.f32 %v9178_v49, %v9178_v49  ;;  %v4762_v59 = vmul.f32 %v9191_v39, %v9191_v39 }
 0xc55   : > { %v4761_v43 = vmul.f32 %v9181_v24, %v9181_v24 }
 0xc56   : > { %4793 = vadd.xlane.f32.xlu0 %v4767_v30 }
 0xc57   : > { %4773 = vadd.xlane.f32.xlu2 %v4757_v2  ;;  %4781 = vadd.xlane.f32.xlu1 %v4761_v43  ;;  %v4724_v12 = vpop.xlane.xlu2 %4723  ;;  %v4722_v40 = vpop.xlane.xlu1 %4721 }
 0xc58   : > { %v4740_v53 = vmul.f32 %v4724_v12, %v9848_v51  ;;  %v4716_v61 = vpop.xlane.xlu0 %4715  ;;  %v4739_v3 = vmul.f32 %v4722_v40, %v9848_v51 }
 0xc59   : > { %v4736_v15 = vmul.f32 %v4716_v61, %v9848_v51 }
 0xc5a   : > { %v9196_v4 = vsub.f32 %v9125_v37, %v4740_v53  ;;  %v9209_v29 = vsub.f32 %v9120_v44, %v4739_v3 }
 0xc5b   : > { %v9199_v0 = vsub.f32 %v9111_v16, %v4736_v15 }
 0xc5c   : > { %v4772_v54 = vmul.f32 %v9196_v4, %v9196_v4  ;;  %v4771_v56 = vmul.f32 %v9209_v29, %v9209_v29 }
 0xc5d   : > { %v4768_v28 = vmul.f32 %v9199_v0, %v9199_v0 }
 0xc5e   : > { %4803 = vadd.xlane.f32.xlu0 %v4772_v54 }
 0xc5f   : > { %4783 = vadd.xlane.f32.xlu2 %v4762_v59  ;;  %4795 = vadd.xlane.f32.xlu1 %v4768_v28  ;;  %v4706_v50 = vpop.xlane.xlu2 %4705  ;;  %v4700_v13 = vpop.xlane.xlu1 %4699 }
 0xc60   : > { %v4731_v16 = vmul.f32 %v4706_v50, %v9848_v51  ;;  %v4698_v63 = vpop.xlane.xlu0 %4697  ;;  %v4728_v36 = vmul.f32 %v4700_v13, %v9848_v51 }
 0xc61   : > { %v4727_v18 = vmul.f32 %v4698_v63, %v9848_v51 }
 0xc62   : > { %v9214_v34 = vsub.f32 %v9086_v6, %v4731_v16  ;;  %v9227_v6 = vsub.f32 %v9071_v55, %v4728_v36  ;;  %v5963_v55 = vld [vmem:[%s9734_s9 + $0x30] sm:$0xff] }
 0xc63   : > { %v9217_v1 = vsub.f32 %v9066_v27, %v4727_v18  ;;  %5994 = vmatpush.bf16.msra.mxu2 %v5963_v55  ;;  %5995 = vmatpush.bf16.msra.mxu3 %v5963_v55 }
 0xc64   : > { %v4763_v44 = vmul.f32 %v9214_v34, %v9214_v34  ;;  %v4760_v32 = vmul.f32 %v9227_v6, %v9227_v6  ;;  %5128 = vmatpush.bf16.msra.mxu0 %v5963_v55  ;;  %5993 = vmatpush.bf16.msra.mxu1 %v5963_v55 }
 0xc65   : > { %v4759_v58 = vmul.f32 %v9217_v1, %v9217_v1 }
 0xc66   : > { %4785 = vadd.xlane.f32.xlu0 %v4763_v44 }
 0xc67   : > { %4801 = vadd.xlane.f32.xlu2 %v4771_v56  ;;  %4777 = vadd.xlane.f32.xlu1 %v4759_v58 }
 0xc68   : > { %v4708_v37 = vpop.xlane.xlu0 %4707 }
 0xc69   : > { %v4732_v27 = vmul.f32 %v4708_v37, %v9848_v51 }
 0xc6b   : > { %v9231_v46 = vsub.f32 %v9091_v20, %v4732_v27  ;;  %v5962_v20 = vld [vmem:[%s9734_s9 + $0x28] sm:$0xff] }
 0xc6c   : > { %5997 = vmatpush.bf16.msra.mxu2 %v5962_v20  ;;  %5998 = vmatpush.bf16.msra.mxu3 %v5962_v20 }
 0xc6d   : > { %v4764_v42 = vmul.f32 %v9231_v46, %v9231_v46  ;;  %5129 = vmatpush.bf16.msra.mxu0 %v5962_v20  ;;  %5996 = vmatpush.bf16.msra.mxu1 %v5962_v20 }
 0xc6f   : > { %4779 = vadd.xlane.f32.xlu2 %v4760_v32  ;;  %4787 = vadd.xlane.f32.xlu1 %v4764_v42 }
 0xc70   : > { %6000 = vmatpush.bf16.msra.mxu2 %v5961_v33  ;;  %6001 = vmatpush.bf16.msra.mxu3 %v5961_v33 }
 0xc71   : > { %5130 = vmatpush.bf16.msra.mxu0 %v5961_v33  ;;  %5999 = vmatpush.bf16.msra.mxu1 %v5961_v33 }
 0xc74   : > { %6003 = vmatpush.bf16.msra.mxu2 %v5960_v31  ;;  %6004 = vmatpush.bf16.msra.mxu3 %v5960_v31 }
 0xc75   : > { %5131 = vmatpush.bf16.msra.mxu0 %v5960_v31  ;;  %6002 = vmatpush.bf16.msra.mxu1 %v5960_v31 }
 0xc78   : > { %6006 = vmatpush.bf16.msra.mxu2 %v5959_v14  ;;  %6007 = vmatpush.bf16.msra.mxu3 %v5959_v14 }
 0xc79   : > { %5132 = vmatpush.bf16.msra.mxu0 %v5959_v14  ;;  %6005 = vmatpush.bf16.msra.mxu1 %v5959_v14 }
 0xc7c   : > { %6009 = vmatpush.bf16.msra.mxu2 %v5958_v21  ;;  %6010 = vmatpush.bf16.msra.mxu3 %v5958_v21 }
 0xc7d   : > { %5133 = vmatpush.bf16.msra.mxu0 %v5958_v21  ;;  %6008 = vmatpush.bf16.msra.mxu1 %v5958_v21 }
 0xc80   : > { %6012 = vmatpush.bf16.msra.mxu2 %v5957_v62  ;;  %6013 = vmatpush.bf16.msra.mxu3 %v5957_v62 }
 0xc81   : > { %5134 = vmatpush.bf16.msra.mxu0 %v5957_v62  ;;  %6011 = vmatpush.bf16.msra.mxu1 %v5957_v62 }
 0xcb9   : > { %v4798_v8 = vpop.xlane.xlu0 %4797 }
 0xcba   : > { %v4790_v9 = vpop.xlane.xlu1 %4789  ;;  %v4817_v25 = vmul.f32 %v4798_v8, %v9848_v51 }
 0xcbb   : > { %v4813_v57 = vmul.f32 %v4790_v9, %v9848_v51 }
 0xcbc   : > { %v9257_v22 = vadd.f32 1e-05, %v4817_v25 }
 0xcbd   : > { %v9262_v7 = vadd.f32 1e-05, %v4813_v57 }
 0xcbe   : > { %6435 = vrsqrt.f32 %v9257_v22  ;;  %vm4963_vm6 = vweird.f32 %v9257_v22 }
 0xcbf   : > { %6437 = vrsqrt.f32 %v9262_v7  ;;  %vm4923_vm1 = vweird.f32 %v9262_v7 }
 0xcc1   : > { %v4776_v60 = vpop.xlane.xlu0 %4775 }
 0xcc2   : > { %v4800_v5 = vpop.xlane.xlu1 %4799  ;;  %v4792_v19 = vpop.xlane.xlu2 %4791  ;;  %v4806_v10 = vmul.f32 %v4776_v60, %v9848_v51 }
 0xcc3   : > { %v4818_v52 = vmul.f32 %v4800_v5, %v9848_v51  ;;  %v4814_v26 = vmul.f32 %v4792_v19, %v9848_v51 }
 0xcc4   : > { %v9272_v23 = vpop.eup %6435  ;;  %v9274_v48 = vadd.f32 1e-05, %v4806_v10 }
 0xcc5   : > { %v9276_v30 = vpop.eup %6437  ;;  %v4958_v2 = vmul.f32 %v9272_v23, %v9257_v22  ;;  %v9280_v43 = vadd.f32 1e-05, %v4818_v52  ;;  %v9282_v12 = vadd.f32 1e-05, %v4814_v26  ;;  %vm4964_vm8 = vweird.f32 %v9272_v23 }
 0xcc6   : > { %v4918_v40 = vmul.f32 %v9276_v30, %v9262_v7  ;;  %6439 = vrsqrt.f32 %v9274_v48  ;;  %vm4924_vm7 = vweird.f32 %v9276_v30  ;;  %vm9345_vm10 = vmor %vm4963_vm6, %vm4964_vm8  ;;  %vm4853_vm0 = vweird.f32 %v9274_v48 }
 0xcc7   : > { %6441 = vrsqrt.f32 %v9280_v43  ;;  %v4959_v53 = vmul.f32 %v9272_v23, %v4958_v2  ;;  %vm9357_vm11 = vmor %vm4923_vm1, %vm4924_vm7  ;;  %vm4933_vm12 = vweird.f32 %v9282_v12  ;;  %vm4973_vm13 = vweird.f32 %v9280_v43 }
 0xcc8   : > { %6443 = vrsqrt.f32 %v9282_v12  ;;  %v4919_v61 = vmul.f32 %v9276_v30, %v4918_v40 }
 0xcc9   : > { %v4794_v15 = vpop.xlane.xlu0 %4793  ;;  %v4960_v63 = vmul.f32 0.5, %v4959_v53 }
 0xcca   : > { %v4774_v59 = vpop.xlane.xlu2 %4773  ;;  %v4782_v3 = vpop.xlane.xlu1 %4781  ;;  %v4815_v54 = vmul.f32 %v4794_v15, %v9848_v51  ;;  %v4920_v18 = vmul.f32 0.5, %v4919_v61 }
 0xccb   : > { %v4805_v28 = vmul.f32 %v4774_v59, %v9848_v51  ;;  %v4809_v50 = vmul.f32 %v4782_v3, %v9848_v51  ;;  %v4961_v42 = vsub.f32 1.5, %v4960_v63 }
 0xccc   : > { %v9294_v16 = vpop.eup %6439  ;;  %v9300_v36 = vadd.f32 1e-05, %v4815_v54  ;;  %v4921_v38 = vsub.f32 1.5, %v4920_v18 }
 0xccd   : > { %v9296_v13 = vpop.eup %6441  ;;  %v9298_v56 = vadd.f32 1e-05, %v4805_v28  ;;  %v4848_v58 = vmul.f32 %v9294_v16, %v9274_v48  ;;  %v9306_v37 = vadd.f32 1e-05, %v4809_v50  ;;  %v4962_v62 = vmul.f32 %v9272_v23, %v4961_v42 }
 0xcce   : > { %v9302_v44 = vpop.eup %6443  ;;  %v4968_v27 = vmul.f32 %v9296_v13, %v9280_v43  ;;  %v4922_v19 = vmul.f32 %v9276_v30, %v4921_v38  ;;  %vm4974_vm15 = vweird.f32 %v9296_v13  ;;  %vm4854_vm2 = vweird.f32 %v9294_v16 }
 0xccf   : > { %v4928_v32 = vmul.f32 %v9302_v44, %v9282_v12  ;;  %6445 = vrsqrt.f32 %v9298_v56  ;;  %v4849_v33 = vmul.f32 %v9294_v16, %v4848_v58  ;;  %vm4934_vm9 = vweird.f32 %v9302_v44  ;;  %vm9440_vm1 = vmor %vm4973_vm13, %vm4974_vm15 }
 0xcd0   : > { %6447 = vrsqrt.f32 %v9306_v37  ;;  %v4969_v9 = vmul.f32 %v9296_v13, %v4968_v27  ;;  %v4926_v7 = vsel %vm9357_vm11, %v9276_v30, %v4922_v19  ;;  %v4966_v12 = vsel %vm9345_vm10, %v9272_v23, %v4962_v62  ;;  %vm9376_vm14 = vmor %vm4933_vm12, %vm4934_vm9 }
 0xcd1   : > { %v4929_v55 = vmul.f32 %v9302_v44, %v4928_v32  ;;  %6449 = vrsqrt.f32 %v9300_v36  ;;  %v4804_v20 = vpop.xlane.xlu0 %4803  ;;  %v4850_v40 = vmul.f32 0.5, %v4849_v33  ;;  %vm4843_vm5 = vweird.f32 %v9298_v56  ;;  %vm9491_vm15 = vmor %vm4853_vm0, %vm4854_vm2 }
 0xcd2   : > { %v4784_v31 = vpop.xlane.xlu2 %4783  ;;  %v4796_v14 = vpop.xlane.xlu1 %4795  ;;  %v4820_v8 = vmul.f32 %v4804_v20, %v9848_v51  ;;  %v4970_v59 = vmul.f32 0.5, %v4969_v9  ;;  %v5005_v9 = vmul.f32 %v4926_v7, %v9148_v41  ;;  %v9434_v7 = vld [vmem:[%s9733_s8] ss:$0 sm:$0xff]  ;;  %vm4883_vm6 = vweird.f32 %v9306_v37 }
 0xcd3   : > { %v4930_v25 = vmul.f32 0.5, %v4929_v55  ;;  %v4810_v57 = vmul.f32 %v4784_v31, %v9848_v51  ;;  %v4816_v21 = vmul.f32 %v4796_v14, %v9848_v51  ;;  %v4851_v27 = vsub.f32 1.5, %v4850_v40 }
 0xcd4   : > { %v9326_v60 = vadd.f32 1e-05, %v4820_v8  ;;  %v4971_v33 = vsub.f32 1.5, %v4970_v59  ;;  %vm4943_vm9 = vweird.f32 %v9300_v36 }
 0xcd5   : > { %v9328_v5 = vpop.eup %6445  ;;  %v4931_v10 = vsub.f32 1.5, %v4930_v25  ;;  %v9331_v52 = vadd.f32 1e-05, %v4810_v57  ;;  %v9333_v26 = vadd.f32 1e-05, %v4816_v21  ;;  %v5009_v57 = vmul.f32 %v4966_v12, %v9145_v17 }
 0xcd6   : > { %v9335_v2 = vpop.eup %6447  ;;  %v4838_v53 = vmul.f32 %v9328_v5, %v9298_v56  ;;  %6451 = vrsqrt.f32 %v9326_v60  ;;  %v9394_v25 = vld [vmem:[%s9732_s7] ss:$0 sm:$0xff]  ;;  %v9406_v40 = vmul.f32 %v9294_v16, %v4851_v27  ;;  %v4972_v59 = vmul.f32 %v9296_v13, %v4971_v33 }
 0xcd7   : > { %v9341_v61 = vpop.eup %6449  ;;  %v4932_v3 = vmul.f32 %v9302_v44, %v4931_v10  ;;  %v4878_v54 = vmul.f32 %v9335_v2, %v9306_v37  ;;  %6453 = vrsqrt.f32 %v9331_v52  ;;  %vm4844_vm3 = vweird.f32 %v9328_v5 }
 0xcd8   : > { %v4839_v22 = vmul.f32 %v9328_v5, %v4838_v53  ;;  %v4938_v50 = vmul.f32 %v9341_v61, %v9300_v36  ;;  %6455 = vrsqrt.f32 %v9333_v26  ;;  %vm4884_vm4 = vweird.f32 %v9335_v2 }
 0xcd9   : > { %v4879_v63 = vmul.f32 %v9335_v2, %v4878_v54  ;;  %v4786_v18 = vpop.xlane.xlu0 %4785  ;;  %v4936_v23 = vsel %vm9376_vm14, %v9302_v44, %v4932_v3  ;;  %vm4893_vm7 = vweird.f32 %v9331_v52  ;;  %v4976_v43 = vsel %vm9440_vm1, %v9296_v13, %v4972_v59  ;;  %vm9505_vm14 = vmor %vm4843_vm5, %vm4844_vm3 }
 0xcda   : > { %v4840_v32 = vmul.f32 0.5, %v4839_v22  ;;  %v4939_v42 = vmul.f32 %v9341_v61, %v4938_v50  ;;  %v4802_v38 = vpop.xlane.xlu2 %4801  ;;  %v4778_v55 = vpop.xlane.xlu1 %4777  ;;  %v4811_v20 = vmul.f32 %v4786_v18, %v9848_v51  ;;  %v5006_v53 = vmul.f32 %v4936_v23, %v9163_v11  ;;  %vm9518_vm2 = vmor %vm4883_vm6, %vm4884_vm4 }
 0xcdb   : > { %v4819_v30 = vmul.f32 %v4802_v38, %v9848_v51  ;;  %v4880_v14 = vmul.f32 0.5, %v4879_v63  ;;  %v4807_v8 = vmul.f32 %v4778_v55, %v9848_v51  ;;  %v5024_v11 = vmul.f32 %v9394_v25, %v5005_v9 }
 0xcdc   : > { %v9387_v31 = vpop.eup %6451  ;;  %v4841_v62 = vsub.f32 1.5, %v4840_v32  ;;  %v9403_v10 = vadd.f32 1e-05, %v4811_v20  ;;  %v4940_v41 = vmul.f32 0.5, %v4939_v42  ;;  %v5025_v42 = vmul.f32 %v9394_v25, %v5006_v53 }
 0xcdd   : > { %v9397_v21 = vpop.eup %6453  ;;  %v4988_v44 = vmul.f32 %v9387_v31, %v9326_v60  ;;  %v9401_v19 = vadd.f32 1e-05, %v4819_v30  ;;  %v4881_v54 = vsub.f32 1.5, %v4880_v14  ;;  %v9428_v18 = vadd.f32 1e-05, %v4807_v8 }
 0xcde   : > { %v4888_v17 = vmul.f32 %v9397_v21, %v9331_v52  ;;  %v9413_v15 = vpop.eup %6455  ;;  %v9425_v50 = vmul.f32 %v9328_v5, %v4841_v62  ;;  %v4941_v58 = vsub.f32 1.5, %v4940_v41  ;;  %vm4894_vm8 = vweird.f32 %v9397_v21 }
 0xcdf   : > { %v4989_v3 = vmul.f32 %v9387_v31, %v4988_v44  ;;  %6457 = vrsqrt.f32 %v9401_v19  ;;  %v4948_v22 = vmul.f32 %v9413_v15, %v9333_v26  ;;  %vm4944_vm10 = vweird.f32 %v9341_v61  ;;  %vm9533_vm4 = vmor %vm4893_vm7, %vm4894_vm8 }
 0xce0   : > { %v4889_v28 = vmul.f32 %v9397_v21, %v4888_v17  ;;  %6459 = vrsqrt.f32 %v9403_v10  ;;  %v5044_v23 = vadd.f32 %v9434_v7, %v5025_v42  ;;  %v5010_v14 = vmul.f32 %v4976_v43, %v9160_v35  ;;  %vm9559_vm8 = vmor %vm4943_vm9, %vm4944_vm10 }
 0xce1   : > { %v4990_v63 = vmul.f32 0.5, %v4989_v3  ;;  %v4949_v32 = vmul.f32 %v9413_v15, %v4948_v22  ;;  %6461 = vrsqrt.f32 %v9428_v18  ;;  %v5043_v9 = vadd.f32 %v9434_v7, %v5024_v11 }
 0xce2   : > { %v4890_v27 = vmul.f32 0.5, %v4889_v28  ;;  %v4780_v38 = vpop.xlane.xlu2 %4779  ;;  %v4788_v55 = vpop.xlane.xlu1 %4787  ;;  %v5028_v62 = vmul.f32 %v9394_v25, %v5009_v57  ;;  %v4882_v41 = vmul.f32 %v9335_v2, %v4881_v54  ;;  %v9465_v17 = vmul.f32 %v9341_v61, %v4941_v58 }
 0xce3   : > { %v4991_v20 = vsub.f32 1.5, %v4990_v63  ;;  %v4950_v30 = vmul.f32 0.5, %v4949_v32  ;;  %v4808_v44 = vmul.f32 %v4780_v38, %v9848_v51  ;;  %v4812_v13 = vmul.f32 %v4788_v55, %v9848_v51 }
 0xce4   : > { %v4891_v33 = vsub.f32 1.5, %v4890_v27  ;;  %vm4993_vm11 = vweird.f32 %v9326_v60  ;;  %vm4994_vm12 = vweird.f32 %v9387_v31  ;;  %vm4903_vm13 = vweird.f32 %v9403_v10 }
 0xce5   : > { %v9457_v8 = vpop.eup %6457  ;;  %v4951_v53 = vsub.f32 1.5, %v4950_v30  ;;  %v5055_v57 = vpack.c.bf16 %v5044_v23, %v5043_v9  ;;  %v5029_v51 = vmul.f32 %v9394_v25, %v5010_v14  ;;  %v9475_v3 = vadd.f32 1e-05, %v4808_v44  ;;  %vm9579_vm9 = vmor %vm4993_vm11, %vm4994_vm12 }
 0xce6   : > { %v4978_v35 = vmul.f32 %v9457_v8, %v9401_v19  ;;  %v9471_v59 = vpop.eup %6459  ;;  %v4892_v54 = vmul.f32 %v9397_v21, %v4891_v33  ;;  %v9480_v28 = vmul.f32 %v9387_v31, %v4991_v20  ;;  %vm4984_vm1 = vweird.f32 %v9457_v8 }
 0xce7   : > { %v4898_v11 = vmul.f32 %v9471_v59, %v9403_v10  ;;  %v9485_v63 = vpop.eup %6461  ;;  %5155 = vmatmul.bf16.vlgmr.msra.gmra.mxu2 %v5055_v57  ;;  %v5047_v58 = vadd.f32 %v9434_v7, %v5028_v62  ;;  %v5048_v27 = vadd.f32 %v9434_v7, %v5029_v51  ;;  %6463 = vrsqrt.f32 %v9475_v3 }
 0xce8   : > { %v4979_v22 = vmul.f32 %v9457_v8, %v4978_v35  ;;  %v9499_v32 = vadd.f32 1e-05, %v4812_v13  ;;  %v4952_v42 = vmul.f32 %v9413_v15, %v4951_v53  ;;  %vm4953_vm0 = vweird.f32 %v9333_v26 }
 0xce9   : > { %v4858_v55 = vmul.f32 %v9485_v63, %v9428_v18  ;;  %v4899_v20 = vmul.f32 %v9471_v59, %v4898_v11  ;;  %vm4983_vm3 = vweird.f32 %v9401_v19  ;;  %vm4904_vm5 = vweird.f32 %v9471_v59 }
 0xcea   : > { %v4980_v38 = vmul.f32 0.5, %v4979_v22  ;;  %v5057_v43 = vpack.c.bf16 %v5048_v27, %v5047_v58  ;;  %6465 = vrsqrt.f32 %v9499_v32  ;;  %v4846_v33 = vsel %vm9505_vm14, %v9328_v5, %v9425_v50  ;;  %vm9592_vm10 = vmor %vm4903_vm13, %vm4904_vm5 }
 0xceb   : > { %v4859_v23 = vmul.f32 %v9485_v63, %v4858_v55  ;;  %v4900_v14 = vmul.f32 0.5, %v4899_v20  ;;  %v4856_v9 = vsel %vm9491_vm15, %v9294_v16, %v9406_v40  ;;  %vm4863_vm6 = vweird.f32 %v9428_v18  ;;  %vm4985_vm13 = vmor %vm4983_vm3, %vm4984_vm1 }
 0xcec   : > { %v4981_v30 = vsub.f32 1.5, %v4980_v38  ;;  %5165 = vmatmul.bf16.vlgmr.msra.gmra.mxu3 %v5057_v43  ;;  %v4997_v5 = vmul.f32 %v4846_v33, %v9174_v45  ;;  %v4998_v52 = vmul.f32 %v4856_v9, %v9158_v47  ;;  %v4886_v50 = vsel %vm9518_vm2, %v9335_v2, %v4882_v41 }
 0xced   : > { %v4896_v62 = vsel %vm9533_vm4, %v9397_v21, %v4892_v54  ;;  %v4860_v44 = vmul.f32 0.5, %v4859_v23  ;;  %vm4864_vm7 = vweird.f32 %v9485_v63  ;;  %v4901_v13 = vsub.f32 1.5, %v4900_v14  ;;  %v9553_v40 = vpop.eup %6463 }
 0xcee   : > { %v5001_v16 = vmul.f32 %v4886_v50, %v9181_v24  ;;  %v4982_v45 = vmul.f32 %v9457_v8, %v4981_v30  ;;  %v5016_v2 = vmul.f32 %v9394_v25, %v4997_v5  ;;  %v5017_v21 = vmul.f32 %v9394_v25, %v4998_v52  ;;  %vm9624_vm1 = vmor %vm4863_vm6, %vm4864_vm7 }
 0xcef   : > { %v5002_v41 = vmul.f32 %v4896_v62, %v9191_v39  ;;  %v4861_v53 = vsub.f32 1.5, %v4860_v44  ;;  %v4902_v24 = vmul.f32 %v9471_v59, %v4901_v13  ;;  %v4868_v35 = vmul.f32 %v9553_v40, %v9475_v3 }
 0xcf0   : > { %vm4873_vm14 = vweird.f32 %v9475_v3  ;;  %v4946_v36 = vsel %vm9559_vm8, %v9341_v61, %v9465_v17  ;;  %v6466_v57 = vpop.eup %6465  ;;  %v5035_v51 = vadd.f32 %v9434_v7, %v5016_v2  ;;  %v5036_v54 = vadd.f32 %v9434_v7, %v5017_v21 }
 0xcf1   : > { %v5020_v22 = vmul.f32 %v9394_v25, %v5001_v16  ;;  %v5021_v11 = vmul.f32 %v9394_v25, %v5002_v41  ;;  %v4862_v12 = vmul.f32 %v9485_v63, %v4861_v53  ;;  %v4869_v61 = vmul.f32 %v9553_v40, %v4868_v35 }
 0xcf2   : > { %vm4874_vm11 = vweird.f32 %v9553_v40  ;;  %v4908_v17 = vmul.f32 %v6466_v57, %v9499_v32  ;;  %vm9871_vm12 = vweird.f32 %v9413_v15  ;;  %v4906_v58 = vsel %vm9592_vm10, %v9471_v59, %v4902_v24 }
 0xcf3   : > { %vm4955_vm15 = vmor %vm4953_vm0, %vm9871_vm12  ;;  %v5051_v10 = vpack.c.bf16 %v5036_v54, %v5035_v51  ;;  %v5039_v27 = vadd.f32 %v9434_v7, %v5020_v22  ;;  %v5040_v48 = vadd.f32 %v9434_v7, %v5021_v11  ;;  %v4870_v38 = vmul.f32 0.5, %v4869_v61 }
 0xcf4   : > { %v4909_v55 = vmul.f32 %v6466_v57, %v4908_v17  ;;  %v4956_v20 = vsel %vm4955_vm15, %v9413_v15, %v4952_v42  ;;  %v5007_v26 = vmul.f32 %v4946_v36, %v9178_v49  ;;  %v4986_v43 = vsel %vm4985_vm13, %v9457_v8, %v4982_v45  ;;  %vm4875_vm2 = vmor %vm4873_vm14, %vm4874_vm11 }
 0xcf5   : > { %5135 = vmatmul.bf16.vlgmr.msra.gmra.mxu0 %v5051_v10  ;;  %v5053_v56 = vpack.c.bf16 %v5040_v48, %v5039_v27  ;;  %v5008_v59 = vmul.f32 %v4956_v20, %v9199_v0  ;;  %v4996_v33 = vsel %vm9579_vm9, %v9387_v31, %v9480_v28  ;;  %v4871_v49 = vsub.f32 1.5, %v4870_v38 }
 0xcf6   : > { %v4910_v15 = vmul.f32 0.5, %v4909_v55  ;;  %v5026_v42 = vmul.f32 %v9394_v25, %v5007_v26  ;;  %v5011_v0 = vmul.f32 %v4986_v43, %v9209_v29  ;;  %vm4914_vm0 = vweird.f32 %v6466_v57 }
 0xcf7   : > { %5145 = vmatmul.bf16.vlgmr.msra.gmra.mxu1 %v5053_v56  ;;  %v5027_v8 = vmul.f32 %v9394_v25, %v5008_v59  ;;  %v5012_v31 = vmul.f32 %v4996_v33, %v9196_v4  ;;  %v4866_v18 = vsel %vm9624_vm1, %v9485_v63, %v4862_v12  ;;  %v4872_v28 = vmul.f32 %v9553_v40, %v4871_v49 }
 0xcf8   : > { %v4911_v37 = vsub.f32 1.5, %v4910_v15  ;;  %v5030_v30 = vmul.f32 %v9394_v25, %v5011_v0  ;;  %v5003_v23 = vmul.f32 %v4906_v58, %v9214_v34  ;;  %v5045_v29 = vadd.f32 %v9434_v7, %v5026_v42 }
 0xcf9   : > { %v5046_v4 = vadd.f32 %v9434_v7, %v5027_v8  ;;  %v5031_v14 = vmul.f32 %v9394_v25, %v5012_v31  ;;  %v4999_v63 = vmul.f32 %v4866_v18, %v9217_v1  ;;  %v4876_v9 = vsel %vm4875_vm2, %v9553_v40, %v4872_v28 }
 0xcfa   : > { %v4912_v5 = vmul.f32 %v6466_v57, %v4911_v37  ;;  %vm4913_vm3 = vweird.f32 %v9499_v32  ;;  %v5049_v34 = vadd.f32 %v9434_v7, %v5030_v30  ;;  %v5000_v50 = vmul.f32 %v4876_v9, %v9227_v6 }
 0xcfb   : > { %vm4915_vm5 = vmor %vm4913_vm3, %vm4914_vm0  ;;  %v5056_v52 = vpack.c.bf16 %v5046_v4, %v5045_v29  ;;  %v5050_v3 = vadd.f32 %v9434_v7, %v5031_v14  ;;  %v5018_v62 = vmul.f32 %v9394_v25, %v4999_v63  ;;  %v5022_v32 = vmul.f32 %v9394_v25, %v5003_v23 }
 0xcfc   : > { %v4916_v44 = vsel %vm4915_vm5, %v6466_v57, %v4912_v5  ;;  %v5019_v1 = vmul.f32 %v9394_v25, %v5000_v50 }
 0xcfd   : > { %5160 = vmatmul.bf16.gmra.mxu2 %v5056_v52  ;;  %v5058_v13 = vpack.c.bf16 %v5050_v3, %v5049_v34  ;;  %v5004_v16 = vmul.f32 %v4916_v44, %v9231_v46  ;;  %v5037_v40 = vadd.f32 %v9434_v7, %v5018_v62  ;;  %v5041_v2 = vadd.f32 %v9434_v7, %v5022_v32  ;;  %v6434_v46 = vld [vmem:[%s9735_s10] ss:$0 sm:$0xff] }
 0xcfe   : > { %v5038_v47 = vadd.f32 %v9434_v7, %v5019_v1 }
 0xcff   : > { %5170 = vmatmul.bf16.gmra.mxu3 %v5058_v13  ;;  %v5023_v6 = vmul.f32 %v9394_v25, %v5004_v16 }
 0xd00   : > { %v5052_v45 = vpack.c.bf16 %v5038_v47, %v5037_v40 }
 0xd01   : > { %v5042_v21 = vadd.f32 %v9434_v7, %v5023_v6 }
 0xd03   : > { %v5054_v41 = vpack.c.bf16 %v5042_v21, %v5041_v2 }
 0xd05   : > { %5140 = vmatmul.bf16.gmra.mxu0 %v5052_v45 }
 0xd07   : > { %5150 = vmatmul.bf16.gmra.mxu1 %v5054_v41 }
 0xd6a   : > { %v5156_v53 = vpop.f32.mrf.mxu2 }
 0xd6b   : > { %v5157_v24 = vadd.f32 %v6434_v46, %v5156_v53 }
 0xd6d   : > { %5184 = vst [vmem:[%s6740_s15 + $0x40] sm:$0xff] %v5157_v24 }
 0xd6f   : > { %v5166_v25 = vpop.f32.mrf.mxu3 }
 0xd70   : > { %v5167_v35 = vadd.f32 %v6434_v46, %v5166_v25 }
 0xd72   : > { %v5136_v36 = vpop.f32.mrf.mxu0  ;;  %5188 = vst [vmem:[%s6740_s15 + $0x60] sm:$0xff] %v5167_v35  ;;  %v5158_v7 = vpop.f32.mrf.mxu2 }
 0xd73   : > { %v5137_v57 = vadd.f32 %v6434_v46, %v5136_v36  ;;  %v5159_v51 = vadd.f32 %v6434_v46, %v5158_v7 }
 0xd74   : > { %v5146_v39 = vpop.f32.mrf.mxu1 }
 0xd75   : > { %5176 = vst [vmem:[%s6740_s15] sm:$0xff] %v5137_v57  ;;  %v5147_v54 = vadd.f32 %v6434_v46, %v5146_v39 }
 0xd76   : > { %5185 = vst [vmem:[%s6740_s15 + $0x48] sm:$0xff] %v5159_v51 }
 0xd77   : > { %v5168_v22 = vpop.f32.mrf.mxu3  ;;  %5180 = vst [vmem:[%s6740_s15 + $0x20] sm:$0xff] %v5147_v54 }
 0xd78   : > { %v5169_v11 = vadd.f32 %v6434_v46, %v5168_v22 }
 0xd7a   : > { %v5138_v12 = vpop.f32.mrf.mxu0  ;;  %5189 = vst [vmem:[%s6740_s15 + $0x68] sm:$0xff] %v5169_v11 }
 0xd7b   : > { %v5139_v60 = vadd.f32 %v6434_v46, %v5138_v12 }
 0xd7c   : > { %v5148_v61 = vpop.f32.mrf.mxu1 }
 0xd7d   : > { %5177 = vst [vmem:[%s6740_s15 + $0x8] sm:$0xff] %v5139_v60  ;;  %v5149_v17 = vadd.f32 %v6434_v46, %v5148_v61 }
 0xd7f   : > { %5181 = vst [vmem:[%s6740_s15 + $0x28] sm:$0xff] %v5149_v17 }
 0xd80   : > { %v5161_v58 = vpop.f32.mrf.mxu2 }
 0xd81   : > { %v5162_v10 = vadd.f32 %v6434_v46, %v5161_v58 }
 0xd82   : > { %v5171_v27 = vpop.f32.mrf.mxu3  ;;  %v5141_v48 = vpop.f32.mrf.mxu0 }
 0xd83   : > { %5186 = vst [vmem:[%s6740_s15 + $0x50] sm:$0xff] %v5162_v10  ;;  %v5172_v38 = vadd.f32 %v6434_v46, %v5171_v27  ;;  %v5142_v55 = vadd.f32 %v6434_v46, %v5141_v48 }
 0xd84   : > { %v5151_v20 = vpop.f32.mrf.mxu1 }
 0xd85   : > { %5190 = vst [vmem:[%s6740_s15 + $0x70] sm:$0xff] %v5172_v38  ;;  %v5152_v26 = vadd.f32 %v6434_v46, %v5151_v20 }
 0xd86   : > { %5178 = vst [vmem:[%s6740_s15 + $0x10] sm:$0xff] %v5142_v55 }
 0xd87   : > { %5182 = vst [vmem:[%s6740_s15 + $0x30] sm:$0xff] %v5152_v26 }
 0xd88   : > { %v5163_v56 = vpop.f32.mrf.mxu2 }
 0xd89   : > { %v5164_v59 = vadd.f32 %v6434_v46, %v5163_v56 }
 0xd8a   : > { %v5173_v43 = vpop.f32.mrf.mxu3  ;;  %v5143_v33 = vpop.f32.mrf.mxu0 }
 0xd8b   : > { %5187 = vst [vmem:[%s6740_s15 + $0x58] sm:$0xff] %v5164_v59  ;;  %v5174_v19 = vadd.f32 %v6434_v46, %v5173_v43  ;;  %v5144_v49 = vadd.f32 %v6434_v46, %v5143_v33 }
 0xd8c   : > { %v5153_v15 = vpop.f32.mrf.mxu1 }
 0xd8d   : > { %5191 = vst [vmem:[%s6740_s15 + $0x78] sm:$0xff] %v5174_v19  ;;  %v5154_v42 = vadd.f32 %v6434_v46, %v5153_v15 }
 0xd8e   : > { %5179 = vst [vmem:[%s6740_s15 + $0x18] sm:$0xff] %v5144_v49 }
 0xd8f   : > { %5183 = vst [vmem:[%s6740_s15 + $0x38] sm:$0xff] %v5154_v42 }
 0xd90 PF: > { %s9874_s1 = sld [smem:[#allocation9_spill]]  ;;  %s5205_s25 = sshll.u32 %s6740_s15, 4  ;;  %s5206_s25 = int_to_ptr.vmem [resolvable:$true] %s5205_s25 }
 0xd91   : > { %s9875_s19 = sld [smem:[#allocation7_spill]] }
 0xd92   : > { %s9877_s26 = sld [smem:[#allocation34_spill]] }
 0xd96   : > { %s5965_s24 = sshll.u32 %s9874_s1, 7 }
 0xd97   : > { %s9878_s27 = sand.u32 1, %s9875_s19  }
 0xd98   : > { %s5204_s12 = scalar_lea.hbm %s9877_s26, %s5965_s24  ;;  %s5193_s28 = scalar_lea.sflag [#allocation4], %s9878_s27 }
 0xd99   : > { %s5207_s23 = sshll.u32 %s5204_s12, 4  ;;  %s6487_s30 = scalar_lea.hbm %s9877_s26, 256  ;;  %s5208_s23 = int_to_ptr.hbm [resolvable:$true] %s5207_s23 }
 0xd9a   : > { %s6481_s22 = sshra.s32 %s5208_s23, 4  ;;  %s6482_s22 = int_to_ptr.hbm [resolvable:$true] %s6481_s22 }
 0xd9b   : > { %s6483_s14 = scalar_lea.hbm %s6482_s22, 128  ;;  %p6488_p6 = scmp.lt.s32.totalorder %s6482_s22, %s9877_s26 }
 0xd9c   : > { %p6484_p2 = scmp.ne.s32.totalorder %s6482_s22, %s6483_s14  ;;  %p6489_p7 = scmp.lt.s32.totalorder %s6487_s30, %s6483_s14 }
 0xd9e   : > { %p6485_p4 = pnand %p6484_p2, %p6678_p3  ;;  %p6490_p8 = por %p6489_p7, %p6488_p6 }
 0xda0   : > { %p6486_p5 = pneg %p6485_p4 }
 0xda2   : > { %p6491_p10 = pnand %p6490_p8, %p6486_p5 }
 0xda4   : > { %6494 = shalt.err (!%p6491_p10)
}
 0xda5   : > { %s6567_s15 = smov 128   ;;  %s6568_s21 = smov 8  }
 0xda6   : > { %6015 = dma.vmem_to_hbm [thread:$0]  (%p6678_p3), %s5206_s25, 2048, %s5208_s23, %s5193_s28, %s6567_s15, %s6567_s15, %s6568_s21  }
 0xda7 PF: > { %s9879_s0 = sld [smem:[#allocation12_spill]] }
 0xda8   : > { %s9880_s1 = sld [smem:[#allocation6_spill]] }
 0xdad   : > { %p6021_p11 = scmp.ge.s32.totalorder %s9879_s0, 2 }
 0xdae   : > { %s5222_s24 = sand.u32 1, %s9880_s1  }
 0xdaf   : > { %p6018_p12 = pnand %p6021_p11, %p6688_p9  ;;  %s5223_s29 = scalar_lea.sflag [#allocation4], %s5222_s24 }
 0xdb1   : > { %p6019_p13 = pneg %p6018_p12 }
 0xdb3   : > { %6528 = dma.done.wait (%p6019_p13), %s5223_s29, 2048  }
 0xdb4   : > { %6530 = vsyncadd (%p6019_p13), %s5223_s29, 4294965248  ;;  %s24_s24 = sadd.s32 1, %s9879_s0   ;;  %s9882_s17 = sld [smem:[#allocation7_spill]] }
 0xdb5   : > { %p21_p0 = scmp.ge.s32.totalorder %s24_s24, 6   ;;  %s9883_s18 = sld [smem:[#allocation8_spill]] }
 0xdb6   : > { %s9884_s19 = sld [smem:[#allocation17_spill]] }
 0xdb7   : > { %s9885_s20 = sld [smem:[#allocation10_spill]]  ;;  %23 = sbr.rel (!%p21_p0) target bundleno = 9 (0x9), region = 125 }
 0xdb8   : > { %s9886_s21 = sld [smem:[#allocation11_spill]] }
 0xdb9   : > { %s9887_s22 = sld [smem:[#allocation13_spill]] }
 0xdba   : > { %s9888_s23 = sld [smem:[#allocation15_spill]] }
 0xdbc   :  { %5229 = vsyncpa [#allocation4], 1 }
 0xdbd   :  { %5231 = vsyncpa [#allocation4 + $0x1], 1 }

</bundles_post_ra>
